<compile_context>
chip_gen: v5e
topology: v5e:2x2
jax: 0.10.0
libtpu: 0.0.40
codegen_flags: <defaults>
</compile_context>

<pallas_src>
import functools

import jax
import jax.numpy as jnp
from jax.experimental import pallas as pl
from jax.experimental.pallas import tpu as pltpu

HIDDEN = 100
PAD = 128          # lane/sublane-padded hidden width (matches MXU)


# --------------------------------------------------------------------------- #
# Kernel
# --------------------------------------------------------------------------- #
def _pinn_mlp_kernel(x_ref, pb_ref, w2_ref, w3_ref, w4_ref, w5_ref, o_ref, *,
                     act_dtype):
    """Whole folded 6-layer MLP for one (1, TM) tile of sample columns.

    x_ref : (1, TM)  f32   collocation times, batch on lanes.
    pb_ref: (128, 8) f32   packed small params (see pack_params).
    w2..w5: (128,128) bf16 zero-padded, transposed, 0.25-scaled hidden weights.
    o_ref : (1, TM)  f32   lane-dense output row.
    """
    t_row = x_ref[...]                                     # (1, TM) f32
    pb = pb_ref[...]                                       # (128, 8) f32

    # Layer 1 (Linear(1,100) + folded sigmoid): outer-product FMA on the VPU.
    z1 = pb[:, 5:6] * t_row + pb[:, 0:1]                   # (128, TM) f32
    a = jnp.tanh(z1.astype(act_dtype))                     # (128, TM)

    def hidden(a, w_ref, col):
        z = jnp.dot(w_ref[...], a.astype(jnp.bfloat16),
                    preferred_element_type=jnp.float32)    # MXU bf16, f32 acc
        b = pb[:, col:col + 1].astype(act_dtype)           # (128, 1)
        return jnp.tanh(z.astype(act_dtype) + b)           # bias + EUP tanh

    a = hidden(a, w2_ref, 1)
    a = hidden(a, w3_ref, 2)
    a = hidden(a, w4_ref, 3)
    a = hidden(a, w5_ref, 4)

    # Final Linear(100,1) (folded): VPU multiply + sublane reduce -> (1, TM),
    # already lane-dense, no MXU operand and no relayout needed.
    out = jnp.sum(a * pb[:, 6:7], axis=0, keepdims=True)   # f32 (promotion)
    o_ref[...] = out + pb[0:1, 7:8]


# --------------------------------------------------------------------------- #
# Wrapper
# --------------------------------------------------------------------------- #
def _device_config():
    kind = jax.devices()[0].device_kind.lower()
    # bf16 VPU/EUP exist from v6 on; keep f32 activation math on older chips.
    act_bf16 = not any(v in kind for v in ("v2", "v3", "v4", "v5"))
    n_cores = 2 if ("v7" in kind or "7x" in kind) else 1
    return act_bf16, n_cores


def _pick_tm(N, n_cores):
    """Batch columns per block: full block on 1 TC, balanced blocks on 2 TCs.

    Block width must be a multiple of 128 lanes or equal to N (Pallas rule)."""
    cap = 2048
    if n_cores <= 1:
        return N if N <= cap else cap
    tm = -(-N // n_cores)              # ceil(N / cores)
    tm = -(-tm // 128) * 128           # round up to a lane multiple
    tm = min(tm, cap)
    return N if tm >= N else tm


@functools.partial(jax.jit, static_argnames=("tm", "act_bf16"))
def _pinn_forward_call(x_row, pb, w2, w3, w4, w5, *, tm, act_bf16):
    N = x_row.shape[1]
    act_dtype = jnp.bfloat16 if act_bf16 else jnp.float32
    kernel = functools.partial(_pinn_mlp_kernel, act_dtype=act_dtype)

    w_spec = pl.BlockSpec((PAD, PAD), lambda i: (0, 0))
    cost = pl.CostEstimate(
        flops=N * (4 * 2 * PAD * PAD + 4 * PAD),
        transcendentals=5 * N * PAD,
        bytes_accessed=2 * N * 4 + 4 * PAD * PAD * 2 + PAD * 8 * 4,
    )

    return pl.pallas_call(
        kernel,
        out_shape=jax.ShapeDtypeStruct((1, N), jnp.float32),
        grid_spec=pltpu.PrefetchScalarGridSpec(
            num_scalar_prefetch=0,
            grid=(pl.cdiv(N, tm),),
            in_specs=[
                pl.BlockSpec((1, tm), lambda i: (0, i)),    # times (batch on lanes)
                pl.BlockSpec((PAD, 8), lambda i: (0, 0)),   # packed biases + w1 + w6
                w_spec, w_spec, w_spec, w_spec,             # w2..w5 (resident)
            ],
            out_specs=pl.BlockSpec((1, tm), lambda i: (0, i)),
        ),
        compiler_params=pltpu.CompilerParams(
            dimension_semantics=("parallel",)),
        cost_estimate=cost,
    )(x_row, pb, w2, w3, w4, w5)


def pinn_forward(t, pb, wts, *, tm=None):
    """t: (N, 1) float32 -> (N, 1) float32."""
    N = t.shape[0]
    act_bf16, n_cores = _device_config()
    if tm is None:
        tm = _pick_tm(N, n_cores)
    x_row = t.astype(jnp.float32).reshape(1, N)             # free, contiguous
    out = _pinn_forward_call(x_row, pb, *wts, tm=int(tm), act_bf16=bool(act_bf16))
    return out.reshape(N, 1)


# --------------------------------------------------------------------------- #
# Host-side parameter packing (sigmoid-affine folding)
# --------------------------------------------------------------------------- #
def pack_params(weights, biases):
    """Fold sigmoid(z)=0.5*tanh(0.5z)+0.5 into the parameters and pack.

      pb[:, 0]   = 0.5*b1                       (layer-1 bias, tanh-scaled)
      pb[:, l]   = 0.25*colsum(W_l) + 0.5*b_l   for l = 1..4  (layers 2..5)
      pb[:, 5]   = 0.5*W1 row                   (Linear(1,100) weight)
      pb[:, 6]   = 0.5*W6 column                (Linear(100,1) weight)
      pb[:, 7]   = 0.5*sum(W6) + b6             (output bias, broadcast)

    Returns pb (128,8) f32 and 4 zero-padded (128,128) bf16 matrices
    Wt_l = 0.25 * W_l^T (layers 2..5).  Padded rows/cols are exactly 0, so
    padded hidden units stay exactly 0 through tanh and never leak.
    """
    pb = jnp.zeros((PAD, 8), jnp.float32)
    h1 = biases[0].shape[0]
    pb = pb.at[:h1, 0].set(0.5 * biases[0])
    pb = pb.at[:h1, 5].set(0.5 * weights[0][0])

    wts = []
    for l in range(1, 5):
        w, b = weights[l], biases[l]
        din, dout = w.shape
        pb = pb.at[:dout, l].set(0.25 * jnp.sum(w, axis=0) + 0.5 * b)
        wt = jnp.zeros((PAD, PAD), jnp.float32).at[:dout, :din].set(0.25 * w.T)
        wts.append(wt.astype(jnp.bfloat16))   # 0.25 scale is exact in bf16

    w6, b6 = weights[5][:, 0], biases[5][0]
    pb = pb.at[:w6.shape[0], 6].set(0.5 * w6)
    pb = pb.at[:, 7].set(0.5 * jnp.sum(w6) + b6)
    return pb, wts


def init_pinn_params(key):
    """Deterministic init mimicking torch.nn.Linear default (U[-1/sqrt(fan_in), +])."""
    dims = [1, HIDDEN, HIDDEN, HIDDEN, HIDDEN, HIDDEN, 1]
    weights, biases = [], []
    for i in range(len(dims) - 1):
        key, kw, kb = jax.random.split(key, 3)
        bound = 1.0 / jnp.sqrt(jnp.float32(dims[i]))
        weights.append(jax.random.uniform(kw, (dims[i], dims[i + 1]),
                                          jnp.float32, -bound, bound))
        biases.append(jax.random.uniform(kb, (dims[i + 1],),
                                         jnp.float32, -bound, bound))
    # k, d scalar parameters of PINN (not used in forward(); get_params() -> |k|, |d|)
    return weights, biases, jnp.float32(8.0), jnp.float32(0.5)


# --------------------------------------------------------------------------- #
# References
# --------------------------------------------------------------------------- #
def reference_forward_f32(t, weights, biases):
    """Plain f32 JAX equivalent of the PyTorch module (loose check / fallback)."""
    h = t.astype(jnp.float32)
    for i, (w, b) in enumerate(zip(weights, biases)):
        h = h @ w + b
        if i < len(weights) - 1:
            h = jax.nn.sigmoid(h)
    return h


def reference_from_packed(t, pb, wts, act_bf16):
    """Pure-JAX twin of the kernel: identical folded params, dtypes and op
    order.  Also the differentiable path for PINN training (jax.grad does not
    flow through the pallas_call)."""
    act = jnp.bfloat16 if act_bf16 else jnp.float32
    x = t.astype(jnp.float32).reshape(1, -1)                      # (1, N)
    z1 = pb[:, 5:6] * x + pb[:, 0:1]                              # (128, N)
    a = jnp.tanh(z1.astype(act))
    for i, w in enumerate(wts):
        z = jnp.dot(w, a.astype(jnp.bfloat16),
                    preferred_element_type=jnp.float32)
        a = jnp.tanh(z.astype(act) + pb[:, i + 1:i + 2].astype(act))
    out = jnp.sum(a * pb[:, 6:7], axis=0, keepdims=True) + pb[0:1, 7:8]
    return out.reshape(-1, 1)


# --------------------------------------------------------------------------- #
if __name__ == "__main__":
    key = jax.random.PRNGKey(0)
    weights, biases, k_param, d_param = init_pinn_params(key)
    pb, wts = pack_params(weights, biases)

    # Collocation times of the original script: t = np.linspace(0, 6, 600).
    N = 600
    t = jnp.linspace(0.0, 6.0, N, dtype=jnp.float32).reshape(N, 1)

    out = pinn_forward(t, pb, wts)
    out = jax.block_until_ready(out)
    assert out.shape == (N, 1)

    act_bf16, _ = _device_config()

    # Tight check vs the pure-JAX twin (same folded params / bf16 recipe).
    ref_eq = reference_from_packed(t, pb, wts, act_bf16)
    assert jnp.allclose(out, ref_eq, atol=5e-3, rtol=5e-3), "mismatch vs packed ref"

    # Loose check vs the plain f32 PyTorch-equivalent forward (bf16 weights /
    # activations are an intentional, review-requested accuracy tradeoff).
    ref_f32 = reference_forward_f32(t, weights, biases)
    assert jnp.allclose(out, ref_f32, atol=1e-1, rtol=1e-1), "mismatch vs f32 ref"

    # Ragged-tile / multi-block pipeline path: force grid=2 with a partial
    # last block (384 + 216 valid columns); result must match the single-block run.
    out_ragged = jax.block_until_ready(pinn_forward(t, pb, wts, tm=384))
    assert jnp.allclose(out, out_ragged, atol=1e-4), "mismatch on ragged tiling"

    # get_params() equivalent (trivial scalars, not part of the kernel hot path).
    _k, _d = jnp.abs(k_param), jnp.abs(d_param)

    print("KERNEL_OK")
</pallas_src>

<mosaic_0001>
module attributes {stable_mosaic.version = 11 : i64} {
  func.func @_pinn_mlp_kernel(%arg0: i32, %arg1: memref<1x600xf32, #tpu.memory_space<vmem>>, %arg2: memref<128x8xf32, #tpu.memory_space<vmem>>, %arg3: memref<128x128xbf16, #tpu.memory_space<vmem>>, %arg4: memref<128x128xbf16, #tpu.memory_space<vmem>>, %arg5: memref<128x128xbf16, #tpu.memory_space<vmem>>, %arg6: memref<128x128xbf16, #tpu.memory_space<vmem>>, %arg7: memref<1x600xf32, #tpu.memory_space<vmem>>) attributes {dimension_semantics = [#tpu.dimension_semantics<parallel>], iteration_bounds = array<i64: 1>, scalar_prefetch = 0 : i64, scratch_operands = 0 : i64, tpu.core_type = #tpu.core_type<tc>, window_params = [{transform_indices = @transform_0, window_bounds = array<i64: 1, 600>}, {pipeline_mode = #tpu.pipeline_mode<synchronous>, transform_indices = @transform_1, window_bounds = array<i64: 128, 8>}, {pipeline_mode = #tpu.pipeline_mode<synchronous>, transform_indices = @transform_2, window_bounds = array<i64: 128, 128>}, {pipeline_mode = #tpu.pipeline_mode<synchronous>, transform_indices = @transform_3, window_bounds = array<i64: 128, 128>}, {pipeline_mode = #tpu.pipeline_mode<synchronous>, transform_indices = @transform_4, window_bounds = array<i64: 128, 128>}, {pipeline_mode = #tpu.pipeline_mode<synchronous>, transform_indices = @transform_5, window_bounds = array<i64: 128, 128>}, {transform_indices = @transform_6, window_bounds = array<i64: 1, 600>}]} {
    %c0 = arith.constant 0 : index
    %c0_0 = arith.constant 0 : index
    %0 = vector.load %arg1[%c0, %c0_0] : memref<1x600xf32, #tpu.memory_space<vmem>>, vector<1x600xf32>
    %c0_1 = arith.constant 0 : index
    %c0_2 = arith.constant 0 : index
    %1 = vector.load %arg2[%c0_1, %c0_2] : memref<128x8xf32, #tpu.memory_space<vmem>>, vector<128x8xf32>
    %2 = vector.extract_strided_slice %1 {offsets = [0, 5], sizes = [128, 1], strides = [1, 1]} : vector<128x8xf32> to vector<128x1xf32>
    %3 = vector.broadcast %2 : vector<128x1xf32> to vector<128x600xf32>
    %4 = vector.broadcast %0 : vector<1x600xf32> to vector<128x600xf32>
    %5 = arith.mulf %3, %4 : vector<128x600xf32>
    %6 = vector.extract_strided_slice %1 {offsets = [0, 0], sizes = [128, 1], strides = [1, 1]} : vector<128x8xf32> to vector<128x1xf32>
    %7 = vector.broadcast %6 : vector<128x1xf32> to vector<128x600xf32>
    %8 = arith.addf %5, %7 : vector<128x600xf32>
    %9 = arith.truncf %8 : vector<128x600xf32> to vector<128x600xbf16>
    %10 = math.tanh %9 : vector<128x600xbf16>
    %c0_3 = arith.constant 0 : index
    %c0_4 = arith.constant 0 : index
    %11 = vector.load %arg3[%c0_3, %c0_4] : memref<128x128xbf16, #tpu.memory_space<vmem>>, vector<128x128xbf16>
    %cst = arith.constant dense<0.000000e+00> : vector<128x600xf32>
    %12 = tpu.matmul %11, %10, %cst {dimension_numbers = #tpu.dot_dimension_numbers<[1], [0], [0], [1], [0, 0, 1, 1], [], []>} : vector<128x128xbf16>, vector<128x600xbf16>, vector<128x600xf32> -> vector<128x600xf32>
    %13 = vector.extract_strided_slice %1 {offsets = [0, 1], sizes = [128, 1], strides = [1, 1]} : vector<128x8xf32> to vector<128x1xf32>
    %14 = arith.truncf %13 : vector<128x1xf32> to vector<128x1xbf16>
    %15 = arith.truncf %12 : vector<128x600xf32> to vector<128x600xbf16>
    %16 = vector.broadcast %14 : vector<128x1xbf16> to vector<128x600xbf16>
    %17 = arith.addf %15, %16 : vector<128x600xbf16>
    %18 = math.tanh %17 : vector<128x600xbf16>
    %c0_5 = arith.constant 0 : index
    %c0_6 = arith.constant 0 : index
    %19 = vector.load %arg4[%c0_5, %c0_6] : memref<128x128xbf16, #tpu.memory_space<vmem>>, vector<128x128xbf16>
    %cst_7 = arith.constant dense<0.000000e+00> : vector<128x600xf32>
    %20 = tpu.matmul %19, %18, %cst_7 {dimension_numbers = #tpu.dot_dimension_numbers<[1], [0], [0], [1], [0, 0, 1, 1], [], []>} : vector<128x128xbf16>, vector<128x600xbf16>, vector<128x600xf32> -> vector<128x600xf32>
    %21 = vector.extract_strided_slice %1 {offsets = [0, 2], sizes = [128, 1], strides = [1, 1]} : vector<128x8xf32> to vector<128x1xf32>
    %22 = arith.truncf %21 : vector<128x1xf32> to vector<128x1xbf16>
    %23 = arith.truncf %20 : vector<128x600xf32> to vector<128x600xbf16>
    %24 = vector.broadcast %22 : vector<128x1xbf16> to vector<128x600xbf16>
    %25 = arith.addf %23, %24 : vector<128x600xbf16>
    %26 = math.tanh %25 : vector<128x600xbf16>
    %c0_8 = arith.constant 0 : index
    %c0_9 = arith.constant 0 : index
    %27 = vector.load %arg5[%c0_8, %c0_9] : memref<128x128xbf16, #tpu.memory_space<vmem>>, vector<128x128xbf16>
    %cst_10 = arith.constant dense<0.000000e+00> : vector<128x600xf32>
    %28 = tpu.matmul %27, %26, %cst_10 {dimension_numbers = #tpu.dot_dimension_numbers<[1], [0], [0], [1], [0, 0, 1, 1], [], []>} : vector<128x128xbf16>, vector<128x600xbf16>, vector<128x600xf32> -> vector<128x600xf32>
    %29 = vector.extract_strided_slice %1 {offsets = [0, 3], sizes = [128, 1], strides = [1, 1]} : vector<128x8xf32> to vector<128x1xf32>
    %30 = arith.truncf %29 : vector<128x1xf32> to vector<128x1xbf16>
    %31 = arith.truncf %28 : vector<128x600xf32> to vector<128x600xbf16>
    %32 = vector.broadcast %30 : vector<128x1xbf16> to vector<128x600xbf16>
    %33 = arith.addf %31, %32 : vector<128x600xbf16>
    %34 = math.tanh %33 : vector<128x600xbf16>
    %c0_11 = arith.constant 0 : index
    %c0_12 = arith.constant 0 : index
    %35 = vector.load %arg6[%c0_11, %c0_12] : memref<128x128xbf16, #tpu.memory_space<vmem>>, vector<128x128xbf16>
    %cst_13 = arith.constant dense<0.000000e+00> : vector<128x600xf32>
    %36 = tpu.matmul %35, %34, %cst_13 {dimension_numbers = #tpu.dot_dimension_numbers<[1], [0], [0], [1], [0, 0, 1, 1], [], []>} : vector<128x128xbf16>, vector<128x600xbf16>, vector<128x600xf32> -> vector<128x600xf32>
    %37 = vector.extract_strided_slice %1 {offsets = [0, 4], sizes = [128, 1], strides = [1, 1]} : vector<128x8xf32> to vector<128x1xf32>
    %38 = arith.truncf %37 : vector<128x1xf32> to vector<128x1xbf16>
    %39 = arith.truncf %36 : vector<128x600xf32> to vector<128x600xbf16>
    %40 = vector.broadcast %38 : vector<128x1xbf16> to vector<128x600xbf16>
    %41 = arith.addf %39, %40 : vector<128x600xbf16>
    %42 = math.tanh %41 : vector<128x600xbf16>
    %43 = vector.extract_strided_slice %1 {offsets = [0, 6], sizes = [128, 1], strides = [1, 1]} : vector<128x8xf32> to vector<128x1xf32>
    %44 = arith.extf %42 : vector<128x600xbf16> to vector<128x600xf32>
    %45 = vector.broadcast %43 : vector<128x1xf32> to vector<128x600xf32>
    %46 = arith.mulf %44, %45 : vector<128x600xf32>
    %cst_14 = arith.constant dense<0.000000e+00> : vector<600xf32>
    %47 = vector.multi_reduction <add>, %46, %cst_14 [0] : vector<128x600xf32> to vector<600xf32>
    %48 = vector.shape_cast %47 : vector<600xf32> to vector<1x600xf32>
    %49 = vector.extract_strided_slice %1 {offsets = [0, 7], sizes = [1, 1], strides = [1, 1]} : vector<128x8xf32> to vector<1x1xf32>
    %50 = vector.broadcast %49 : vector<1x1xf32> to vector<1x600xf32>
    %51 = arith.addf %48, %50 : vector<1x600xf32>
    %c0_15 = arith.constant 0 : index
    %c0_16 = arith.constant 0 : index
    %52 = vector.load %arg7[%c0_15, %c0_16] : memref<1x600xf32, #tpu.memory_space<vmem>>, vector<1x600xf32>
    tpu.vector_store %arg7[%c0_15, %c0_16], %51 {strides = array<i32>} : memref<1x600xf32, #tpu.memory_space<vmem>>, vector<1x600xf32>,
    return
  }
  func.func @transform_0(%arg0: i32) -> (i32, i32) {
    %c0_i32 = arith.constant 0 : i32
    %c0_i32_0 = arith.constant 0 : i32
    return %c0_i32, %arg0 : i32, i32
  }
  func.func @transform_1(%arg0: i32) -> (i32, i32) {
    %c0_i32 = arith.constant 0 : i32
    %c0_i32_0 = arith.constant 0 : i32
    %c0_i32_1 = arith.constant 0 : i32
    return %c0_i32, %c0_i32_0 : i32, i32
  }
  func.func @transform_2(%arg0: i32) -> (i32, i32) {
    %c0_i32 = arith.constant 0 : i32
    %c0_i32_0 = arith.constant 0 : i32
    %c0_i32_1 = arith.constant 0 : i32
    return %c0_i32, %c0_i32_0 : i32, i32
  }
  func.func @transform_3(%arg0: i32) -> (i32, i32) {
    %c0_i32 = arith.constant 0 : i32
    %c0_i32_0 = arith.constant 0 : i32
    %c0_i32_1 = arith.constant 0 : i32
    return %c0_i32, %c0_i32_0 : i32, i32
  }
  func.func @transform_4(%arg0: i32) -> (i32, i32) {
    %c0_i32 = arith.constant 0 : i32
    %c0_i32_0 = arith.constant 0 : i32
    %c0_i32_1 = arith.constant 0 : i32
    return %c0_i32, %c0_i32_0 : i32, i32
  }
  func.func @transform_5(%arg0: i32) -> (i32, i32) {
    %c0_i32 = arith.constant 0 : i32
    %c0_i32_0 = arith.constant 0 : i32
    %c0_i32_1 = arith.constant 0 : i32
    return %c0_i32, %c0_i32_0 : i32, i32
  }
  func.func @transform_6(%arg0: i32) -> (i32, i32) {
    %c0_i32 = arith.constant 0 : i32
    %c0_i32_0 = arith.constant 0 : i32
    return %c0_i32, %arg0 : i32, i32
  }
}

</mosaic_0001>

<bundles_post_ra>
// kernel: _pinn_forward_call.1
= control target key start
LH: loop header
LB: loop body
LE: loop exit
PB: predicated region body
PF: predicated region fallthrough
CT: control target
= control target key end

     0   :  { %11 = vsyncpa [#allocation3], 0  ;;  %s8697_s0 = inlined_call_operand.vmem [shape: f32[1,600], index: 0, kind: input, shape index: {}]   ;;  %s8698_s1 = inlined_call_operand.vmem [shape: f32[128,8], index: 1, kind: input, shape index: {}]   ;;  %s8699_s2 = inlined_call_operand.vmem [shape: bf16[128,128], index: 2, kind: input, shape index: {}]   ;;  %s8700_s3 = inlined_call_operand.vmem [shape: bf16[128,128], index: 3, kind: input, shape index: {}]   ;;  %s8701_s4 = inlined_call_operand.hbm [shape: bf16[128,128], index: 4, kind: input, shape index: {}]   ;;  %s8702_s5 = inlined_call_operand.hbm [shape: bf16[128,128], index: 5, kind: input, shape index: {}]   ;;  %s8703_s6 = inlined_call_operand.hbm [shape: f32[1,600], index: 6, kind: output, shape index: {}]  }
   0x1   :  { %12 = vsyncpa [#allocation6], 0 }
   0x2   :  { %13 = vsyncpa [#allocation4], 0  ;;  %s26_s23 = sshll.u32 %s8701_s4, 4  ;;  %s5783_s24 = smov [#allocation2]   ;;  %s27_s23 = int_to_ptr.hbm [resolvable:$true] %s26_s23 }
   0x3   :  { %s28_s25 = sshll.u32 %s5783_s24, 4  ;;  %s39_s28 = sshll.u32 %s8702_s5, 4  ;;  %s29_s25 = int_to_ptr.vmem [resolvable:$true] %s28_s25  ;;  %s40_s28 = int_to_ptr.hbm [resolvable:$true] %s39_s28 }
   0x4   :  { %s5784_s29 = smov 64   ;;  %s5785_s30 = smov 4  }
   0x5   :  { %34 = dma.hbm_to_vmem [thread:$0]  %s27_s23, 1024, %s29_s25, [#allocation3], %s5784_s29, %s5784_s29, %s5785_s30  }
   0x6   :  { %s5786_s7 = smov [#allocation5]  }
   0x7   :  { %s41_s8 = sshll.u32 %s5786_s7, 4  ;;  %s42_s8 = int_to_ptr.vmem [resolvable:$true] %s41_s8 }
   0x8   :  { %47 = dma.hbm_to_vmem [thread:$0]  %s40_s28, 1024, %s42_s8, [#allocation6], %s5784_s29, %s5784_s29, %s5785_s30  }
   0x9   :  { %5777 = dma.done.wait [#allocation3], 1024  }
   0xa   :  { %5778 = vsyncadd [#allocation3], 4294966272 }
   0xb   :  { %5779 = dma.done.wait [#allocation6], 1024  }
   0xc   :  { %5780 = vsyncadd [#allocation6], 4294966272  ;;  %v5787_v0 = vmov 0   ;;  %v5788_v1 = vmov 5   ;;  %v5842_v2 = vld [vmem:[%s8698_s1 + $0x70] sm:$0xff]  ;;  %v5847_v3 = vld [vmem:[%s8698_s1 + $0x60] sm:$0xff] }
   0xd   :  { %4851 = vset.pattern.permute.xlu1 %v5787_v0  ;;  %4850 = vset.pattern.permute.xlu0 %v5788_v1  ;;  %v5855_v4 = vld [vmem:[%s8698_s1 + $0x78] sm:$0xff]  ;;  %v5860_v5 = vld [vmem:[%s8698_s1 + $0x68] sm:$0xff]  ;;  %v67_v7 = vld [vmem:[%s8698_s1 + $0x50] sm:$0xff]  ;;  %vm4588_vm0 = vcmask 719872   ;;  %vm4644_vm1 = vcmask 1040384   ;;  %vm4646_vm2 = vcmask 1041408  }
   0xe   :  { %4852 = vset.pattern.permute.xlu2 %v5788_v1  ;;  %301 = vperm.xlu1 %4851, %v5842_v2   ;;  %v5868_v6 = vld [vmem:[%s8698_s1 + $0x38] sm:$0xff]  ;;  %v5887_v9 = vld [vmem:[%s8698_s1 + $0x40] sm:$0xff]  ;;  %v66_v10 = vld [vmem:[%s8698_s1 + $0x48] sm:$0xff]  ;;  %vm4648_vm3 = vcmask 1043459   ;;  %s4665_s11 = sshll.u32 %s8703_s6, 4  ;;  %vm4650_vm4 = vcmask 1042432   ;;  %s4666_s11 = int_to_ptr.hbm [resolvable:$true] %s4665_s11 }
   0xf   :  { %145 = vperm.xlu0 %4850, %v5842_v2   ;;  %135 = vperm.xlu2 %4852, %v5847_v3   ;;  %v5878_v8 = vld [vmem:[%s8698_s1 + $0x58] sm:$0xff]  ;;  %v63_v11 = vld [vmem:[%s8698_s1 + $0x30] sm:$0xff]  ;;  %v61_v12 = vld [vmem:[%s8698_s1 + $0x20] sm:$0xff] }
  0x10   :  { %v60_v13 = vld [vmem:[%s8698_s1 + $0x18] sm:$0xff]  ;;  %v62_v14 = vld [vmem:[%s8698_s1 + $0x28] sm:$0xff]  ;;  %v57_v15 = vld [vmem:[%s8698_s1] sm:$0xff] }
  0x11   :  { %v5917_v16 = vld [vmem:[%s8698_s1 + $0x10] sm:$0xff]  ;;  %v5925_v17 = vld [vmem:[%s8698_s1 + $0x8] sm:$0xff]  ;;  %v56_v18 = vld [vmem:[%s8697_s0] sm:$0x1f] }
  0x12   :  { %8789 = vst [vmem:[#allocation11_spill] sm:$0xff] %v5917_v16  ;;  %v5931_v20 = vperm.slane %v56_v18, 4  ;;  %v5944_v29 = vperm.slane %v56_v18, 0  ;;  %v5948_v31 = vperm.slane %v56_v18, 1  ;;  %v5953_v34 = vperm.slane %v56_v18, 2 }
  0x13   :  { %8790 = vst [vmem:[#allocation12_spill] sm:$0xff] %v5925_v17  ;;  %v5957_v39 = vperm.slane %v56_v18, 3 }
  0x16   :  { %305 = vperm.xlu1 %4851, %v5855_v4  }
  0x17   :  { %150 = vperm.xlu0 %4850, %v5855_v4   ;;  %140 = vperm.xlu2 %4852, %v5860_v5  }
  0x1e   :  { %297 = vperm.xlu1 %4851, %v5860_v5  }
  0x1f   :  { %110 = vperm.xlu0 %4850, %v5868_v6   ;;  %125 = vperm.xlu2 %4852, %v67_v7  }
  0x26   :  { %4853 = vset.pattern.permute.xlu1 %v5788_v1 }
  0x27   :  { %4857 = vset.pattern.permute.xlu0 %v5787_v0  ;;  %130 = vperm.xlu1 %4853, %v5878_v8  }
  0x28   :  { %293 = vperm.xlu0 %4857, %v5847_v3   ;;  %4854 = vset.pattern.permute.xlu2 %v5787_v0 }
  0x29   :  { %285 = vperm.xlu2 %4854, %v67_v7  }
  0x2f   :  { %115 = vperm.xlu1 %4853, %v5887_v9  }
  0x30   :  { %289 = vperm.xlu0 %4857, %v5878_v8  }
  0x31   :  { %4855 = vset.pattern.permute.xlu2 %v5788_v1 }
  0x32   :  { %120 = vperm.xlu2 %4855, %v66_v10  }
  0x37   :  { %4856 = vset.pattern.permute.xlu1 %v5787_v0 }
  0x38   :  { %277 = vperm.xlu0 %4857, %v5887_v9   ;;  %281 = vperm.xlu1 %4856, %v66_v10  }
  0x3a   :  { %105 = vperm.xlu2 %4855, %v63_v11  }
  0x40   :  { %261 = vperm.xlu0 %4857, %v61_v12   ;;  %269 = vperm.xlu1 %4856, %v63_v11  }
  0x42   :  { %4858 = vset.pattern.permute.xlu2 %v5787_v0 }
  0x43   :  { %273 = vperm.xlu2 %4858, %v5868_v6  }
  0x48   :  { %257 = vperm.xlu0 %4857, %v60_v13   ;;  %4859 = vset.pattern.permute.xlu1 %v5788_v1 }
  0x49   :  { %95 = vperm.xlu1 %4859, %v61_v12  }
  0x4b   :  { %4860 = vset.pattern.permute.xlu2 %v5788_v1 }
  0x4c   :  { %100 = vperm.xlu2 %4860, %v62_v14  }
  0x50   :  { %245 = vperm.xlu0 %4857, %v57_v15  }
  0x51   :  { %4861 = vset.pattern.permute.xlu1 %v5787_v0 }
  0x52   :  { %265 = vperm.xlu1 %4861, %v62_v14  }
  0x54   :  { %85 = vperm.xlu2 %4860, %v5917_v16  }
  0x5a   :  { %4862 = vset.pattern.permute.xlu1 %v5788_v1 }
  0x5b   :  { %90 = vperm.xlu1 %4862, %v60_v13  }
  0x5c   :  { %4863 = vset.pattern.permute.xlu2 %v5787_v0 }
  0x5d   :  { %253 = vperm.xlu2 %4863, %v5917_v16  }
  0x63   :  { %75 = vperm.xlu1 %4862, %v57_v15  }
  0x65   :  { %4864 = vset.pattern.permute.xlu2 %v5788_v1 }
  0x66   :  { %80 = vperm.xlu2 %4864, %v5925_v17  }
  0x69   :  { %v136_v19 = vpop.permute.xlu2 %135 }
  0x6a   :  { %v5935_v21 = vmul.f32 %v5931_v20, %v136_v19  ;;  %v224_v58 = vmul.f32 %v5944_v29, %v136_v19  ;;  %v225_v59 = vmul.f32 %v5948_v31, %v136_v19  ;;  %v226_v60 = vmul.f32 %v5953_v34, %v136_v19 }
  0x6b   :  { %4865 = vset.pattern.permute.xlu1 %v5787_v0  ;;  %v227_v11 = vmul.f32 %v5957_v39, %v136_v19 }
  0x6c   :  { %249 = vperm.xlu1 %4865, %v5925_v17  }
  0x71   :  { %v5938_v22 = vpop.permute.xlu2 %140 }
  0x72   :  { %v233_v23 = vmul.f32 %v5931_v20, %v5938_v22  ;;  %v229_v12 = vmul.f32 %v5944_v29, %v5938_v22  ;;  %v230_v19 = vmul.f32 %v5948_v31, %v5938_v22 }
  0x79   :  { %v126_v24 = vpop.permute.xlu2 %125 }
  0x7a   :  { %v218_v25 = vmul.f32 %v5931_v20, %v126_v24  ;;  %v214_v13 = vmul.f32 %v5944_v29, %v126_v24  ;;  %v215_v14 = vmul.f32 %v5948_v31, %v126_v24  ;;  %v216_v15 = vmul.f32 %v5953_v34, %v126_v24 }
  0x80   :  { %v302_v26 = vpop.permute.xlu1 %301 }
  0x81   :  { %v146_v27 = vpop.permute.xlu0 %145 }
  0x82   :  { %v238_v28 = vmul.f32 %v5931_v20, %v146_v27  ;;  %v234_v35 = vmul.f32 %v5944_v29, %v146_v27  ;;  %v235_v36 = vmul.f32 %v5948_v31, %v146_v27  ;;  %v236_v43 = vmul.f32 %v5953_v34, %v146_v27 }
  0x83   :  { %v5946_v30 = vpop.permute.xlu2 %285  ;;  %v237_v53 = vmul.f32 %v5957_v39, %v146_v27 }
  0x84   :  { %v382_v32 = vadd.f32 %v302_v26, %v238_v28  ;;  %v5951_v33 = vadd.f32 %v5946_v30, %v218_v25  ;;  %v378_v45 = vadd.f32 %v302_v26, %v234_v35  ;;  %v379_v48 = vadd.f32 %v302_v26, %v235_v36 }
  0x85   :  { %v380_v54 = vadd.f32 %v302_v26, %v236_v43  ;;  %v381_v18 = vadd.f32 %v302_v26, %v237_v53  ;;  %v217_v28 = vmul.f32 %v5957_v39, %v126_v24  ;;  %v5991_v26 = vadd.f32 %v5946_v30, %v214_v13 }
  0x88   :  { %v306_v37 = vpop.permute.xlu1 %305 }
  0x89   :  { %v151_v38 = vpop.permute.xlu0 %150 }
  0x8a   :  { %v239_v40 = vmul.f32 %v5944_v29, %v151_v38  ;;  %v240_v41 = vmul.f32 %v5948_v31, %v151_v38  ;;  %v241_v42 = vmul.f32 %v5953_v34, %v151_v38  ;;  %v243_v44 = vmul.f32 %v5931_v20, %v151_v38 }
  0x8b   :  { %v242_v49 = vmul.f32 %v5957_v39, %v151_v38  ;;  %v231_v38 = vmul.f32 %v5953_v34, %v5938_v22 }
  0x8c   :  { %v383_v46 = vadd.f32 %v306_v37, %v239_v40  ;;  %v384_v47 = vadd.f32 %v306_v37, %v240_v41  ;;  %v385_v50 = vadd.f32 %v306_v37, %v241_v42  ;;  %v387_v51 = vadd.f32 %v306_v37, %v243_v44  ;;  %v121_v52 = vpop.permute.xlu2 %120 }
  0x8d   :  { %v5967_v55 = vmul.f32 %v5931_v20, %v121_v52  ;;  %v386_v62 = vadd.f32 %v306_v37, %v242_v49  ;;  %v5994_v41 = vadd.f32 %v5946_v30, %v215_v14  ;;  %v5997_v42 = vadd.f32 %v5946_v30, %v216_v15 }
  0x8e   :  { %v423_v56 = vpack.c.bf16 %v383_v46, %v378_v45  ;;  %v424_v57 = vpack.c.bf16 %v384_v47, %v379_v48  ;;  %v5972_v61 = vpack.c.bf16 %v387_v51, %v382_v32  ;;  %v425_v10 = vpack.c.bf16 %v385_v50, %v380_v54 }
  0x8f   :  { %v426_v37 = vpack.c.bf16 %v386_v62, %v381_v18  ;;  %v6003_v44 = vadd.f32 %v5946_v30, %v217_v28  ;;  %v6009_v45 = vmul.f32 %v5948_v31, %v121_v52  ;;  %v6012_v46 = vmul.f32 %v5953_v34, %v121_v52 }
  0x90   :  { %v298_v63 = vpop.permute.xlu1 %297  ;;  %v498_v1 = vunpack.c.l.bf16 %v423_v56  ;;  %v503_v7 = vunpack.c.h.bf16 %v423_v56  ;;  %v499_v27 = vunpack.c.l.bf16 %v424_v57  ;;  %v504_v35 = vunpack.c.h.bf16 %v424_v57 }
  0x91   :  { %v111_v0 = vpop.permute.xlu0 %110  ;;  %v377_v25 = vadd.f32 %v298_v63, %v233_v23  ;;  %v500_v36 = vunpack.c.l.bf16 %v425_v10  ;;  %v232_v23 = vmul.f32 %v5957_v39, %v5938_v22  ;;  %v505_v40 = vunpack.c.h.bf16 %v425_v10 }
  0x92   :  { %v5982_v32 = vmul.f32 %v5931_v20, %v111_v0  ;;  %4882 = vtanh.f32 %v498_v1  ;;  %v6006_v22 = vmul.f32 %v5944_v29, %v121_v52  ;;  %v6015_v47 = vmul.f32 %v5957_v39, %v121_v52 }
  0x93   :  { %4884 = vtanh.f32 %v503_v7  ;;  %v501_v48 = vunpack.c.l.bf16 %v426_v37  ;;  %v373_v50 = vadd.f32 %v298_v63, %v229_v12  ;;  %v374_v51 = vadd.f32 %v298_v63, %v230_v19 }
  0x94   :  { %v106_v24 = vpop.permute.xlu2 %105  ;;  %4886 = vtanh.f32 %v499_v27  ;;  %v506_v54 = vunpack.c.h.bf16 %v426_v37  ;;  %v375_v57 = vadd.f32 %v298_v63, %v231_v38  ;;  %v376_v62 = vadd.f32 %v298_v63, %v232_v23 }
  0x95   :  { %v6000_v43 = vmul.f32 %v5931_v20, %v106_v24  ;;  %4888 = vtanh.f32 %v504_v35  ;;  %v6018_v1 = vmul.f32 %v5944_v29, %v111_v0  ;;  %v6021_v7 = vmul.f32 %v5948_v31, %v111_v0 }
  0x96   :  { %4890 = vtanh.f32 %v500_v36  ;;  %v6025_v15 = vmul.f32 %v5953_v34, %v111_v0  ;;  %v6029_v28 = vmul.f32 %v5957_v39, %v111_v0  ;;  %v6034_v23 = vmul.f32 %v5944_v29, %v106_v24 }
  0x97   :  { %4892 = vtanh.f32 %v505_v40  ;;  %v6040_v0 = vmul.f32 %v5953_v34, %v106_v24 }
  0x98   :  { %v4883_v49 = vpop.eup %4882  ;;  %4894 = vtanh.f32 %v501_v48 }
  0x99   :  { %v131_v30 = vpop.permute.xlu1 %130  ;;  %v4885_v56 = vpop.eup %4884  ;;  %4896 = vtanh.f32 %v506_v54 }
  0x9a   :  { %v294_v53 = vpop.permute.xlu0 %293  ;;  %v223_v52 = vmul.f32 %v5931_v20, %v131_v30  ;;  %v4887_v12 = vpop.eup %4886  ;;  %v623_v27 = vpack.c.bf16 %v4885_v56, %v4883_v49  ;;  %v219_v40 = vmul.f32 %v5944_v29, %v131_v30 }
  0x9b   :  { %v368_v10 = vadd.f32 %v294_v53, %v224_v58  ;;  %v369_v13 = vadd.f32 %v294_v53, %v225_v59  ;;  %v370_v14 = vadd.f32 %v294_v53, %v226_v60  ;;  %v372_v18 = vadd.f32 %v294_v53, %v5935_v21  ;;  %v4889_v63 = vpop.eup %4888 }
  0x9c   :  { %v371_v35 = vadd.f32 %v294_v53, %v227_v11  ;;  %v4891_v36 = vpop.eup %4890  ;;  %692 = vmatpush.bf16.msra.mxu0 %v623_v27  ;;  %v624_v60 = vpack.c.bf16 %v4889_v63, %v4887_v12  ;;  %v6037_v21 = vmul.f32 %v5948_v31, %v106_v24  ;;  %v6043_v11 = vmul.f32 %v5957_v39, %v106_v24 }
  0x9d   :  { %v418_v19 = vpack.c.bf16 %v373_v50, %v368_v10  ;;  %v419_v37 = vpack.c.bf16 %v374_v51, %v369_v13  ;;  %v420_v58 = vpack.c.bf16 %v375_v57, %v370_v14  ;;  %v6031_v59 = vpack.c.bf16 %v377_v25, %v372_v18  ;;  %v4893_v38 = vpop.eup %4892 }
  0x9e   :  { %v220_v25 = vmul.f32 %v5948_v31, %v131_v30  ;;  %741 = vmatpush.bf16.msra.mxu1 %v624_v60  ;;  %v625_v48 = vpack.c.bf16 %v4893_v38, %v4891_v36  ;;  %v221_v50 = vmul.f32 %v5953_v34, %v131_v30  ;;  %v222_v51 = vmul.f32 %v5957_v39, %v131_v30  ;;  %v4895_v10 = vpop.eup %4894 }
  0x9f   :  { %v488_v49 = vunpack.c.l.bf16 %v418_v19  ;;  %v421_v53 = vpack.c.bf16 %v376_v62, %v371_v35  ;;  %v493_v57 = vunpack.c.h.bf16 %v418_v19  ;;  %v489_v13 = vunpack.c.l.bf16 %v419_v37  ;;  %v4897_v18 = vpop.eup %4896 }
  0xa0   :  { %790 = vmatpush.bf16.msra.mxu2 %v625_v48  ;;  %v494_v24 = vunpack.c.h.bf16 %v419_v37  ;;  %v490_v14 = vunpack.c.l.bf16 %v420_v58  ;;  %v495_v12 = vunpack.c.h.bf16 %v420_v58  ;;  %v626_v38 = vpack.c.bf16 %v4897_v18, %v4895_v10 }
  0xa1   :  { %v116_v54 = vpop.permute.xlu1 %115  ;;  %4898 = vtanh.f32 %v488_v49  ;;  %v491_v35 = vunpack.c.l.bf16 %v421_v53 }
  0xa2   :  { %v290_v56 = vpop.permute.xlu0 %289  ;;  %v208_v27 = vmul.f32 %v5931_v20, %v116_v54  ;;  %4900 = vtanh.f32 %v493_v57  ;;  %839 = vmatpush.bf16.msra.mxu3 %v626_v38  ;;  %v204_v19 = vmul.f32 %v5944_v29, %v116_v54 }
  0xa3   :  { %v363_v63 = vadd.f32 %v290_v56, %v219_v40  ;;  %v364_v36 = vadd.f32 %v290_v56, %v220_v25  ;;  %v365_v60 = vadd.f32 %v290_v56, %v221_v50  ;;  %v366_v17 = vadd.f32 %v290_v56, %v222_v51 }
  0xa4   :  { %v367_v16 = vadd.f32 %v290_v56, %v223_v52  ;;  %4902 = vtanh.f32 %v489_v13  ;;  %v205_v40 = vmul.f32 %v5948_v31, %v116_v54  ;;  %v206_v52 = vmul.f32 %v5953_v34, %v116_v54 }
  0xa5   :  { %v413_v30 = vpack.c.bf16 %v363_v63, %v5991_v26  ;;  %v414_v62 = vpack.c.bf16 %v364_v36, %v5994_v41  ;;  %v415_v37 = vpack.c.bf16 %v365_v60, %v5997_v42  ;;  %v207_v25 = vmul.f32 %v5957_v39, %v116_v54 }
  0xa6   :  { %v6055_v58 = vpack.c.bf16 %v367_v16, %v5951_v33  ;;  %4904 = vtanh.f32 %v494_v24  ;;  %v6061_v26 = vpack.c.bf16 %v366_v17, %v6003_v44  ;;  %v496_v41 = vunpack.c.h.bf16 %v421_v53  ;;  %v6065_v24 = vpop.permute.xlu2 %273 }
  0xa7   :  { %4906 = vtanh.f32 %v490_v14  ;;  %v478_v48 = vunpack.c.l.bf16 %v413_v30  ;;  %v483_v42 = vunpack.c.h.bf16 %v413_v30  ;;  %v479_v50 = vunpack.c.l.bf16 %v414_v62  ;;  %v4899_v33 = vpop.eup %4898 }
  0xa8   :  { %4908 = vtanh.f32 %v495_v12  ;;  %v484_v16 = vunpack.c.h.bf16 %v414_v62  ;;  %v480_v10 = vunpack.c.l.bf16 %v415_v37  ;;  %v485_v13 = vunpack.c.h.bf16 %v415_v37  ;;  %v4901_v18 = vpop.eup %4900 }
  0xa9   :  { %4910 = vtanh.f32 %v491_v35  ;;  %v618_v63 = vpack.c.bf16 %v4901_v18, %v4899_v33 }
  0xaa   :  { %v278_v49 = vpop.permute.xlu0 %277  ;;  %v282_v57 = vpop.permute.xlu1 %281  ;;  %4912 = vtanh.f32 %v496_v41 }
  0xab   :  { %v348_v51 = vadd.f32 %v278_v49, %v204_v19  ;;  %v349_v56 = vadd.f32 %v278_v49, %v205_v40  ;;  %v352_v54 = vadd.f32 %v278_v49, %v208_v27  ;;  %v353_v17 = vadd.f32 %v282_v57, %v6006_v22  ;;  %v4903_v53 = vpop.eup %4902  ;;  %693 = vmatpush.bf16.msra.mxu0 %v618_v63 }
  0xac   :  { %v354_v44 = vadd.f32 %v282_v57, %v6009_v45  ;;  %v350_v14 = vadd.f32 %v278_v49, %v206_v52  ;;  %v351_v12 = vadd.f32 %v278_v49, %v207_v25  ;;  %v4905_v36 = vpop.eup %4904  ;;  %v355_v60 = vadd.f32 %v282_v57, %v6012_v46 }
  0xad   :  { %v357_v38 = vadd.f32 %v282_v57, %v5967_v55  ;;  %v408_v30 = vpack.c.bf16 %v353_v17, %v348_v51  ;;  %4914 = vtanh.f32 %v478_v48  ;;  %v4907_v27 = vpop.eup %4906  ;;  %v619_v62 = vpack.c.bf16 %v4905_v36, %v4903_v53 }
  0xae   :  { %v356_v22 = vadd.f32 %v282_v57, %v6015_v47  ;;  %v409_v45 = vpack.c.bf16 %v354_v44, %v349_v56  ;;  %4916 = vtanh.f32 %v483_v42  ;;  %v4909_v35 = vpop.eup %4908  ;;  %v343_v19 = vadd.f32 %v6065_v24, %v6018_v1  ;;  %v6086_v17 = vpop.permute.xlu2 %100 }
  0xaf   :  { %v6072_v37 = vpack.c.bf16 %v357_v38, %v352_v54  ;;  %4918 = vtanh.f32 %v479_v50  ;;  %v481_v46 = vunpack.c.l.bf16 %v6061_v26  ;;  %v344_v55 = vadd.f32 %v6065_v24, %v6021_v7  ;;  %742 = vmatpush.bf16.msra.mxu1 %v619_v62  ;;  %v4911_v47 = vpop.eup %4910 }
  0xb0   :  { %v620_v40 = vpack.c.bf16 %v4909_v35, %v4907_v27  ;;  %4920 = vtanh.f32 %v484_v16  ;;  %v486_v52 = vunpack.c.h.bf16 %v6061_v26  ;;  %v345_v25 = vadd.f32 %v6065_v24, %v6025_v15  ;;  %v4913_v48 = vpop.eup %4912 }
  0xb1   :  { %v410_v41 = vpack.c.bf16 %v355_v60, %v350_v14  ;;  %4922 = vtanh.f32 %v480_v10  ;;  %v468_v1 = vunpack.c.l.bf16 %v408_v30  ;;  %v411_v49 = vpack.c.bf16 %v356_v22, %v351_v12 }
  0xb2   :  { %791 = vmatpush.bf16.msra.mxu2 %v620_v40  ;;  %4924 = vtanh.f32 %v485_v13  ;;  %v270_v42 = vpop.permute.xlu1 %269  ;;  %v473_v50 = vunpack.c.h.bf16 %v408_v30  ;;  %v469_v33 = vunpack.c.l.bf16 %v409_v45  ;;  %v621_v51 = vpack.c.bf16 %v4913_v48, %v4911_v47 }
  0xb3   :  { %v4915_v7 = vpop.eup %4914  ;;  %4926 = vtanh.f32 %v481_v46  ;;  %v338_v16 = vadd.f32 %v270_v42, %v6034_v23  ;;  %v339_v26 = vadd.f32 %v270_v42, %v6037_v21  ;;  %v347_v15 = vadd.f32 %v6065_v24, %v5982_v32 }
  0xb4   :  { %v4917_v56 = vpop.eup %4916  ;;  %4928 = vtanh.f32 %v486_v52  ;;  %v342_v57 = vadd.f32 %v270_v42, %v6000_v43  ;;  %v474_v10 = vunpack.c.h.bf16 %v409_v45  ;;  %840 = vmatpush.bf16.msra.mxu3 %v621_v51  ;;  %v340_v54 = vadd.f32 %v270_v42, %v6040_v0 }
  0xb5   :  { %v4919_v18 = vpop.eup %4918  ;;  %v613_v13 = vpack.c.bf16 %v4917_v56, %v4915_v7  ;;  %4930 = vtanh.f32 %v468_v1  ;;  %v470_v44 = vunpack.c.l.bf16 %v410_v41  ;;  %v403_v53 = vpack.c.bf16 %v343_v19, %v338_v16 }
  0xb6   :  { %v4921_v23 = vpop.eup %4920  ;;  %v6088_v21 = vpack.c.bf16 %v347_v15, %v342_v57  ;;  %4932 = vtanh.f32 %v473_v50  ;;  %v475_v14 = vunpack.c.h.bf16 %v410_v41  ;;  %v404_v43 = vpack.c.bf16 %v344_v55, %v339_v26 }
  0xb7   :  { %v4923_v32 = vpop.eup %4922  ;;  %694 = vmatpush.bf16.msra.mxu0 %v613_v13  ;;  %v614_v12 = vpack.c.bf16 %v4921_v23, %v4919_v18  ;;  %4934 = vtanh.f32 %v469_v33  ;;  %v471_v63 = vunpack.c.l.bf16 %v411_v49  ;;  %v341_v60 = vadd.f32 %v270_v42, %v6043_v11  ;;  %v6101_v33 = vpop.permute.xlu2 %85 }
  0xb8   :  { %v4925_v36 = vpop.eup %4924  ;;  %4936 = vtanh.f32 %v474_v10  ;;  %v476_v0 = vunpack.c.h.bf16 %v411_v49  ;;  %v405_v27 = vpack.c.bf16 %v345_v25, %v340_v54  ;;  %v346_v22 = vadd.f32 %v6065_v24, %v6029_v28  ;;  %v6111_v23 = vpop.permute.xlu0 %261 }
  0xb9   :  { %v4927_v38 = vpop.eup %4926  ;;  %743 = vmatpush.bf16.msra.mxu1 %v614_v12  ;;  %v615_v30 = vpack.c.bf16 %v4925_v36, %v4923_v32  ;;  %4938 = vtanh.f32 %v470_v44  ;;  %v458_v45 = vunpack.c.l.bf16 %v403_v53  ;;  %v463_v35 = vunpack.c.h.bf16 %v403_v53 }
  0xba   :  { %v4929_v62 = vpop.eup %4928  ;;  %4940 = vtanh.f32 %v475_v14  ;;  %v459_v11 = vunpack.c.l.bf16 %v404_v43  ;;  %v406_v52 = vpack.c.bf16 %v346_v22, %v341_v60  ;;  %v464_v47 = vunpack.c.h.bf16 %v404_v43 }
  0xbb   :  { %v4931_v19 = vpop.eup %4930  ;;  %792 = vmatpush.bf16.msra.mxu2 %v615_v30  ;;  %v616_v46 = vpack.c.bf16 %v4929_v62, %v4927_v38  ;;  %4942 = vtanh.f32 %v471_v63  ;;  %v6093_v55 = vpop.permute.xlu1 %95  ;;  %v460_v1 = vunpack.c.l.bf16 %v405_v27  ;;  %v189_v24 = vmul.f32 %v5944_v29, %v6086_v17 }
  0xbc   :  { %v4933_v40 = vpop.eup %4932  ;;  %4944 = vtanh.f32 %v476_v0  ;;  %v184_v42 = vmul.f32 %v5944_v29, %v6093_v55  ;;  %v185_v50 = vmul.f32 %v5948_v31, %v6093_v55  ;;  %v465_v51 = vunpack.c.h.bf16 %v405_v27 }
  0xbd   :  { %v4935_v25 = vpop.eup %4934  ;;  %841 = vmatpush.bf16.msra.mxu3 %v616_v46  ;;  %v608_v41 = vpack.c.bf16 %v4933_v40, %v4931_v19  ;;  %4946 = vtanh.f32 %v458_v45  ;;  %v461_v16 = vunpack.c.l.bf16 %v406_v52  ;;  %v466_v26 = vunpack.c.h.bf16 %v406_v52 }
  0xbe   :  { %v4937_v28 = vpop.eup %4936  ;;  %4948 = vtanh.f32 %v463_v35  ;;  %v190_v15 = vmul.f32 %v5948_v31, %v6086_v17  ;;  %v191_v57 = vmul.f32 %v5953_v34, %v6086_v17  ;;  %v192_v13 = vmul.f32 %v5957_v39, %v6086_v17 }
  0xbf   :  { %v4939_v48 = vpop.eup %4938  ;;  %695 = vmatpush.bf16.msra.mxu0 %v608_v41  ;;  %v609_v49 = vpack.c.bf16 %v4937_v28, %v4935_v25  ;;  %4950 = vtanh.f32 %v459_v11  ;;  %v186_v54 = vmul.f32 %v5953_v34, %v6093_v55  ;;  %v187_v32 = vmul.f32 %v5957_v39, %v6093_v55  ;;  %v6131_v28 = vpop.permute.xlu2 %253 }
  0xc0   :  { %v4941_v7 = vpop.eup %4940  ;;  %4952 = vtanh.f32 %v464_v47  ;;  %v328_v12 = vadd.f32 %v6111_v23, %v184_v42  ;;  %v329_v43 = vadd.f32 %v6111_v23, %v185_v50  ;;  %v174_v35 = vmul.f32 %v5944_v29, %v6101_v33 }
  0xc1   :  { %v4943_v56 = vpop.eup %4942  ;;  %744 = vmatpush.bf16.msra.mxu1 %v609_v49  ;;  %v610_v10 = vpack.c.bf16 %v4941_v7, %v4939_v48  ;;  %4954 = vtanh.f32 %v460_v1  ;;  %v330_v62 = vadd.f32 %v6111_v23, %v186_v54  ;;  %v331_v52 = vadd.f32 %v6111_v23, %v187_v32  ;;  %v6160_v32 = vpop.permute.xlu0 %257 }
  0xc2   :  { %v4945_v18 = vpop.eup %4944  ;;  %4956 = vtanh.f32 %v465_v51  ;;  %v6129_v25 = vpack.c.bf16 %v5855_v4, %v5855_v4  ;;  %v5789_v42 = vmov 1   ;;  %v175_v7 = vmul.f32 %v5948_v31, %v6101_v33 }
  0xc3   :  { %v4947_v44 = vpop.eup %4946  ;;  %793 = vmatpush.bf16.msra.mxu2 %v610_v10  ;;  %v611_v53 = vpack.c.bf16 %v4945_v18, %v4943_v56  ;;  %4958 = vtanh.f32 %v461_v16  ;;  %4867 = vset.pattern.permute.xlu0 %v5789_v42  ;;  %v176_v56 = vmul.f32 %v5953_v34, %v6101_v33 }
  0xc4   :  { %v4949_v14 = vpop.eup %4948  ;;  %4960 = vtanh.f32 %v466_v26  ;;  %v6117_v63 = vpop.permute.xlu1 %265  ;;  %8791 = vst [vmem:[#allocation13_spill] sm:$0xff] %v6129_v25  ;;  %1138 = vperm.xlu0 %4867, %v6129_v25   ;;  %4866 = vset.pattern.permute.xlu2 %v5789_v42  ;;  %v6138_v26 = vpack.c.bf16 %v5842_v2, %v5842_v2  ;;  %v6150_v2 = vpack.c.bf16 %v5887_v9, %v5887_v9 }
  0xc5   :  { %v4951_v36 = vpop.eup %4950  ;;  %842 = vmatpush.bf16.msra.mxu3 %v611_v53  ;;  %v603_v60 = vpack.c.bf16 %v4949_v14, %v4947_v44  ;;  %v333_v0 = vadd.f32 %v6117_v63, %v189_v24  ;;  %v334_v38 = vadd.f32 %v6117_v63, %v190_v15  ;;  %v335_v30 = vadd.f32 %v6117_v63, %v191_v57 }
  0xc6   :  { %v4953_v27 = vpop.eup %4952  ;;  %v336_v22 = vadd.f32 %v6117_v63, %v192_v13  ;;  %8792 = vst [vmem:[#allocation14_spill] sm:$0xff] %v6138_v26  ;;  %4868 = vset.pattern.permute.xlu1 %v5789_v42  ;;  %v177_v15 = vmul.f32 %v5957_v39, %v6101_v33  ;;  %v318_v57 = vadd.f32 %v6131_v28, %v174_v35 }
  0xc7   :  { %v4955_v45 = vpop.eup %4954  ;;  %696 = vmatpush.bf16.msra.mxu0 %v603_v60  ;;  %v604_v19 = vpack.c.bf16 %v4953_v27, %v4951_v36  ;;  %v398_v46 = vpack.c.bf16 %v333_v0, %v328_v12  ;;  %v399_v11 = vpack.c.bf16 %v334_v38, %v329_v43  ;;  %v400_v47 = vpack.c.bf16 %v335_v30, %v330_v62 }
  0xc8   :  { %v4957_v40 = vpop.eup %4956  ;;  %v401_v51 = vpack.c.bf16 %v336_v22, %v331_v52  ;;  %1129 = vperm.xlu2 %4866, %v6138_v26   ;;  %8793 = vst [vmem:[#allocation15_spill] sm:$0xff] %v6150_v2  ;;  %v319_v12 = vadd.f32 %v6131_v28, %v175_v7  ;;  %v320_v27 = vadd.f32 %v6131_v28, %v176_v56  ;;  %v502_v62 = vunpack.c.l.bf16 %v5972_v61 }
  0xc9   :  { %v4959_v41 = vpop.eup %4958  ;;  %745 = vmatpush.bf16.msra.mxu1 %v604_v19  ;;  %v605_v1 = vpack.c.bf16 %v4957_v40, %v4955_v45  ;;  %v448_v24 = vunpack.c.l.bf16 %v398_v46  ;;  %v453_v48 = vunpack.c.h.bf16 %v398_v46  ;;  %v449_v49 = vunpack.c.l.bf16 %v399_v11  ;;  %v6171_v40 = vpop.permute.xlu2 %80 }
  0xca   :  { %v4961_v50 = vpop.eup %4960  ;;  %v454_v16 = vunpack.c.h.bf16 %v399_v11  ;;  %v450_v18 = vunpack.c.l.bf16 %v400_v47  ;;  %v455_v13 = vunpack.c.h.bf16 %v400_v47  ;;  %v451_v43 = vunpack.c.l.bf16 %v401_v51 }
  0xcb   :  { %794 = vmatpush.bf16.msra.mxu2 %v605_v1  ;;  %v606_v4 = vpack.c.bf16 %v4961_v50, %v4959_v41  ;;  %4962 = vtanh.f32 %v448_v24  ;;  %v456_v9 = vunpack.c.h.bf16 %v401_v51  ;;  %v321_v45 = vadd.f32 %v6131_v28, %v177_v15 }
  0xcc   :  { %4964 = vtanh.f32 %v453_v48  ;;  %1075 = vperm.xlu0 %4867, %v6150_v2   ;;  %v169_v50 = vmul.f32 %v5944_v29, %v6171_v40 }
  0xcd   :  { %843 = vmatpush.bf16.msra.mxu3 %v606_v4  ;;  %v6145_v10 = vpop.permute.xlu1 %90  ;;  %4966 = vtanh.f32 %v449_v49  ;;  %v170_v4 = vmul.f32 %v5948_v31, %v6171_v40 }
  0xce   :  { %v179_v54 = vmul.f32 %v5944_v29, %v6145_v10  ;;  %v180_v44 = vmul.f32 %v5948_v31, %v6145_v10  ;;  %v181_v53 = vmul.f32 %v5953_v34, %v6145_v10  ;;  %v182_v14 = vmul.f32 %v5957_v39, %v6145_v10 }
  0xcf   :  { %4968 = vtanh.f32 %v454_v16 }
  0xd0   :  { %v323_v36 = vadd.f32 %v6160_v32, %v179_v54  ;;  %v324_v60 = vadd.f32 %v6160_v32, %v180_v44  ;;  %v325_v0 = vadd.f32 %v6160_v32, %v181_v53  ;;  %v326_v38 = vadd.f32 %v6160_v32, %v182_v14 }
  0xd1   :  { %v4963_v30 = vpop.eup %4962  ;;  %4970 = vtanh.f32 %v450_v18 }
  0xd2   :  { %v4965_v22 = vpop.eup %4964  ;;  %4972 = vtanh.f32 %v455_v13  ;;  %v393_v35 = vpack.c.bf16 %v323_v36, %v318_v57  ;;  %v394_v19 = vpack.c.bf16 %v324_v60, %v319_v12  ;;  %v395_v52 = vpack.c.bf16 %v325_v0, %v320_v27 }
  0xd3   :  { %v4967_v46 = vpop.eup %4966  ;;  %v598_v11 = vpack.c.bf16 %v4965_v22, %v4963_v30  ;;  %4974 = vtanh.f32 %v451_v43  ;;  %v396_v1 = vpack.c.bf16 %v326_v38, %v321_v45  ;;  %v6187_v43 = vpack.c.bf16 %v5860_v5, %v5860_v5 }
  0xd4   :  { %4976 = vtanh.f32 %v456_v9  ;;  %v438_v47 = vunpack.c.l.bf16 %v393_v35  ;;  %v443_v41 = vunpack.c.h.bf16 %v393_v35  ;;  %v439_v49 = vunpack.c.l.bf16 %v394_v19 }
  0xd5   :  { %v4969_v24 = vpop.eup %4968  ;;  %697 = vmatpush.bf16.msra.mxu0 %v598_v11  ;;  %v6173_v48 = vpop.permute.xlu1 %75  ;;  %v444_v7 = vunpack.c.h.bf16 %v394_v19  ;;  %4978 = vtanh.f32 %v502_v62  ;;  %v440_v16 = vunpack.c.l.bf16 %v395_v52  ;;  %v445_v56 = vunpack.c.h.bf16 %v395_v52  ;;  %8794 = vst [vmem:[#allocation16_spill] sm:$0xff] %v6187_v43  ;;  %1120 = vperm.xlu2 %4866, %v6187_v43  }
  0xd6   :  { %v599_v42 = vpack.c.bf16 %v4969_v24, %v4967_v46  ;;  %4980 = vtanh.f32 %v438_v47  ;;  %v164_v57 = vmul.f32 %v5944_v29, %v6173_v48  ;;  %v165_v18 = vmul.f32 %v5948_v31, %v6173_v48 }
  0xd7   :  { %v4971_v51 = vpop.eup %4970  ;;  %4982 = vtanh.f32 %v443_v41  ;;  %v441_v13 = vunpack.c.l.bf16 %v396_v1  ;;  %v166_v53 = vmul.f32 %v5953_v34, %v6173_v48  ;;  %v446_v14 = vunpack.c.h.bf16 %v396_v1 }
  0xd8   :  { %v4973_v15 = vpop.eup %4972  ;;  %746 = vmatpush.bf16.msra.mxu1 %v599_v42  ;;  %4984 = vtanh.f32 %v439_v49  ;;  %v6191_v29 = vpack.c.bf16 %v5868_v6, %v5868_v6  ;;  %v6195_v31 = vpack.c.bf16 %v5847_v3, %v5847_v3  ;;  %v171_v36 = vmul.f32 %v5953_v34, %v6171_v40  ;;  %v6207_v6 = vpop.permute.xlu0 %245 }
  0xd9   :  { %v4975_v54 = vpop.eup %4974  ;;  %v600_v44 = vpack.c.bf16 %v4973_v15, %v4971_v51  ;;  %4986 = vtanh.f32 %v444_v7  ;;  %v172_v60 = vmul.f32 %v5957_v39, %v6171_v40  ;;  %v167_v5 = vmul.f32 %v5957_v39, %v6173_v48 }
  0xda   :  { %v4977_v12 = vpop.eup %4976  ;;  %8795 = vst [vmem:[#allocation17_spill] sm:$0xff] %v6191_v29  ;;  %4988 = vtanh.f32 %v440_v16  ;;  %1066 = vperm.xlu0 %4867, %v6191_v29   ;;  %v507_v34 = vunpack.c.h.bf16 %v5972_v61  ;;  %1111 = vperm.xlu1 %4868, %v6195_v31   ;;  %v308_v30 = vadd.f32 %v6207_v6, %v164_v57  ;;  %v309_v27 = vadd.f32 %v6207_v6, %v165_v18 }
  0xdb   :  { %8796 = vst [vmem:[#allocation18_spill] sm:$0xff] %v6195_v31  ;;  %795 = vmatpush.bf16.msra.mxu2 %v600_v44  ;;  %v601_v9 = vpack.c.bf16 %v4977_v12, %v4975_v54  ;;  %v6201_v0 = vpop.eup %4978  ;;  %4990 = vtanh.f32 %v445_v56  ;;  %v310_v39 = vadd.f32 %v6207_v6, %v166_v53  ;;  %v311_v11 = vadd.f32 %v6207_v6, %v167_v5  ;;  %v5682_v56 = vld [vmem:[%s8698_s1 + $0x50] sm:$0xff] }
  0xdc   :  { %v4981_v3 = vpop.eup %4980  ;;  %4992 = vtanh.f32 %v441_v13  ;;  %v492_v47 = vunpack.c.l.bf16 %v6031_v59  ;;  %v6224_v41 = vpack.c.bf16 %v5878_v8, %v5878_v8  ;;  %v6233_v15 = vpack.c.bf16 %v5682_v56, %v5682_v56 }
  0xdd   :  { %844 = vmatpush.bf16.msra.mxu3 %v601_v9  ;;  %v4983_v38 = vpop.eup %4982  ;;  %4994 = vtanh.f32 %v446_v14 }
  0xde   :  { %v6214_v62 = vpop.permute.xlu1 %249  ;;  %v4985_v22 = vpop.eup %4984  ;;  %v593_v52 = vpack.c.bf16 %v4983_v38, %v4981_v3  ;;  %8797 = vst [vmem:[#allocation19_spill] sm:$0xff] %v6224_v41  ;;  %4996 = vtanh.f32 %v507_v34  ;;  %1102 = vperm.xlu2 %4866, %v6224_v41   ;;  %v5683_v3 = vld [vmem:[%s8698_s1 + $0x30] sm:$0xff]  ;;  %v193_v38 = vmul.f32 %v5931_v20, %v6086_v17  ;;  %v487_v17 = vunpack.c.h.bf16 %v6055_v58 }
  0xdf   :  { %v313_v45 = vadd.f32 %v6214_v62, %v169_v50  ;;  %v314_v35 = vadd.f32 %v6214_v62, %v170_v4  ;;  %v315_v19 = vadd.f32 %v6214_v62, %v171_v36  ;;  %v316_v61 = vadd.f32 %v6214_v62, %v172_v60  ;;  %v4987_v46 = vpop.eup %4986  ;;  %v8798_v50 = vld [vmem:[#allocation11_spill] sm:$0xff]  ;;  %8800 = vst [vmem:[#allocation20_spill] sm:$0xff] %v6233_v15 }
  0xe0   :  { %v4989_v1 = vpop.eup %4988  ;;  %v6228_v7 = vpack.c.bf16 %v8798_v50, %v8798_v50  ;;  %698 = vmatpush.bf16.msra.mxu0 %v593_v52  ;;  %v594_v16 = vpack.c.bf16 %v4987_v46, %v4985_v22  ;;  %4998 = vtanh.f32 %v492_v47  ;;  %v6241_v34 = vpack.c.bf16 %v5683_v3, %v5683_v3 }
  0xe1   :  { %v388_v24 = vpack.c.bf16 %v313_v45, %v308_v30  ;;  %v389_v49 = vpack.c.bf16 %v314_v35, %v309_v27  ;;  %v390_v42 = vpack.c.bf16 %v315_v19, %v310_v39  ;;  %v4991_v51 = vpop.eup %4990  ;;  %v391_v4 = vpack.c.bf16 %v316_v61, %v311_v11  ;;  %v8802_v27 = vld [vmem:[#allocation12_spill] sm:$0xff] }
  0xe2   :  { %8799 = vst [vmem:[#allocation11_spill] sm:$0xff] %v6228_v7  ;;  %v4993_v8 = vpop.eup %4992  ;;  %v595_v57 = vpack.c.bf16 %v4991_v51, %v4989_v1  ;;  %747 = vmatpush.bf16.msra.mxu1 %v594_v16  ;;  %1021 = vperm.xlu0 %4867, %v6228_v7   ;;  %v497_v30 = vunpack.c.h.bf16 %v6031_v59  ;;  %v6248_v39 = vpack.c.bf16 %v8802_v27, %v8802_v27  ;;  %v482_v45 = vunpack.c.l.bf16 %v6055_v58  ;;  %v5684_v35 = vld [vmem:[%s8698_s1 + $0x48] sm:$0xff] }
  0xe3   :  { %v428_v18 = vunpack.c.l.bf16 %v388_v24  ;;  %v433_v13 = vunpack.c.h.bf16 %v388_v24  ;;  %v429_v54 = vunpack.c.l.bf16 %v389_v49  ;;  %v4995_v44 = vpop.eup %4994  ;;  %v434_v53 = vunpack.c.h.bf16 %v389_v49  ;;  %1093 = vperm.xlu1 %4868, %v6233_v15   ;;  %8801 = vst [vmem:[#allocation21_spill] sm:$0xff] %v6241_v34 }
  0xe4   :  { %796 = vmatpush.bf16.msra.mxu2 %v595_v57  ;;  %v596_v14 = vpack.c.bf16 %v4995_v44, %v4993_v8  ;;  %v430_v12 = vunpack.c.l.bf16 %v390_v42  ;;  %v435_v9 = vunpack.c.h.bf16 %v390_v42  ;;  %v431_v36 = vunpack.c.l.bf16 %v391_v4  ;;  %v4997_v60 = vpop.eup %4996  ;;  %8803 = vst [vmem:[#allocation12_spill] sm:$0xff] %v6248_v39 }
  0xe5   :  { %5000 = vtanh.f32 %v428_v18  ;;  %v436_v5 = vunpack.c.h.bf16 %v391_v4  ;;  %v6254_v19 = vpack.c.bf16 %v5684_v35, %v5684_v35  ;;  %v188_v59 = vmul.f32 %v5931_v20, %v6093_v55  ;;  %v6268_v55 = vld [vmem:[%s8699_s2] sm:$0xff]  ;;  %v5685_v4 = vld [vmem:[%s8698_s1 + $0x28] sm:$0xff] }
  0xe6   :  { %5002 = vtanh.f32 %v433_v13  ;;  %845 = vmatpush.bf16.msra.mxu3 %v596_v14  ;;  %v4999_v22 = vpop.eup %4998  ;;  %1057 = vperm.xlu2 %4866, %v6241_v34   ;;  %v337_v52 = vadd.f32 %v6117_v63, %v193_v38  ;;  %v183_v24 = vmul.f32 %v5931_v20, %v6145_v10  ;;  %v627_v58 = vpack.c.bf16 %v4997_v60, %v6201_v0 }
  0xe7   :  { %5004 = vtanh.f32 %v429_v54  ;;  %8804 = vst [vmem:[#allocation22_spill] sm:$0xff] %v6254_v19  ;;  %v472_v49 = vunpack.c.l.bf16 %v6072_v37  ;;  %v477_v50 = vunpack.c.h.bf16 %v6072_v37  ;;  %v332_v10 = vadd.f32 %v6111_v23, %v188_v59 }
  0xe8   :  { %5006 = vtanh.f32 %v434_v53  ;;  %v178_v0 = vmul.f32 %v5931_v20, %v6101_v33  ;;  %v6279_v16 = vpack.c.bf16 %v5685_v4, %v5685_v4  ;;  %v173_v8 = vmul.f32 %v5931_v20, %v6171_v40  ;;  %v5686_v40 = vld [vmem:[%s8698_s1 + $0x20] sm:$0xff]  ;;  %v6335_v4 = vld [vmem:[%s8699_s2 + $0x18] sm:$0xff] }
  0xe9   :  { %5008 = vtanh.f32 %v430_v12  ;;  %v402_v18 = vpack.c.bf16 %v337_v52, %v332_v10  ;;  %v327_v23 = vadd.f32 %v6160_v32, %v183_v24  ;;  %v462_v33 = vunpack.c.l.bf16 %v6088_v21 }
  0xea   :  { %5010 = vtanh.f32 %v435_v9  ;;  %1012 = vperm.xlu0 %4867, %v6248_v39   ;;  %8805 = vst [vmem:[#allocation23_spill] sm:$0xff] %v6279_v16  ;;  %v467_v44 = vunpack.c.h.bf16 %v6088_v21  ;;  %v6290_v53 = vpack.c.bf16 %v5686_v40, %v5686_v40  ;;  %v322_v32 = vadd.f32 %v6131_v28, %v178_v0  ;;  %v6326_v0 = vld [vmem:[%s8699_s2 + $0x10] sm:$0xff]  ;;  %v6385_v40 = vld [vmem:[%s8699_s2 + $0x38] sm:$0xff] }
  0xeb   :  { %v5001_v61 = vpop.eup %5000  ;;  %5012 = vtanh.f32 %v431_v36  ;;  %1084 = vperm.xlu1 %4868, %v6254_v19   ;;  %v168_v12 = vmul.f32 %v5931_v20, %v6173_v48  ;;  %v317_v21 = vadd.f32 %v6214_v62, %v173_v8  ;;  %v452_v60 = vunpack.c.l.bf16 %v402_v18  ;;  %v5687_v62 = vld [vmem:[%s8698_s1] sm:$0xff]  ;;  %v6353_v8 = vld [vmem:[%s8699_s2 + $0x28] sm:$0xff] }
  0xec   :  { %v5003_v46 = vpop.eup %5002  ;;  %5014 = vtanh.f32 %v436_v5  ;;  %8806 = vst [vmem:[#allocation24_spill] sm:$0xff] %v6290_v53  ;;  %v397_v5 = vpack.c.bf16 %v327_v23, %v322_v32  ;;  %v457_v28 = vunpack.c.h.bf16 %v402_v18  ;;  %v6305_v38 = vpack.c.bf16 %v5687_v62, %v5687_v62  ;;  %v6368_v23 = vld [vmem:[%s8699_s2 + $0x30] sm:$0xff] }
  0xed   :  { %v5005_v11 = vpop.eup %5004  ;;  %v588_v47 = vpack.c.bf16 %v5003_v46, %v5001_v61  ;;  %5016 = vtanh.f32 %v497_v30  ;;  %v312_v48 = vadd.f32 %v6207_v6, %v168_v12  ;;  %v5688_v6 = vld [vmem:[%s8698_s1 + $0x18] sm:$0xff] }
  0xee   :  { %v5007_v1 = vpop.eup %5006  ;;  %5018 = vtanh.f32 %v482_v45  ;;  %1048 = vperm.xlu2 %4866, %v6279_v16   ;;  %8807 = vst [vmem:[#allocation25_spill] sm:$0xff] %v6305_v38  ;;  %v447_v45 = vunpack.c.h.bf16 %v397_v5  ;;  %v6310_v35 = vpack.c.bf16 %v5688_v6, %v5688_v6 }
  0xef   :  { %v5009_v63 = vpop.eup %5008  ;;  %699 = vmatpush.bf16.msra.mxu0 %v588_v47  ;;  %v589_v42 = vpack.c.bf16 %v5007_v1, %v5005_v11  ;;  %5020 = vtanh.f32 %v487_v17  ;;  %v392_v27 = vpack.c.bf16 %v317_v21, %v312_v48  ;;  %v6316_v11 = vld [vmem:[%s8699_s2 + $0x8] sm:$0xff] }
  0xf0   :  { %v5011_v51 = vpop.eup %5010  ;;  %5022 = vtanh.f32 %v472_v49  ;;  %8808 = vst [vmem:[#allocation26_spill] sm:$0xff] %v6310_v35 }
  0xf1   :  { %v5013_v56 = vpop.eup %5012  ;;  %748 = vmatpush.bf16.msra.mxu1 %v589_v42  ;;  %v590_v57 = vpack.c.bf16 %v5011_v51, %v5009_v63  ;;  %5024 = vtanh.f32 %v477_v50  ;;  %v432_v59 = vunpack.c.l.bf16 %v392_v27  ;;  %v437_v52 = vunpack.c.h.bf16 %v392_v27 }
  0xf2   :  { %v5015_v37 = vpop.eup %5014  ;;  %700 = vmatmul.bf16.vlgmr.msra.gmra.mxu0 %v6268_v55  ;;  %5026 = vtanh.f32 %v462_v33 }
  0xf3   :  { %888 = vmatpush.bf16.msrb.mxu0 %v627_v58  ;;  %v5017_v13 = vpop.eup %5016  ;;  %797 = vmatpush.bf16.msra.mxu2 %v590_v57  ;;  %v591_v54 = vpack.c.bf16 %v5015_v37, %v5013_v56  ;;  %5028 = vtanh.f32 %v467_v44  ;;  %v6344_v56 = vld [vmem:[%s8699_s2 + $0x20] sm:$0xff] }
  0xf4   :  { %v5019_v14 = vpop.eup %5018  ;;  %749 = vmatmul.bf16.vlgmr.msra.gmra.mxu1 %v6268_v55  ;;  %v622_v9 = vpack.c.bf16 %v5017_v13, %v4999_v22  ;;  %1039 = vperm.xlu1 %4868, %v6290_v53   ;;  %5030 = vtanh.f32 %v452_v60  ;;  %v442_v22 = vunpack.c.l.bf16 %v397_v5 }
  0xf5   :  { %v5021_v36 = vpop.eup %5020  ;;  %846 = vmatpush.bf16.msra.mxu3 %v591_v54  ;;  %5032 = vtanh.f32 %v457_v28 }
  0xf6   :  { %798 = vmatmul.bf16.vlgmr.msra.gmra.mxu2 %v6268_v55  ;;  %v5023_v20 = vpop.eup %5022  ;;  %v617_v3 = vpack.c.bf16 %v5021_v36, %v5019_v14  ;;  %1003 = vperm.xlu2 %4866, %v6305_v38   ;;  %5034 = vtanh.f32 %v442_v22  ;;  %v5790_v36 = vmov 839922192  }
  0xf7   :  { %889 = vmatpush.bf16.msrb.mxu0 %v622_v9  ;;  %v5025_v30 = vpop.eup %5024  ;;  %5036 = vtanh.f32 %v447_v45  ;;  %v1007_v21 = vunpack.c.l.s4 %v5790_v36 }
  0xf8   :  { %847 = vmatmul.bf16.vlgmr.msra.gmra.mxu3 %v6268_v55  ;;  %v5027_v61 = vpop.eup %5026  ;;  %v612_v17 = vpack.c.bf16 %v5025_v30, %v5023_v20  ;;  %5038 = vtanh.f32 %v432_v59 }
  0xf9   :  { %v5029_v46 = vpop.eup %5028  ;;  %5040 = vtanh.f32 %v437_v52  ;;  %v6399_v28 = vunpack.c.0.s8 %v1007_v21 }
  0xfa   :  { %v5031_v47 = vpop.eup %5030  ;;  %v607_v1 = vpack.c.bf16 %v5029_v46, %v5027_v61 }
  0xfb   :  { %890 = vmatpush.bf16.msrb.mxu0 %v617_v3  ;;  %v5033_v24 = vpop.eup %5032  ;;  %8809 = vst [vmem:[#allocation27_spill] sm:$0xff] %v6399_v28 }
  0xfc   :  { %1030 = vperm.xlu1 %4868, %v6310_v35   ;;  %v5035_v58 = vpop.eup %5034  ;;  %v602_v49 = vpack.c.bf16 %v5033_v24, %v5031_v47 }
  0xfd   :  { %v5037_v63 = vpop.eup %5036 }
  0xfe   :  { %v5039_v42 = vpop.eup %5038  ;;  %v597_v50 = vpack.c.bf16 %v5037_v63, %v5035_v58 }
  0xff   :  { %891 = vmatpush.bf16.msrb.mxu0 %v612_v17  ;;  %v5041_v51 = vpop.eup %5040 }
 0x100   :  { %v592_v10 = vpack.c.bf16 %v5041_v51, %v5039_v42 }
 0x102   :  { %705 = vmatmul.bf16.gmra.mxu0 %v6316_v11 }
 0x103   :  { %892 = vmatpush.bf16.msrb.mxu0 %v607_v1 }
 0x104   :  { %754 = vmatmul.bf16.gmra.mxu1 %v6316_v11 }
 0x106   :  { %803 = vmatmul.bf16.gmra.mxu2 %v6316_v11 }
 0x107   :  { %893 = vmatpush.bf16.msrb.mxu0 %v602_v49 }
 0x108   :  { %852 = vmatmul.bf16.gmra.mxu3 %v6316_v11 }
 0x10b   :  { %894 = vmatpush.bf16.msrb.mxu0 %v597_v50 }
 0x10f   :  { %895 = vmatpush.bf16.msrb.mxu0 %v592_v10 }
 0x112   :  { %710 = vmatmul.bf16.gmra.mxu0 %v6326_v0 }
 0x114   :  { %759 = vmatmul.bf16.gmra.mxu1 %v6326_v0 }
 0x116   :  { %808 = vmatmul.bf16.gmra.mxu2 %v6326_v0 }
 0x118   :  { %857 = vmatmul.bf16.gmra.mxu3 %v6326_v0 }
 0x122   :  { %715 = vmatmul.bf16.gmra.mxu0 %v6335_v4  ;;  %v6355_v57 = vpop.permute.xlu2 %1129 }
 0x123   :  { %v1135_v35 = vperm.slane %v6355_v57, %v6399_v28 }
 0x124   :  { %764 = vmatmul.bf16.gmra.mxu1 %v6335_v4 }
 0x125   :  { %v6520_v57 = vunpack.c.l.bf16 %v1135_v35 }
 0x126   :  { %813 = vmatmul.bf16.gmra.mxu2 %v6335_v4 }
 0x128   :  { %862 = vmatmul.bf16.gmra.mxu3 %v6335_v4 }
 0x12f   :  { %v6361_v37 = vpop.permute.xlu2 %1120 }
 0x132   :  { %720 = vmatmul.bf16.gmra.mxu0 %v6344_v56 }
 0x134   :  { %769 = vmatmul.bf16.gmra.mxu1 %v6344_v56 }
 0x136   :  { %818 = vmatmul.bf16.gmra.mxu2 %v6344_v56  ;;  %v6363_v18 = vpop.permute.xlu0 %1138 }
 0x138   :  { %867 = vmatmul.bf16.gmra.mxu3 %v6344_v56  ;;  %v6372_v33 = vpop.permute.xlu2 %1102 }
 0x13e   :  { %v6374_v13 = vpop.permute.xlu0 %1075 }
 0x13f   :  { %v1081_v29 = vperm.slane %v6374_v13, %v6399_v28 }
 0x140   :  { %v6380_v44 = vpop.permute.xlu2 %1057 }
 0x142   :  { %725 = vmatmul.bf16.gmra.mxu0 %v6353_v8 }
 0x144   :  { %774 = vmatmul.bf16.gmra.mxu1 %v6353_v8 }
 0x146   :  { %823 = vmatmul.bf16.gmra.mxu2 %v6353_v8 }
 0x148   :  { %872 = vmatmul.bf16.gmra.mxu3 %v6353_v8  ;;  %v6395_v12 = vpop.permute.xlu2 %1048 }
 0x14c   :  { %v6378_v54 = vpop.permute.xlu1 %1111  ;;  %v6387_v14 = vpop.permute.xlu0 %1066 }
 0x150   :  { %v1004_v48 = vpop.permute.xlu2 %1003 }
 0x151   :  { %v1009_v30 = vperm.slane %v1004_v48, %v6399_v28 }
 0x152   :  { %730 = vmatmul.bf16.gmra.mxu0 %v6368_v23 }
 0x153   :  { %v6404_v6 = vunpack.c.l.bf16 %v1009_v30 }
 0x154   :  { %779 = vmatmul.bf16.gmra.mxu1 %v6368_v23  ;;  %v1022_v9 = vpop.permute.xlu0 %1021 }
 0x155   :  { %v6391_v32 = vpop.permute.xlu1 %1093  ;;  %8810 = vst [vmem:[#allocation28_spill] sm:$0xff] %v6404_v6 }
 0x156   :  { %828 = vmatmul.bf16.gmra.mxu2 %v6368_v23 }
 0x158   :  { %877 = vmatmul.bf16.gmra.mxu3 %v6368_v23 }
 0x15c   :  { %v1013_v62 = vpop.permute.xlu0 %1012 }
 0x15d   :  { %v6397_v60 = vpop.permute.xlu1 %1084  ;;  %v1018_v27 = vperm.slane %v1013_v62, %v6399_v28  ;;  %v1027_v62 = vperm.slane %v1022_v9, %v6399_v28 }
 0x15e   :  { %v1090_v13 = vperm.slane %v6397_v60, %v6399_v28 }
 0x15f   :  { %v6406_v52 = vunpack.c.l.bf16 %v1018_v27 }
 0x161   :  { %8811 = vst [vmem:[#allocation29_spill] sm:$0xff] %v6406_v52 }
 0x162   :  { %735 = vmatmul.bf16.gmra.mxu0 %v6385_v40 }
 0x164   :  { %784 = vmatmul.bf16.gmra.mxu1 %v6385_v40 }
 0x166   :  { %833 = vmatmul.bf16.gmra.mxu2 %v6385_v40  ;;  %v1040_v45 = vpop.permute.xlu1 %1039 }
 0x168   :  { %882 = vmatmul.bf16.gmra.mxu3 %v6385_v40 }
 0x16f   :  { %v701_v5 = vpop.f32.mrf.mxu0 }
 0x171   :  { %v750_v20 = vpop.f32.mrf.mxu1 }
 0x172   :  { %v953_v3 = vpack.c.bf16 %v750_v20, %v701_v5  ;;  %896 = vmatmul.bf16.vlgmr.msrb.gmra.mxu0 %v6268_v55 }
 0x174   :  { %v1145_v46 = vunpack.c.l.bf16 %v953_v3  ;;  %v1146_v59 = vunpack.c.h.bf16 %v953_v3  ;;  %v1031_v3 = vpop.permute.xlu1 %1030 }
 0x175   :  { %v1036_v30 = vperm.slane %v1031_v3, %v6399_v28 }
 0x176   :  { %v1241_v49 = vadd.f32 %v6404_v6, %v1145_v46  ;;  %v1242_v63 = vadd.f32 %v6404_v6, %v1146_v59 }
 0x177   :  { %v703_v22 = vpop.f32.mrf.mxu0  ;;  %v6427_v59 = vunpack.c.l.bf16 %v1036_v30 }
 0x179   :  { %v799_v61 = vpop.f32.mrf.mxu2  ;;  %v752_v17 = vpop.f32.mrf.mxu1  ;;  %8813 = vst [vmem:[#allocation31_spill] sm:$0xff] %v6427_v59 }
 0x17a   :  { %v956_v47 = vpack.c.bf16 %v752_v17, %v703_v22  ;;  %v6425_v17 = vunpack.c.l.bf16 %v1027_v62 }
 0x17b   :  { %v848_v1 = vpop.f32.mrf.mxu3 }
 0x17c   :  { %v6408_v24 = vpack.c.bf16 %v848_v1, %v799_v61  ;;  %v1150_v55 = vunpack.c.l.bf16 %v956_v47  ;;  %v1151_v58 = vunpack.c.h.bf16 %v956_v47 }
 0x17e   :  { %v1246_v42 = vadd.f32 %v6406_v52, %v1150_v55  ;;  %v1247_v50 = vadd.f32 %v6406_v52, %v1151_v58  ;;  %v1148_v35 = vunpack.c.h.bf16 %v6408_v24 }
 0x17f   :  { %v706_v36 = vpop.f32.mrf.mxu0 }
 0x180   :  { %v6414_v51 = vpack.c.bf16 %v1246_v42, %v1241_v49  ;;  %v6416_v10 = vpack.c.bf16 %v1247_v50, %v1242_v63 }
 0x181   :  { %v6418_v21 = vpop.f32.mrf.mxu2  ;;  %v755_v5 = vpop.f32.mrf.mxu1 }
 0x182   :  { %8812 = vst [vmem:[#allocation30_spill] sm:$0xff] %v6416_v10  ;;  %v959_v20 = vpack.c.bf16 %v755_v5, %v706_v36  ;;  %901 = vmatmul.bf16.gmra.mxu0 %v6316_v11 }
 0x183   :  { %v6420_v48 = vpop.f32.mrf.mxu3 }
 0x184   :  { %v1155_v46 = vunpack.c.l.bf16 %v959_v20  ;;  %v1156_v1 = vunpack.c.h.bf16 %v959_v20  ;;  %v6546_v60 = vpack.c.bf16 %v6420_v48, %v6418_v21 }
 0x186   :  { %v1251_v63 = vadd.f32 %v6425_v17, %v1155_v46  ;;  %v1252_v42 = vadd.f32 %v6425_v17, %v1156_v1 }
 0x187   :  { %v708_v27 = vpop.f32.mrf.mxu0 }
 0x189   :  { %v804_v22 = vpop.f32.mrf.mxu2  ;;  %v757_v61 = vpop.f32.mrf.mxu1 }
 0x18a   :  { %v962_v47 = vpack.c.bf16 %v757_v61, %v708_v27  ;;  %v1045_v61 = vperm.slane %v1040_v45, %v6399_v28 }
 0x18b   :  { %v853_v55 = vpop.f32.mrf.mxu3 }
 0x18c   :  { %v6429_v58 = vpack.c.bf16 %v853_v55, %v804_v22  ;;  %v1160_v49 = vunpack.c.l.bf16 %v962_v47  ;;  %v1161_v11 = vunpack.c.h.bf16 %v962_v47  ;;  %v1054_v22 = vperm.slane %v6395_v12, %v6399_v28 }
 0x18e   :  { %v1256_v9 = vadd.f32 %v6427_v59, %v1160_v49  ;;  %v1257_v50 = vadd.f32 %v6427_v59, %v1161_v11  ;;  %v6447_v55 = vunpack.c.l.bf16 %v1054_v22  ;;  %v6449_v49 = vunpack.c.l.bf16 %v1045_v61 }
 0x18f   :  { %v711_v5 = vpop.f32.mrf.mxu0  ;;  %v1144_v59 = vperm.slane %v6363_v18, %v6399_v28  ;;  %v1117_v18 = vperm.slane %v6378_v54, %v6399_v28  ;;  %v6538_v54 = vunpack.c.l.bf16 %v1081_v29 }
 0x190   :  { %v6435_v36 = vpack.c.bf16 %v1256_v9, %v1251_v63  ;;  %v6437_v3 = vpack.c.bf16 %v1257_v50, %v1252_v42  ;;  %8815 = vst [vmem:[#allocation33_spill] sm:$0xff] %v6447_v55 }
 0x191   :  { %v6439_v62 = vpop.f32.mrf.mxu2  ;;  %v760_v20 = vpop.f32.mrf.mxu1  ;;  %8816 = vst [vmem:[#allocation34_spill] sm:$0xff] %v6449_v49  ;;  %v6542_v53 = vunpack.c.l.bf16 %v1117_v18  ;;  %v1361_v18 = vunpack.c.l.bf16 %v6414_v51 }
 0x192   :  { %8814 = vst [vmem:[#allocation32_spill] sm:$0xff] %v6437_v3  ;;  %v965_v30 = vpack.c.bf16 %v760_v20, %v711_v5  ;;  %906 = vmatmul.bf16.gmra.mxu0 %v6326_v0 }
 0x193   :  { %v6441_v27 = vpop.f32.mrf.mxu3 }
 0x194   :  { %v1165_v11 = vunpack.c.l.bf16 %v965_v30  ;;  %v1166_v9 = vunpack.c.h.bf16 %v965_v30 }
 0x196   :  { %v1261_v20 = vadd.f32 %v6449_v49, %v1165_v11  ;;  %v1262_v45 = vadd.f32 %v6449_v49, %v1166_v9  ;;  %v1063_v11 = vperm.slane %v6380_v44, %v6399_v28 }
 0x197   :  { %v713_v46 = vpop.f32.mrf.mxu0 }
 0x199   :  { %v809_v47 = vpop.f32.mrf.mxu2  ;;  %v762_v1 = vpop.f32.mrf.mxu1 }
 0x19a   :  { %v968_v63 = vpack.c.bf16 %v762_v1, %v713_v46 }
 0x19b   :  { %v858_v42 = vpop.f32.mrf.mxu3 }
 0x19c   :  { %v6451_v50 = vpack.c.bf16 %v858_v42, %v809_v47  ;;  %v1170_v5 = vunpack.c.l.bf16 %v968_v63  ;;  %v1171_v0 = vunpack.c.h.bf16 %v968_v63  ;;  %v1072_v63 = vperm.slane %v6387_v14, %v6399_v28 }
 0x19e   :  { %v1266_v12 = vadd.f32 %v6447_v55, %v1170_v5  ;;  %v1267_v39 = vadd.f32 %v6447_v55, %v1171_v0  ;;  %v6466_v0 = vunpack.c.l.bf16 %v1063_v11 }
 0x19f   :  { %v716_v61 = vpop.f32.mrf.mxu0 }
 0x1a0   :  { %v6457_v22 = vpack.c.bf16 %v1266_v12, %v1261_v20  ;;  %v6459_v38 = vpack.c.bf16 %v1267_v39, %v1262_v45  ;;  %v6468_v20 = vunpack.c.l.bf16 %v1072_v63 }
 0x1a1   :  { %v811_v46 = vpop.f32.mrf.mxu2  ;;  %v765_v30 = vpop.f32.mrf.mxu1 }
 0x1a2   :  { %8817 = vst [vmem:[#allocation35_spill] sm:$0xff] %v6459_v38  ;;  %v971_v1 = vpack.c.bf16 %v765_v30, %v716_v61  ;;  %911 = vmatmul.bf16.gmra.mxu0 %v6335_v4  ;;  %v6526_v38 = vunpack.c.l.bf16 %v1144_v59 }
 0x1a3   :  { %v860_v47 = vpop.f32.mrf.mxu3  ;;  %8818 = vst [vmem:[#allocation36_spill] sm:$0xff] %v6468_v20 }
 0x1a4   :  { %v1175_v39 = vunpack.c.l.bf16 %v971_v1  ;;  %v1176_v45 = vunpack.c.h.bf16 %v971_v1 }
 0x1a6   :  { %v1271_v44 = vadd.f32 %v6466_v0, %v1175_v39  ;;  %v1272_v14 = vadd.f32 %v6466_v0, %v1176_v45 }
 0x1a7   :  { %v718_v9 = vpop.f32.mrf.mxu0 }
 0x1a9   :  { %v814_v42 = vpop.f32.mrf.mxu2  ;;  %v767_v5 = vpop.f32.mrf.mxu1 }
 0x1aa   :  { %v974_v12 = vpack.c.bf16 %v767_v5, %v718_v9 }
 0x1ab   :  { %v863_v61 = vpop.f32.mrf.mxu3 }
 0x1ac   :  { %v6470_v30 = vpack.c.bf16 %v863_v61, %v814_v42  ;;  %v1180_v4 = vunpack.c.l.bf16 %v974_v12  ;;  %v1181_v7 = vunpack.c.h.bf16 %v974_v12 }
 0x1ae   :  { %v1276_v16 = vadd.f32 %v6468_v20, %v1180_v4  ;;  %v1277_v10 = vadd.f32 %v6468_v20, %v1181_v7 }
 0x1af   :  { %v721_v63 = vpop.f32.mrf.mxu0 }
 0x1b0   :  { %v6476_v11 = vpack.c.bf16 %v1276_v16, %v1271_v44  ;;  %v6478_v52 = vpack.c.bf16 %v1277_v10, %v1272_v14  ;;  %v6491_v16 = vpack.c.bf16 %v860_v47, %v811_v46 }
 0x1b1   :  { %v816_v9 = vpop.f32.mrf.mxu2  ;;  %v770_v1 = vpop.f32.mrf.mxu1 }
 0x1b2   :  { %8819 = vst [vmem:[#allocation37_spill] sm:$0xff] %v6478_v52  ;;  %v6480_v5 = vpack.c.bf16 %v770_v1, %v721_v63  ;;  %916 = vmatmul.bf16.gmra.mxu0 %v6344_v56  ;;  %v1168_v56 = vunpack.c.h.bf16 %v6451_v50  ;;  %v1173_v63 = vunpack.c.h.bf16 %v6491_v16 }
 0x1b3   :  { %v865_v42 = vpop.f32.mrf.mxu3  ;;  %8820 = vst [vmem:[#allocation38_spill] sm:$0xff] %v6491_v16 }
 0x1b4   :  { %v6498_v1 = vpack.c.bf16 %v865_v42, %v816_v9  ;;  %v1108_v42 = vperm.slane %v6372_v33, %v6399_v28  ;;  %v1099_v33 = vperm.slane %v6391_v32, %v6399_v28 }
 0x1b7   :  { %v6483_v12 = vpop.f32.mrf.mxu0 }
 0x1b9   :  { %v819_v39 = vpop.f32.mrf.mxu2  ;;  %v6485_v61 = vpop.f32.mrf.mxu1 }
 0x1bb   :  { %v868_v45 = vpop.f32.mrf.mxu3 }
 0x1bc   :  { %v6487_v4 = vpack.c.bf16 %v868_v45, %v819_v39  ;;  %v1264_v39 = vadd.f32 %v6449_v49, %v1168_v56  ;;  %v1269_v45 = vadd.f32 %v6447_v55, %v1173_v63  ;;  %v1178_v56 = vunpack.c.h.bf16 %v6470_v30 }
 0x1bd   :  { %v1183_v63 = vunpack.c.h.bf16 %v6498_v1  ;;  %v1147_v49 = vunpack.c.l.bf16 %v6408_v24 }
 0x1be   :  { %v1334_v34 = vpack.c.bf16 %v1269_v45, %v1264_v39  ;;  %v6533_v39 = vunpack.c.l.bf16 %v1108_v42 }
 0x1bf   :  { %v6489_v7 = vpop.f32.mrf.mxu0  ;;  %v6553_v29 = vadd.f32 %v6404_v6, %v1147_v49 }
 0x1c0   :  { %v1384_v59 = vunpack.c.l.bf16 %v1334_v34  ;;  %v1389_v24 = vunpack.c.h.bf16 %v1334_v34  ;;  %v1366_v34 = vunpack.c.h.bf16 %v6414_v51 }
 0x1c1   :  { %v821_v10 = vpop.f32.mrf.mxu2  ;;  %v6493_v44 = vpop.f32.mrf.mxu1  ;;  %8821 = vst [vmem:[#allocation39_spill] sm:$0xff] %v6553_v29 }
 0x1c2   :  { %921 = vmatmul.bf16.gmra.mxu0 %v6353_v8  ;;  %v1126_v8 = vperm.slane %v6361_v37, %v6399_v28  ;;  %5042 = vtanh.f32 %v1384_v59 }
 0x1c3   :  { %v870_v14 = vpop.f32.mrf.mxu3  ;;  %5044 = vtanh.f32 %v1389_v24 }
 0x1c4   :  { %v6518_v55 = vpack.c.bf16 %v870_v14, %v821_v10  ;;  %v6522_v37 = vunpack.c.l.bf16 %v1126_v8  ;;  %v1274_v10 = vadd.f32 %v6466_v0, %v1178_v56  ;;  %v1279_v14 = vadd.f32 %v6468_v20, %v1183_v63 }
 0x1c5   :  { %v1188_v8 = vunpack.c.h.bf16 %v6487_v4  ;;  %v6550_v56 = vunpack.c.l.bf16 %v1099_v33  ;;  %v6555_v63 = vunpack.c.l.bf16 %v1090_v13  ;;  %v6560_v20 = vadd.f32 %v6404_v6, %v1148_v35 }
 0x1c6   :  { %v1193_v32 = vunpack.c.h.bf16 %v6518_v55  ;;  %v1339_v21 = vpack.c.bf16 %v1279_v14, %v1274_v10  ;;  %5046 = vtanh.f32 %v1361_v18 }
 0x1c7   :  { %v6500_v3 = vpop.f32.mrf.mxu0  ;;  %8822 = vst [vmem:[#allocation40_spill] sm:$0xff] %v6560_v20  ;;  %v1284_v49 = vadd.f32 %v6538_v54, %v1188_v8  ;;  %5048 = vtanh.f32 %v1366_v34 }
 0x1c8   :  { %v1394_v14 = vunpack.c.l.bf16 %v1339_v21  ;;  %v1399_v8 = vunpack.c.h.bf16 %v1339_v21  ;;  %v6588_v10 = vpop.eup %5042 }
 0x1c9   :  { %v824_v46 = vpop.f32.mrf.mxu2  ;;  %v6504_v47 = vpop.f32.mrf.mxu1  ;;  %8823 = vst [vmem:[#allocation41_spill] sm:$0xff] %v6588_v10 }
 0x1ca   :  { %5050 = vtanh.f32 %v1394_v14 }
 0x1cb   :  { %v873_v9 = vpop.f32.mrf.mxu3  ;;  %5052 = vtanh.f32 %v1399_v8 }
 0x1cc   :  { %v6548_v42 = vpack.c.bf16 %v873_v9, %v824_v46  ;;  %v1185_v46 = vunpack.c.l.bf16 %v6480_v5  ;;  %v1289_v9 = vadd.f32 %v6555_v63, %v1193_v32 }
 0x1ce   :  { %v6580_v32 = vadd.f32 %v6538_v54, %v1185_v46  ;;  %v1344_v24 = vpack.c.bf16 %v1289_v9, %v1284_v49  ;;  %v1371_v46 = vunpack.c.l.bf16 %v6435_v36  ;;  %v6596_v49 = vpop.eup %5044  ;;  %v1376_v9 = vunpack.c.h.bf16 %v6435_v36 }
 0x1cf   :  { %v731_v45 = vpop.f32.mrf.mxu0  ;;  %8824 = vst [vmem:[#allocation42_spill] sm:$0xff] %v6596_v49 }
 0x1d0   :  { %v1404_v51 = vunpack.c.l.bf16 %v1344_v24  ;;  %5054 = vtanh.f32 %v1371_v46 }
 0x1d1   :  { %v826_v52 = vpop.f32.mrf.mxu2  ;;  %v780_v16 = vpop.f32.mrf.mxu1  ;;  %5056 = vtanh.f32 %v1376_v9 }
 0x1d2   :  { %926 = vmatmul.bf16.gmra.mxu0 %v6368_v23  ;;  %v1198_v23 = vunpack.c.h.bf16 %v6548_v42  ;;  %v989_v33 = vpack.c.bf16 %v780_v16, %v731_v45  ;;  %5058 = vtanh.f32 %v1404_v51  ;;  %v1391_v51 = vunpack.c.l.bf16 %v6476_v11 }
 0x1d3   :  { %v875_v28 = vpop.f32.mrf.mxu3 }
 0x1d4   :  { %v6562_v48 = vpack.c.bf16 %v875_v28, %v826_v52  ;;  %v1186_v28 = vunpack.c.h.bf16 %v6480_v5  ;;  %v6575_v52 = vpack.c.bf16 %v6485_v61, %v6483_v12  ;;  %v1294_v6 = vadd.f32 %v6550_v56, %v1198_v23  ;;  %v6603_v23 = vpop.eup %5046 }
 0x1d5   :  { %v6585_v12 = vpack.c.bf16 %v6504_v47, %v6500_v3  ;;  %v6600_v3 = vpack.c.bf16 %v6493_v44, %v6489_v7  ;;  %8825 = vst [vmem:[#allocation43_spill] sm:$0xff] %v6603_v23  ;;  %v1409_v7 = vunpack.c.h.bf16 %v1344_v24  ;;  %v1206_v44 = vunpack.c.h.bf16 %v989_v33 }
 0x1d6   :  { %v1203_v13 = vunpack.c.h.bf16 %v6562_v48  ;;  %v6591_v21 = vadd.f32 %v6538_v54, %v1186_v28  ;;  %v1190_v34 = vunpack.c.l.bf16 %v6575_v52  ;;  %v1205_v28 = vunpack.c.l.bf16 %v989_v33 }
 0x1d7   :  { %v733_v59 = vpop.f32.mrf.mxu0  ;;  %v1200_v16 = vunpack.c.l.bf16 %v6585_v12  ;;  %v1195_v36 = vunpack.c.l.bf16 %v6600_v3  ;;  %v1196_v8 = vunpack.c.h.bf16 %v6600_v3  ;;  %v1386_v33 = vunpack.c.h.bf16 %v6457_v22 }
 0x1d8   :  { %v1299_v61 = vadd.f32 %v6533_v39, %v1203_v13  ;;  %v1301_v23 = vadd.f32 %v6542_v53, %v1205_v28  ;;  %5060 = vtanh.f32 %v1409_v7  ;;  %v1302_v9 = vadd.f32 %v6542_v53, %v1206_v44 }
 0x1d9   :  { %v829_v35 = vpop.f32.mrf.mxu2  ;;  %v782_v5 = vpop.f32.mrf.mxu1  ;;  %v1396_v7 = vunpack.c.h.bf16 %v6476_v11  ;;  %v8831_v11 = vunpack.c.h.bf16 %v6575_v52 }
 0x1da   :  { %v992_v18 = vpack.c.bf16 %v782_v5, %v733_v59  ;;  %v6606_v5 = vpop.eup %5048  ;;  %v1349_v14 = vpack.c.bf16 %v1299_v61, %v1294_v6 }
 0x1db   :  { %v878_v45 = vpop.f32.mrf.mxu3  ;;  %8826 = vst [vmem:[#allocation44_spill] sm:$0xff] %v6606_v5  ;;  %v1201_v5 = vunpack.c.h.bf16 %v6585_v12  ;;  %v6619_v61 = vpop.eup %5050 }
 0x1dc   :  { %v1210_v47 = vunpack.c.l.bf16 %v992_v18  ;;  %v1211_v59 = vunpack.c.h.bf16 %v992_v18  ;;  %v6609_v49 = vpack.c.bf16 %v878_v45, %v829_v35  ;;  %v1381_v18 = vunpack.c.l.bf16 %v6457_v22  ;;  %8827 = vst [vmem:[#allocation45_spill] sm:$0xff] %v6619_v61 }
 0x1dd   :  { %v1296_v45 = vadd.f32 %v6533_v39, %v1200_v16  ;;  %v1414_v46 = vunpack.c.l.bf16 %v1349_v14  ;;  %v1419_v12 = vunpack.c.h.bf16 %v1349_v14  ;;  %v1291_v22 = vadd.f32 %v6550_v56, %v1195_v36 }
 0x1de   :  { %v1306_v10 = vadd.f32 %v6522_v37, %v1210_v47  ;;  %v1307_v6 = vadd.f32 %v6522_v37, %v1211_v59  ;;  %v1208_v3 = vunpack.c.h.bf16 %v6609_v49  ;;  %v6623_v47 = vpop.eup %5052  ;;  %5062 = vtanh.f32 %v1381_v18 }
 0x1df   :  { %v736_v13 = vpop.f32.mrf.mxu0  ;;  %8828 = vst [vmem:[#allocation46_spill] sm:$0xff] %v6623_v47  ;;  %v6631_v16 = vpop.eup %5054  ;;  %5064 = vtanh.f32 %v1386_v33  ;;  %v1297_v44 = vadd.f32 %v6533_v39, %v1201_v5  ;;  %v6640_v36 = vpack.c.bf16 %v1296_v45, %v1291_v22 }
 0x1e0   :  { %v1351_v28 = vpack.c.bf16 %v1306_v10, %v1301_v23  ;;  %8829 = vst [vmem:[#allocation47_spill] sm:$0xff] %v6631_v16  ;;  %v1352_v61 = vpack.c.bf16 %v1307_v6, %v1302_v9  ;;  %v6634_v14 = vpop.eup %5056  ;;  %v1286_v10 = vadd.f32 %v6555_v63, %v1190_v34  ;;  %5066 = vtanh.f32 %v1414_v46 }
 0x1e1   :  { %v831_v35 = vpop.f32.mrf.mxu2  ;;  %v785_v24 = vpop.f32.mrf.mxu1  ;;  %8830 = vst [vmem:[#allocation48_spill] sm:$0xff] %v6634_v14  ;;  %5068 = vtanh.f32 %v1419_v12  ;;  %v1292_v46 = vadd.f32 %v6550_v56, %v1196_v8 }
 0x1e2   :  { %931 = vmatmul.bf16.gmra.mxu0 %v6385_v40  ;;  %v995_v20 = vpack.c.bf16 %v785_v24, %v736_v13  ;;  %v1304_v40 = vadd.f32 %v6542_v53, %v1208_v3  ;;  %v1421_v18 = vunpack.c.l.bf16 %v1351_v28  ;;  %v6642_v6 = vpop.eup %5058  ;;  %v1287_v13 = vadd.f32 %v6555_v63, %v8831_v11 }
 0x1e3   :  { %v880_v59 = vpop.f32.mrf.mxu3  ;;  %v1426_v24 = vunpack.c.h.bf16 %v1351_v28  ;;  %5070 = vtanh.f32 %v1391_v51  ;;  %v6648_v33 = vpop.eup %5060  ;;  %v1422_v12 = vunpack.c.l.bf16 %v1352_v61  ;;  %v1427_v11 = vunpack.c.h.bf16 %v1352_v61 }
 0x1e4   :  { %v6628_v29 = vpack.c.bf16 %v880_v59, %v831_v35  ;;  %v1215_v5 = vunpack.c.l.bf16 %v995_v20  ;;  %5072 = vtanh.f32 %v1396_v7  ;;  %v6651_v9 = vpop.eup %5062  ;;  %v1216_v52 = vunpack.c.h.bf16 %v995_v20 }
 0x1e5   :  { %v6653_v47 = vpop.eup %5064  ;;  %5074 = vtanh.f32 %v1421_v18  ;;  %v1411_v51 = vunpack.c.l.bf16 %v6640_v36  ;;  %v6661_v14 = vpack.c.bf16 %v1286_v10, %v6580_v32 }
 0x1e6   :  { %v1213_v23 = vunpack.c.h.bf16 %v6628_v29  ;;  %v6658_v8 = vpop.eup %5066  ;;  %5076 = vtanh.f32 %v1426_v24  ;;  %v1312_v32 = vadd.f32 %v6520_v57, %v1216_v52 }
 0x1e7   :  { %v738_v34 = vpop.f32.mrf.mxu0  ;;  %v6663_v20 = vpop.eup %5068  ;;  %5078 = vtanh.f32 %v1422_v12  ;;  %v6679_v12 = vpack.c.bf16 %v1287_v13, %v6591_v21  ;;  %v1202_v21 = vunpack.c.l.bf16 %v6562_v48 }
 0x1e8   :  { %v1309_v35 = vadd.f32 %v6522_v37, %v1213_v23  ;;  %v6655_v23 = vpack.c.bf16 %v1297_v44, %v1292_v46  ;;  %v1311_v44 = vadd.f32 %v6520_v57, %v1215_v5  ;;  %5080 = vtanh.f32 %v1427_v11 }
 0x1e9   :  { %v834_v45 = vpop.f32.mrf.mxu2  ;;  %v787_v3 = vpop.f32.mrf.mxu1  ;;  %5082 = vtanh.f32 %v1411_v51 }
 0x1ea   :  { %v1354_v59 = vpack.c.bf16 %v1309_v35, %v1304_v40  ;;  %v998_v22 = vpack.c.bf16 %v787_v3, %v738_v34  ;;  %v5791_v40 = vmov 2   ;;  %v6668_v18 = vpop.eup %5070  ;;  %v1416_v34 = vunpack.c.h.bf16 %v6640_v36 }
 0x1eb   :  { %v883_v28 = vpop.f32.mrf.mxu3  ;;  %4869 = vset.pattern.permute.xlu1 %v5791_v40  ;;  %4870 = vset.pattern.permute.xlu2 %v5791_v40  ;;  %v6673_v24 = vpop.eup %5072  ;;  %v1412_v3 = vunpack.c.l.bf16 %v6655_v23 }
 0x1ec   :  { %v1424_v7 = vunpack.c.l.bf16 %v1354_v59  ;;  %v1220_v16 = vunpack.c.l.bf16 %v998_v22  ;;  %v1429_v61 = vunpack.c.h.bf16 %v1354_v59  ;;  %v1221_v35 = vunpack.c.h.bf16 %v998_v22  ;;  %2031 = vperm.xlu1 %4869, %v6138_v26   ;;  %2039 = vperm.xlu2 %4870, %v6129_v25   ;;  %v6684_v36 = vpop.eup %5074 }
 0x1ed   :  { %4871 = vset.pattern.permute.xlu0 %v5791_v40  ;;  %v996_v46 = vpack.c.bf16 %v883_v28, %v834_v45  ;;  %v1197_v59 = vunpack.c.l.bf16 %v6548_v42  ;;  %v1207_v45 = vunpack.c.l.bf16 %v6609_v49  ;;  %v1212_v22 = vunpack.c.l.bf16 %v6628_v29  ;;  %v6688_v51 = vpop.eup %5076 }
 0x1ee   :  { %v1316_v10 = vadd.f32 %v6526_v38, %v1220_v16  ;;  %v1317_v5 = vadd.f32 %v6526_v38, %v1221_v35  ;;  %2015 = vperm.xlu0 %4871, %v6195_v31   ;;  %5084 = vtanh.f32 %v1424_v7  ;;  %v6691_v42 = vpop.eup %5078 }
 0x1ef   :  { %v6682_v52 = vpop.f32.mrf.mxu0  ;;  %5086 = vtanh.f32 %v1429_v61  ;;  %v1217_v7 = vunpack.c.l.bf16 %v996_v46  ;;  %v6693_v49 = vpop.eup %5080  ;;  %v1218_v29 = vunpack.c.h.bf16 %v996_v46  ;;  %v1303_v48 = vadd.f32 %v6542_v53, %v1207_v45 }
 0x1f0   :  { %v1356_v16 = vpack.c.bf16 %v1316_v10, %v1311_v44  ;;  %8832 = vst [vmem:[#allocation49_spill] sm:$0xff] %v6682_v52  ;;  %v1357_v11 = vpack.c.bf16 %v1317_v5, %v1312_v32  ;;  %5088 = vtanh.f32 %v1416_v34  ;;  %v1417_v32 = vunpack.c.h.bf16 %v6655_v23  ;;  %v6696_v5 = vpop.eup %5082 }
 0x1f1   :  { %v836_v28 = vpop.f32.mrf.mxu2  ;;  %5090 = vtanh.f32 %v1412_v3  ;;  %v1308_v34 = vadd.f32 %v6522_v37, %v1212_v22  ;;  %v1406_v23 = vunpack.c.h.bf16 %v6661_v14  ;;  %v1192_v45 = vunpack.c.l.bf16 %v6518_v55 }
 0x1f2   :  { %v1431_v13 = vunpack.c.l.bf16 %v1356_v16  ;;  %v1436_v40 = vunpack.c.h.bf16 %v1356_v16  ;;  %v1432_v35 = vunpack.c.l.bf16 %v1357_v11  ;;  %v1437_v10 = vunpack.c.h.bf16 %v1357_v11 }
 0x1f3   :  { %v885_v44 = vpop.f32.mrf.mxu3  ;;  %v1401_v16 = vunpack.c.l.bf16 %v6661_v14  ;;  %v1313_v22 = vadd.f32 %v6520_v57, %v1217_v7  ;;  %v1293_v55 = vadd.f32 %v6550_v56, %v1197_v59  ;;  %v1298_v7 = vadd.f32 %v6533_v39, %v1202_v21 }
 0x1f4   :  { %v999_v61 = vpack.c.bf16 %v885_v44, %v836_v28  ;;  %5092 = vtanh.f32 %v1431_v13  ;;  %2023 = vperm.xlu1 %4869, %v6187_v43   ;;  %1999 = vperm.xlu2 %4870, %v6233_v15   ;;  %v6703_v3 = vpop.eup %5084  ;;  %v1402_v13 = vunpack.c.l.bf16 %v6679_v12  ;;  %v1314_v44 = vadd.f32 %v6520_v57, %v1218_v29 }
 0x1f5   :  { %5094 = vtanh.f32 %v1436_v40  ;;  %v6706_v28 = vpop.eup %5086  ;;  %v1353_v43 = vpack.c.bf16 %v1308_v34, %v1303_v48  ;;  %v1182_v59 = vunpack.c.l.bf16 %v6498_v1  ;;  %v8834_v34 = vunpack.c.l.bf16 %v6487_v4 }
 0x1f6   :  { %v1222_v46 = vunpack.c.l.bf16 %v999_v61  ;;  %v1223_v11 = vunpack.c.h.bf16 %v999_v61  ;;  %5096 = vtanh.f32 %v1432_v35  ;;  %1991 = vperm.xlu0 %4871, %v6254_v19   ;;  %v6712_v40 = vpop.eup %5088  ;;  %v1348_v1 = vpack.c.bf16 %v1298_v7, %v1293_v55 }
 0x1f7   :  { %5098 = vtanh.f32 %v1437_v10  ;;  %v6717_v14 = vpop.f32.mrf.mxu0  ;;  %v6719_v15 = vpop.eup %5090  ;;  %v1407_v10 = vunpack.c.h.bf16 %v6679_v12  ;;  %v963_v4 = vpack.c.bf16 %v6441_v27, %v6439_v62  ;;  %v1551_v7 = vpack.c.bf16 %v6688_v51, %v6684_v36 }
 0x1f8   :  { %v1318_v61 = vadd.f32 %v6526_v38, %v1222_v46  ;;  %v1319_v35 = vadd.f32 %v6526_v38, %v1223_v11  ;;  %5100 = vtanh.f32 %v1417_v32  ;;  %v8833_v11 = vunpack.c.l.bf16 %v6429_v58 }
 0x1f9   :  { %5102 = vtanh.f32 %v1401_v16  ;;  %v1177_v32 = vunpack.c.l.bf16 %v6470_v30  ;;  %v1163_v51 = vunpack.c.h.bf16 %v963_v4 }
 0x1fa   :  { %v5093_v19 = vpop.eup %5092  ;;  %v1358_v31 = vpack.c.bf16 %v1318_v61, %v1313_v22  ;;  %v1359_v29 = vpack.c.bf16 %v1319_v35, %v1314_v44  ;;  %5104 = vtanh.f32 %v1406_v23  ;;  %v6727_v25 = vadd.f32 %v6425_v17, %v8833_v11  ;;  %v8837_v11 = vld [vmem:[#allocation37_spill] sm:$0xff] }
 0x1fb   :  { %v5095_v46 = vpop.eup %5094  ;;  %5106 = vtanh.f32 %v1402_v13  ;;  %v1283_v23 = vadd.f32 %v6538_v54, %v8834_v34  ;;  %v1288_v22 = vadd.f32 %v6555_v63, %v1192_v45  ;;  %v1167_v35 = vunpack.c.l.bf16 %v6451_v50  ;;  %v8835_v45 = vld [vmem:[#allocation24_spill] sm:$0xff] }
 0x1fc   :  { %v5097_v21 = vpop.eup %5096  ;;  %v1434_v16 = vunpack.c.l.bf16 %v1359_v29  ;;  %v1439_v26 = vunpack.c.h.bf16 %v1359_v29  ;;  %v1556_v12 = vpack.c.bf16 %v5095_v46, %v5093_v19  ;;  %v1433_v52 = vunpack.c.l.bf16 %v1358_v31  ;;  %2007 = vperm.xlu1 %4869, %v6224_v41   ;;  %1983 = vperm.xlu2 %4870, %v6150_v2   ;;  %v8836_v29 = vld [vmem:[#allocation38_spill] sm:$0xff] }
 0x1fd   :  { %v5099_v48 = vpop.eup %5098  ;;  %v1438_v44 = vunpack.c.h.bf16 %v1358_v31  ;;  %5108 = vtanh.f32 %v1407_v10  ;;  %v1423_v19 = vunpack.c.l.bf16 %v1353_v43  ;;  %v1428_v31 = vunpack.c.h.bf16 %v1353_v43  ;;  %v8838_v43 = vld [vmem:[#allocation36_spill] sm:$0xff] }
 0x1fe   :  { %v5101_v30 = vpop.eup %5100  ;;  %5110 = vtanh.f32 %v1434_v16  ;;  %1625 = vmatpush.bf16.msrb.mxu1 %v1556_v12  ;;  %v1557_v13 = vpack.c.bf16 %v5099_v48, %v5097_v21  ;;  %1951 = vperm.xlu0 %4871, %v8835_v45   ;;  %v1172_v46 = vunpack.c.l.bf16 %v8836_v29  ;;  %v1392_v21 = vunpack.c.l.bf16 %v8837_v11  ;;  %v8839_v29 = vld [vmem:[#allocation34_spill] sm:$0xff] }
 0x1ff   :  { %v6737_v61 = vpop.eup %5102  ;;  %5112 = vtanh.f32 %v1439_v26  ;;  %v6746_v55 = vpop.f32.mrf.mxu0  ;;  %v1273_v26 = vadd.f32 %v6466_v0, %v1177_v32  ;;  %v1278_v27 = vadd.f32 %v8838_v43, %v1182_v59  ;;  %v1397_v50 = vunpack.c.h.bf16 %v8837_v11 }
 0x200   :  { %v6743_v10 = vpop.eup %5104  ;;  %1674 = vmatpush.bf16.msrb.mxu2 %v1557_v13  ;;  %5114 = vtanh.f32 %v1433_v52  ;;  %v1343_v16 = vpack.c.bf16 %v1288_v22, %v1283_v23  ;;  %v1552_v12 = vpack.c.bf16 %v6693_v49, %v6691_v42  ;;  %v1413_v48 = vunpack.c.l.bf16 %v1348_v1  ;;  %v8840_v23 = vld [vmem:[#allocation35_spill] sm:$0xff] }
 0x201   :  { %v6751_v62 = vpop.eup %5106  ;;  %5116 = vtanh.f32 %v1438_v44  ;;  %v1162_v52 = vunpack.c.l.bf16 %v963_v4  ;;  %v1418_v34 = vunpack.c.h.bf16 %v1348_v1  ;;  %v1263_v32 = vadd.f32 %v8839_v29, %v1167_v35  ;;  %v8842_v4 = vld [vmem:[#allocation21_spill] sm:$0xff] }
 0x202   :  { %1626 = vmatpush.bf16.msrb.mxu1 %v1551_v7  ;;  %5118 = vtanh.f32 %v1423_v19  ;;  %v1546_v59 = vpack.c.bf16 %v6712_v40, %v6696_v5  ;;  %v1382_v22 = vunpack.c.l.bf16 %v8840_v23  ;;  %v8841_v7 = vld [vmem:[#allocation33_spill] sm:$0xff]  ;;  %v6763_v49 = vpack.c.bf16 %v1278_v27, %v1273_v26  ;;  %v8845_v26 = vld [vmem:[#allocation31_spill] sm:$0xff] }
 0x203   :  { %v5109_v36 = vpop.eup %5108  ;;  %5120 = vtanh.f32 %v1428_v31  ;;  %v1268_v42 = vadd.f32 %v8841_v7, %v1172_v46  ;;  %v1387_v19 = vunpack.c.h.bf16 %v8840_v23  ;;  %v8843_v1 = vld [vmem:[#allocation17_spill] sm:$0xff]  ;;  %v1547_v5 = vpack.c.bf16 %v5101_v30, %v6719_v15  ;;  %v8847_v30 = vld [vmem:[#allocation32_spill] sm:$0xff] }
 0x204   :  { %v5111_v13 = vpop.eup %5110  ;;  %1675 = vmatpush.bf16.msrb.mxu2 %v1552_v12  ;;  %5122 = vtanh.f32 %v1392_v21  ;;  %1967 = vperm.xlu1 %4869, %v8842_v4   ;;  %v1403_v40 = vunpack.c.l.bf16 %v1343_v16  ;;  %v8844_v21 = vunpack.c.h.bf16 %v6429_v58  ;;  %v1259_v27 = vadd.f32 %v8845_v26, %v1163_v51  ;;  %v8846_v12 = vld [vmem:[#allocation26_spill] sm:$0xff] }
 0x205   :  { %v5113_v44 = vpop.eup %5112  ;;  %5124 = vtanh.f32 %v1397_v50  ;;  %1975 = vperm.xlu2 %4870, %v8843_v1   ;;  %v1408_v50 = vunpack.c.h.bf16 %v1343_v16  ;;  %v1541_v15 = vpack.c.bf16 %v6743_v10, %v6737_v61  ;;  %v1372_v58 = vunpack.c.l.bf16 %v8847_v30 }
 0x206   :  { %v5115_v35 = vpop.eup %5114  ;;  %v1559_v31 = vpack.c.bf16 %v5113_v44, %v5111_v13  ;;  %1627 = vmatpush.bf16.msrb.mxu1 %v1546_v59  ;;  %5126 = vtanh.f32 %v1413_v48  ;;  %v1254_v46 = vadd.f32 %v6425_v17, %v8844_v21  ;;  %1943 = vperm.xlu0 %4871, %v8846_v12   ;;  %v1258_v59 = vadd.f32 %v8845_v26, %v1162_v52  ;;  %v8852_v21 = vld [vmem:[#allocation23_spill] sm:$0xff] }
 0x207   :  { %v5117_v11 = vpop.eup %5116  ;;  %5128 = vtanh.f32 %v1418_v34  ;;  %v6774_v13 = vpop.f32.mrf.mxu0  ;;  %v1333_v51 = vpack.c.bf16 %v1268_v42, %v1263_v32  ;;  %v1377_v16 = vunpack.c.h.bf16 %v8847_v30  ;;  %v1554_v44 = vpack.c.bf16 %v6706_v28, %v6703_v3  ;;  %v8850_v28 = vld [vmem:[#allocation30_spill] sm:$0xff] }
 0x208   :  { %v5119_v23 = vpop.eup %5118  ;;  %v1558_v45 = vpack.c.bf16 %v5117_v11, %v5115_v35  ;;  %1772 = vmatpush.bf16.msra.mxu0 %v1559_v31  ;;  %1676 = vmatpush.bf16.msrb.mxu2 %v1547_v5  ;;  %5130 = vtanh.f32 %v1382_v22  ;;  %v1542_v35 = vpack.c.bf16 %v5109_v36, %v6751_v62  ;;  %v1393_v61 = vunpack.c.l.bf16 %v6763_v49  ;;  %v8849_v31 = vld [vmem:[#allocation29_spill] sm:$0xff] }
 0x209   :  { %v5121_v48 = vpop.eup %5120  ;;  %5132 = vtanh.f32 %v1387_v19  ;;  %v8848_v22 = vunpack.c.h.bf16 %v6546_v60  ;;  %v1329_v32 = vpack.c.bf16 %v1259_v27, %v1254_v46  ;;  %v1398_v42 = vunpack.c.h.bf16 %v6763_v49  ;;  %v8853_v46 = vld [vmem:[#allocation11_spill] sm:$0xff] }
 0x20a   :  { %v5123_v34 = vpop.eup %5122  ;;  %1723 = vmatpush.bf16.msrb.mxu3 %v1558_v45  ;;  %1628 = vmatpush.bf16.msrb.mxu1 %v1541_v15  ;;  %5134 = vtanh.f32 %v1403_v40  ;;  %v1553_v45 = vpack.c.bf16 %v5121_v48, %v5119_v23  ;;  %v1536_v3 = vpack.c.bf16 %v6673_v24, %v6668_v18  ;;  %v1362_v62 = vunpack.c.l.bf16 %v8850_v28  ;;  %v8854_v23 = vld [vmem:[#allocation40_spill] sm:$0xff] }
 0x20b   :  { %v5125_v10 = vpop.eup %5124  ;;  %v1249_v52 = vadd.f32 %v8849_v31, %v8848_v22  ;;  %5136 = vtanh.f32 %v1408_v50  ;;  %v8851_v5 = vunpack.c.l.bf16 %v6546_v60  ;;  %v1328_v11 = vpack.c.bf16 %v1258_v59, %v6727_v25 }
 0x20c   :  { %v5127_v19 = vpop.eup %5126  ;;  %1773 = vmatpush.bf16.msra.mxu0 %v1554_v44  ;;  %1677 = vmatpush.bf16.msrb.mxu2 %v1542_v35  ;;  %5138 = vtanh.f32 %v1372_v58  ;;  %v1367_v49 = vunpack.c.h.bf16 %v8850_v28  ;;  %v1549_v18 = vpack.c.bf16 %v6663_v20, %v6658_v8  ;;  %v1537_v24 = vpack.c.bf16 %v5125_v10, %v5123_v34  ;;  %v8855_v20 = vld [vmem:[#allocation39_spill] sm:$0xff] }
 0x20d   :  { %v5129_v36 = vpop.eup %5128  ;;  %v1248_v40 = vadd.f32 %v8849_v31, %v8851_v5  ;;  %5140 = vtanh.f32 %v1377_v16  ;;  %1959 = vperm.xlu1 %4869, %v8852_v21   ;;  %1935 = vperm.xlu2 %4870, %v8853_v46   ;;  %v1383_v60 = vunpack.c.l.bf16 %v1333_v51  ;;  %v1324_v15 = vpack.c.bf16 %v1249_v52, %v8854_v23  ;;  %v8861_v5 = vld [vmem:[#allocation46_spill] sm:$0xff]  ;;  %v8862_v23 = vld [vmem:[#allocation43_spill] sm:$0xff] }
 0x20e   :  { %v5131_v27 = vpop.eup %5130  ;;  %1724 = vmatpush.bf16.msrb.mxu3 %v1553_v45  ;;  %1629 = vmatpush.bf16.msrb.mxu1 %v1536_v3  ;;  %5142 = vtanh.f32 %v1393_v61  ;;  %v1388_v25 = vunpack.c.h.bf16 %v1333_v51  ;;  %v1374_v58 = vunpack.c.l.bf16 %v1329_v32  ;;  %v1548_v48 = vpack.c.bf16 %v5129_v36, %v5127_v19  ;;  %v8857_v19 = vld [vmem:[#allocation48_spill] sm:$0xff]  ;;  %v8860_v36 = vld [vmem:[#allocation45_spill] sm:$0xff] }
 0x20f   :  { %v5133_v50 = vpop.eup %5132  ;;  %5144 = vtanh.f32 %v1398_v42  ;;  %v6802_v59 = vpop.f32.mrf.mxu0  ;;  %v1531_v16 = vpack.c.bf16 %v6653_v47, %v6651_v9  ;;  %v1323_v34 = vpack.c.bf16 %v1248_v40, %v8855_v20  ;;  %v1379_v44 = vunpack.c.h.bf16 %v1329_v32  ;;  %v8856_v32 = vld [vmem:[#allocation47_spill] sm:$0xff] }
 0x210   :  { %v5135_v30 = vpop.eup %5134  ;;  %1774 = vmatpush.bf16.msra.mxu0 %v1549_v18  ;;  %1678 = vmatpush.bf16.msrb.mxu2 %v1537_v24  ;;  %5146 = vtanh.f32 %v1362_v62  ;;  %v1544_v51 = vpack.c.bf16 %v6648_v33, %v6642_v6  ;;  %v1532_v61 = vpack.c.bf16 %v5133_v50, %v5131_v27  ;;  %v1373_v10 = vunpack.c.l.bf16 %v1328_v11  ;;  %v8858_v6 = vld [vmem:[#allocation25_spill] sm:$0xff]  ;;  %v8859_v33 = vld [vmem:[#allocation12_spill] sm:$0xff] }
 0x211   :  { %v5137_v8 = vpop.eup %5136  ;;  %5148 = vtanh.f32 %v1367_v49  ;;  %v1378_v52 = vunpack.c.h.bf16 %v1328_v11  ;;  %v1364_v47 = vunpack.c.l.bf16 %v1324_v15  ;;  %v1526_v45 = vpack.c.bf16 %v8857_v19, %v8856_v32 }
 0x212   :  { %v5139_v35 = vpop.eup %5138  ;;  %1725 = vmatpush.bf16.msrb.mxu3 %v1548_v48  ;;  %1630 = vmatpush.bf16.msrb.mxu1 %v1531_v16  ;;  %5150 = vtanh.f32 %v1383_v60  ;;  %v1543_v9 = vpack.c.bf16 %v5137_v8, %v5135_v30  ;;  %v1369_v28 = vunpack.c.h.bf16 %v1324_v15  ;;  %v1539_v40 = vpack.c.bf16 %v8861_v5, %v8860_v36  ;;  %v8863_v15 = vld [vmem:[#allocation44_spill] sm:$0xff]  ;;  %v8864_v16 = vld [vmem:[#allocation41_spill] sm:$0xff]  ;;  %v8865_v8 = vld [vmem:[#allocation42_spill] sm:$0xff] }
 0x213   :  { %v5141_v22 = vpop.eup %5140  ;;  %5152 = vtanh.f32 %v1388_v25  ;;  %v1363_v49 = vunpack.c.l.bf16 %v1323_v34  ;;  %v1368_v18 = vunpack.c.h.bf16 %v1323_v34  ;;  %v1521_v25 = vpack.c.bf16 %v8863_v15, %v8862_v23  ;;  %v6846_v5 = vld [vmem:[%s8700_s3 + $0x10] sm:$0xff] }
 0x214   :  { %v5143_v42 = vpop.eup %5142  ;;  %5154 = vtanh.f32 %v1374_v58  ;;  %1775 = vmatpush.bf16.msra.mxu0 %v1544_v51  ;;  %1679 = vmatpush.bf16.msrb.mxu2 %v1532_v61  ;;  %v1527_v11 = vpack.c.bf16 %v5141_v22, %v5139_v35  ;;  %v6822_v58 = vld [vmem:[%s8700_s3] sm:$0xff]  ;;  %v1534_v20 = vpack.c.bf16 %v8865_v8, %v8864_v16 }
 0x215   :  { %v5145_v3 = vpop.eup %5144  ;;  %5156 = vtanh.f32 %v1379_v44  ;;  %1919 = vperm.xlu1 %4869, %v8858_v6   ;;  %1927 = vperm.xlu2 %4870, %v8859_v33  }
 0x216   :  { %v5147_v62 = vpop.eup %5146  ;;  %1726 = vmatpush.bf16.msrb.mxu3 %v1543_v9  ;;  %1631 = vmatpush.bf16.msrb.mxu1 %v1526_v45  ;;  %5158 = vtanh.f32 %v1373_v10  ;;  %v1538_v60 = vpack.c.bf16 %v5145_v3, %v5143_v42 }
 0x217   :  { %v5149_v27 = vpop.eup %5148  ;;  %5160 = vtanh.f32 %v1378_v52  ;;  %v6815_v50 = vpop.f32.mrf.mxu0 }
 0x218   :  { %v5151_v24 = vpop.eup %5150  ;;  %5162 = vtanh.f32 %v1364_v47  ;;  %1776 = vmatpush.bf16.msra.mxu0 %v1539_v40  ;;  %1680 = vmatpush.bf16.msrb.mxu2 %v1527_v11  ;;  %v1522_v34 = vpack.c.bf16 %v5149_v27, %v5147_v62 }
 0x219   :  { %v5153_v30 = vpop.eup %5152  ;;  %5164 = vtanh.f32 %v1369_v28  ;;  %v6837_v28 = vld [vmem:[%s8700_s3 + $0x8] sm:$0xff] }
 0x21a   :  { %v5155_v48 = vpop.eup %5154  ;;  %1727 = vmatpush.bf16.msrb.mxu3 %v1538_v60  ;;  %1632 = vmatpush.bf16.msrb.mxu1 %v1521_v25  ;;  %5166 = vtanh.f32 %v1363_v49  ;;  %v1533_v51 = vpack.c.bf16 %v5153_v30, %v5151_v24  ;;  %v6855_v49 = vld [vmem:[%s8700_s3 + $0x18] sm:$0xff]  ;;  %v6864_v24 = vld [vmem:[%s8700_s3 + $0x20] sm:$0xff] }
 0x21b   :  { %v5157_v44 = vpop.eup %5156  ;;  %5168 = vtanh.f32 %v1368_v18 }
 0x21c   :  { %v5159_v35 = vpop.eup %5158  ;;  %1777 = vmatpush.bf16.msra.mxu0 %v1534_v20  ;;  %1681 = vmatpush.bf16.msrb.mxu2 %v1522_v34  ;;  %v1529_v22 = vpack.c.bf16 %v5157_v44, %v5155_v48 }
 0x21d   :  { %v5161_v61 = vpop.eup %5160  ;;  %1633 = vmatmul.bf16.vlgmr.msrb.gmra.mxu1 %v6822_v58 }
 0x21e   :  { %v5163_v10 = vpop.eup %5162  ;;  %1728 = vmatpush.bf16.msrb.mxu3 %v1533_v51  ;;  %v1528_v47 = vpack.c.bf16 %v5161_v61, %v5159_v35  ;;  %v6873_v35 = vld [vmem:[%s8700_s3 + $0x28] sm:$0xff] }
 0x21f   :  { %v5165_v52 = vpop.eup %5164  ;;  %1682 = vmatmul.bf16.vlgmr.msrb.gmra.mxu2 %v6822_v58  ;;  %v6828_v9 = vpop.f32.mrf.mxu0 }
 0x220   :  { %v5167_v42 = vpop.eup %5166  ;;  %1778 = vmatpush.bf16.msra.mxu0 %v1529_v22  ;;  %v1524_v19 = vpack.c.bf16 %v5165_v52, %v5163_v10 }
 0x221   :  { %v5169_v32 = vpop.eup %5168 }
 0x222   :  { %1729 = vmatpush.bf16.msrb.mxu3 %v1528_v47  ;;  %v1523_v45 = vpack.c.bf16 %v5169_v32, %v5167_v42 }
 0x224   :  { %1779 = vmatpush.bf16.msra.mxu0 %v1524_v19 }
 0x226   :  { %1730 = vmatpush.bf16.msrb.mxu3 %v1523_v45 }
 0x227   :  { %1780 = vmatmul.bf16.vlgmr.msra.gmra.mxu0 %v6822_v58  ;;  %v6831_v3 = vpop.f32.mrf.mxu0 }
 0x228   :  { %v976_v45 = vpack.c.bf16 %v6831_v3, %v6831_v3 }
 0x229   :  { %1731 = vmatmul.bf16.vlgmr.msrb.gmra.mxu3 %v6822_v58 }
 0x22a   :  { %v1184_v3 = vunpack.c.l.bf16 %v976_v45 }
 0x22d   :  { %1638 = vmatmul.bf16.gmra.mxu1 %v6837_v28 }
 0x22f   :  { %1687 = vmatmul.bf16.gmra.mxu2 %v6837_v28  ;;  %v917_v62 = vpop.f32.mrf.mxu0 }
 0x230   :  { %v979_v52 = vpack.c.bf16 %v917_v62, %v917_v62 }
 0x237   :  { %1785 = vmatmul.bf16.gmra.mxu0 %v6837_v28  ;;  %v919_v36 = vpop.f32.mrf.mxu0 }
 0x238   :  { %v982_v51 = vpack.c.bf16 %v919_v36, %v919_v36 }
 0x239   :  { %1736 = vmatmul.bf16.gmra.mxu3 %v6837_v28 }
 0x23d   :  { %1643 = vmatmul.bf16.gmra.mxu1 %v6846_v5 }
 0x23f   :  { %1692 = vmatmul.bf16.gmra.mxu2 %v6846_v5  ;;  %v922_v40 = vpop.f32.mrf.mxu0 }
 0x240   :  { %v985_v16 = vpack.c.bf16 %v922_v40, %v922_v40  ;;  %v1194_v40 = vunpack.c.l.bf16 %v982_v51 }
 0x242   :  { %v1199_v42 = vunpack.c.l.bf16 %v985_v16 }
 0x247   :  { %1790 = vmatmul.bf16.gmra.mxu0 %v6846_v5  ;;  %v924_v11 = vpop.f32.mrf.mxu0 }
 0x248   :  { %v988_v30 = vpack.c.bf16 %v924_v11, %v924_v11 }
 0x249   :  { %1741 = vmatmul.bf16.gmra.mxu3 %v6846_v5 }
 0x24a   :  { %v1204_v61 = vunpack.c.l.bf16 %v988_v30 }
 0x24c   :  { %v1300_v36 = vadd.f32 %v6533_v39, %v1204_v61  ;;  %v1290_v39 = vadd.f32 %v6555_v63, %v1194_v40 }
 0x24d   :  { %1648 = vmatmul.bf16.gmra.mxu1 %v6855_v49 }
 0x24f   :  { %1697 = vmatmul.bf16.gmra.mxu2 %v6855_v49  ;;  %v927_v27 = vpop.f32.mrf.mxu0 }
 0x250   :  { %v991_v15 = vpack.c.bf16 %v927_v27, %v927_v27 }
 0x252   :  { %v1209_v8 = vunpack.c.l.bf16 %v991_v15 }
 0x254   :  { %v1305_v47 = vadd.f32 %v6542_v53, %v1209_v8  ;;  %v1189_v53 = vunpack.c.l.bf16 %v979_v52  ;;  %v1280_v8 = vadd.f32 %v8838_v43, %v1184_v3  ;;  %v6910_v43 = vld [vmem:[%s8700_s3 + $0x30] sm:$0xff] }
 0x257   :  { %1795 = vmatmul.bf16.gmra.mxu0 %v6855_v49  ;;  %v929_v18 = vpop.f32.mrf.mxu0 }
 0x258   :  { %v994_v23 = vpack.c.bf16 %v929_v18, %v929_v18 }
 0x259   :  { %1746 = vmatmul.bf16.gmra.mxu3 %v6855_v49 }
 0x25a   :  { %v1214_v48 = vunpack.c.l.bf16 %v994_v23 }
 0x25c   :  { %v1310_v10 = vadd.f32 %v6522_v37, %v1214_v48  ;;  %v973_v37 = vpack.c.bf16 %v6828_v9, %v6828_v9  ;;  %v967_v9 = vpack.c.bf16 %v6802_v59, %v6802_v59  ;;  %v1285_v48 = vadd.f32 %v6538_v54, %v1189_v53 }
 0x25d   :  { %1653 = vmatmul.bf16.gmra.mxu1 %v6864_v24  ;;  %v961_v59 = vpack.c.bf16 %v6746_v55, %v6746_v55 }
 0x25e   :  { %v1355_v11 = vpack.c.bf16 %v1310_v10, %v1305_v47  ;;  %v1345_v63 = vpack.c.bf16 %v1290_v39, %v1285_v48 }
 0x25f   :  { %1702 = vmatmul.bf16.gmra.mxu2 %v6864_v24  ;;  %v932_v60 = vpop.f32.mrf.mxu0  ;;  %v1159_v45 = vunpack.c.l.bf16 %v961_v59 }
 0x260   :  { %v997_v25 = vpack.c.bf16 %v932_v60, %v932_v60  ;;  %v6889_v60 = vpop.permute.xlu1 %2031  ;;  %v1425_v15 = vunpack.c.l.bf16 %v1355_v11  ;;  %v1430_v30 = vunpack.c.h.bf16 %v1355_v11  ;;  %v1405_v55 = vunpack.c.l.bf16 %v1345_v63 }
 0x262   :  { %v1219_v34 = vunpack.c.l.bf16 %v997_v25  ;;  %v6892_v25 = vpop.permute.xlu2 %2039 }
 0x264   :  { %v1315_v32 = vadd.f32 %v6520_v57, %v1219_v34  ;;  %v1295_v57 = vadd.f32 %v6550_v56, %v1199_v42  ;;  %v1179_v56 = vunpack.c.l.bf16 %v973_v37  ;;  %v1410_v42 = vunpack.c.h.bf16 %v1345_v63 }
 0x266   :  { %v1350_v23 = vpack.c.bf16 %v1300_v36, %v1295_v57  ;;  %v1275_v54 = vadd.f32 %v6466_v0, %v1179_v56 }
 0x267   :  { %1800 = vmatmul.bf16.gmra.mxu0 %v6864_v24  ;;  %v934_v20 = vpop.f32.mrf.mxu0 }
 0x268   :  { %v1000_v44 = vpack.c.bf16 %v934_v20, %v934_v20  ;;  %v1415_v20 = vunpack.c.l.bf16 %v1350_v23  ;;  %v1420_v34 = vunpack.c.h.bf16 %v1350_v23  ;;  %v1340_v52 = vpack.c.bf16 %v1280_v8, %v1275_v54  ;;  %v6913_v47 = vpop.permute.xlu1 %2023 }
 0x269   :  { %1751 = vmatmul.bf16.gmra.mxu3 %v6864_v24 }
 0x26a   :  { %v1224_v22 = vunpack.c.l.bf16 %v1000_v44  ;;  %v1169_v44 = vunpack.c.l.bf16 %v967_v9  ;;  %v6918_v36 = vpop.permute.xlu2 %1999  ;;  %v1395_v53 = vunpack.c.l.bf16 %v1340_v52  ;;  %v1400_v57 = vunpack.c.h.bf16 %v1340_v52  ;;  %v8867_v9 = vld [vmem:[#allocation28_spill] sm:$0xff] }
 0x26c   :  { %v1320_v19 = vadd.f32 %v6526_v38, %v1224_v22  ;;  %v970_v38 = vpack.c.bf16 %v6815_v50, %v6815_v50  ;;  %v964_v50 = vpack.c.bf16 %v6774_v13, %v6774_v13  ;;  %v958_v13 = vpack.c.bf16 %v6717_v14, %v6717_v14 }
 0x26d   :  { %1658 = vmatmul.bf16.gmra.mxu1 %v6873_v35  ;;  %v1265_v40 = vadd.f32 %v8839_v29, %v1169_v44  ;;  %v1255_v29 = vadd.f32 %v6425_v17, %v1159_v45  ;;  %v6935_v44 = vld [vmem:[%s8700_s3 + $0x38] sm:$0xff]  ;;  %v6944_v45 = vpop.permute.xlu0 %2015 }
 0x26e   :  { %v1360_v27 = vpack.c.bf16 %v1320_v19, %v1315_v32  ;;  %v1174_v16 = vunpack.c.l.bf16 %v970_v38  ;;  %v1164_v61 = vunpack.c.l.bf16 %v964_v50  ;;  %v8866_v32 = vld [vmem:[#allocation49_spill] sm:$0xff] }
 0x26f   :  { %1707 = vmatmul.bf16.gmra.mxu2 %v6873_v35  ;;  %v955_v19 = vpack.c.bf16 %v8866_v32, %v8866_v32 }
 0x270   :  { %v1435_v62 = vunpack.c.l.bf16 %v1360_v27  ;;  %v1440_v18 = vunpack.c.h.bf16 %v1360_v27  ;;  %v1270_v22 = vadd.f32 %v8841_v7, %v1174_v16  ;;  %v1154_v27 = vunpack.c.l.bf16 %v958_v13  ;;  %v6926_v16 = vpop.permute.xlu1 %2007 }
 0x271   :  { %v1260_v7 = vadd.f32 %v8845_v26, %v1164_v61 }
 0x272   :  { %5170 = vtanh.f32 %v1435_v62  ;;  %v1335_v37 = vpack.c.bf16 %v1270_v22, %v1265_v40  ;;  %v1149_v62 = vunpack.c.l.bf16 %v955_v19  ;;  %v1250_v39 = vadd.f32 %v8849_v31, %v1154_v27  ;;  %v6928_v17 = vpop.permute.xlu2 %1983 }
 0x273   :  { %5172 = vtanh.f32 %v1440_v18  ;;  %v1330_v23 = vpack.c.bf16 %v1260_v7, %v1255_v29 }
 0x274   :  { %5174 = vtanh.f32 %v1425_v15  ;;  %v1385_v15 = vunpack.c.l.bf16 %v1335_v37  ;;  %v1390_v26 = vunpack.c.h.bf16 %v1335_v37  ;;  %v1245_v56 = vadd.f32 %v8867_v9, %v1149_v62 }
 0x275   :  { %5176 = vtanh.f32 %v1430_v30  ;;  %v1375_v63 = vunpack.c.l.bf16 %v1330_v23  ;;  %v1380_v31 = vunpack.c.h.bf16 %v1330_v23  ;;  %v6950_v37 = vpop.permute.xlu0 %1991 }
 0x276   :  { %5178 = vtanh.f32 %v1415_v20  ;;  %v1325_v8 = vpack.c.bf16 %v1250_v39, %v1245_v56 }
 0x277   :  { %1805 = vmatmul.bf16.gmra.mxu0 %v6873_v35  ;;  %5180 = vtanh.f32 %v1420_v34 }
 0x278   :  { %v5171_v51 = vpop.eup %5170  ;;  %5182 = vtanh.f32 %v1405_v55  ;;  %v1365_v54 = vunpack.c.l.bf16 %v1325_v8  ;;  %v6939_v22 = vpop.permute.xlu1 %1967 }
 0x279   :  { %1756 = vmatmul.bf16.gmra.mxu3 %v6873_v35  ;;  %v5173_v10 = vpop.eup %5172  ;;  %5184 = vtanh.f32 %v1410_v42 }
 0x27a   :  { %v1560_v0 = vpack.c.bf16 %v5173_v10, %v5171_v51  ;;  %v5175_v14 = vpop.eup %5174  ;;  %5186 = vtanh.f32 %v1395_v53  ;;  %v1370_v51 = vunpack.c.h.bf16 %v1325_v8  ;;  %v6941_v42 = vpop.permute.xlu2 %1975 }
 0x27b   :  { %v5177_v11 = vpop.eup %5176  ;;  %5188 = vtanh.f32 %v1400_v57 }
 0x27c   :  { %1821 = vmatpush.bf16.msra.mxu1 %v1560_v0  ;;  %v5179_v38 = vpop.eup %5178  ;;  %v1555_v18 = vpack.c.bf16 %v5177_v11, %v5175_v14  ;;  %5190 = vtanh.f32 %v1385_v15 }
 0x27d   :  { %1663 = vmatmul.bf16.gmra.mxu1 %v6910_v43  ;;  %v5181_v3 = vpop.eup %5180  ;;  %5192 = vtanh.f32 %v1390_v26 }
 0x27e   :  { %v5183_v30 = vpop.eup %5182  ;;  %v1550_v48 = vpack.c.bf16 %v5181_v3, %v5179_v38  ;;  %5194 = vtanh.f32 %v1375_v63  ;;  %v8868_v3 = vld [vmem:[#allocation27_spill] sm:$0xff] }
 0x27f   :  { %1712 = vmatmul.bf16.gmra.mxu2 %v6910_v43  ;;  %v5185_v50 = vpop.eup %5184  ;;  %5196 = vtanh.f32 %v1380_v31  ;;  %v2013_v33 = vperm.slane %v6926_v16, %v8868_v3  ;;  %v1989_v12 = vperm.slane %v6928_v17, %v8868_v3 }
 0x280   :  { %1822 = vmatpush.bf16.msra.mxu1 %v1555_v18  ;;  %v5187_v20 = vpop.eup %5186  ;;  %v1545_v34 = vpack.c.bf16 %v5185_v50, %v5183_v30  ;;  %5198 = vtanh.f32 %v1365_v54  ;;  %v6947_v11 = vpop.permute.xlu1 %1959 }
 0x281   :  { %v5189_v59 = vpop.eup %5188  ;;  %5200 = vtanh.f32 %v1370_v51  ;;  %v1952_v50 = vpop.permute.xlu0 %1951  ;;  %v7089_v21 = vunpack.c.l.bf16 %v2013_v33  ;;  %v7095_v2 = vunpack.c.l.bf16 %v1989_v12 }
 0x282   :  { %v5191_v13 = vpop.eup %5190  ;;  %v1540_v61 = vpack.c.bf16 %v5189_v59, %v5187_v20  ;;  %v1936_v7 = vpop.permute.xlu2 %1935 }
 0x283   :  { %v5193_v10 = vpop.eup %5192 }
 0x284   :  { %1823 = vmatpush.bf16.msra.mxu1 %v1550_v48  ;;  %v5195_v52 = vpop.eup %5194  ;;  %v1535_v55 = vpack.c.bf16 %v5193_v10, %v5191_v13 }
 0x285   :  { %v5197_v0 = vpop.eup %5196 }
 0x286   :  { %v5199_v14 = vpop.eup %5198  ;;  %v1530_v32 = vpack.c.bf16 %v5197_v0, %v5195_v52 }
 0x287   :  { %1810 = vmatmul.bf16.gmra.mxu0 %v6910_v43  ;;  %v5201_v19 = vpop.eup %5200 }
 0x288   :  { %1824 = vmatpush.bf16.msra.mxu1 %v1545_v34  ;;  %v1525_v40 = vpack.c.bf16 %v5201_v19, %v5199_v14  ;;  %v1920_v38 = vpop.permute.xlu1 %1919 }
 0x289   :  { %1761 = vmatmul.bf16.gmra.mxu3 %v6910_v43  ;;  %v1925_v39 = vperm.slane %v1920_v38, %v8868_v3  ;;  %v1944_v19 = vpop.permute.xlu0 %1943 }
 0x28a   :  { %v1928_v18 = vpop.permute.xlu2 %1927 }
 0x28b   :  { %v1933_v23 = vperm.slane %v1928_v18, %v8868_v3  ;;  %v6954_v15 = vunpack.c.l.bf16 %v1925_v39 }
 0x28c   :  { %1825 = vmatpush.bf16.msra.mxu1 %v1540_v61 }
 0x28d   :  { %1668 = vmatmul.bf16.gmra.mxu1 %v6935_v44  ;;  %8869 = vst [vmem:[#allocation38_spill] sm:$0xff] %v6954_v15  ;;  %v6956_v48 = vunpack.c.l.bf16 %v1933_v23 }
 0x28f   :  { %1717 = vmatmul.bf16.gmra.mxu2 %v6935_v44  ;;  %8870 = vst [vmem:[#allocation37_spill] sm:$0xff] %v6956_v48 }
 0x290   :  { %1826 = vmatpush.bf16.msra.mxu1 %v1535_v55 }
 0x294   :  { %1827 = vmatpush.bf16.msra.mxu1 %v1530_v32 }
 0x297   :  { %1815 = vmatmul.bf16.gmra.mxu0 %v6935_v44 }
 0x298   :  { %1828 = vmatpush.bf16.msra.mxu1 %v1525_v40  ;;  %v1949_v40 = vperm.slane %v1944_v19, %v8868_v3 }
 0x299   :  { %1766 = vmatmul.bf16.gmra.mxu3 %v6935_v44 }
 0x29a   :  { %v1634_v27 = vpop.f32.mrf.mxu1  ;;  %v6977_v18 = vunpack.c.l.bf16 %v1949_v40 }
 0x29d   :  { %1829 = vmatmul.bf16.vlgmr.msra.gmra.mxu1 %v6822_v58 }
 0x2a2   :  { %v1683_v53 = vpop.f32.mrf.mxu2  ;;  %v1636_v57 = vpop.f32.mrf.mxu1 }
 0x2a3   :  { %v1870_v62 = vpack.c.bf16 %v1683_v53, %v1634_v27 }
 0x2a4   :  { %v1781_v29 = vpop.f32.mrf.mxu0 }
 0x2a5   :  { %v2046_v9 = vunpack.c.l.bf16 %v1870_v62  ;;  %v2047_v56 = vunpack.c.h.bf16 %v1870_v62 }
 0x2a7   :  { %v2142_v59 = vadd.f32 %v6954_v15, %v2046_v9  ;;  %v2143_v54 = vadd.f32 %v6954_v15, %v2047_v56 }
 0x2aa   :  { %v1685_v26 = vpop.f32.mrf.mxu2  ;;  %v1639_v30 = vpop.f32.mrf.mxu1 }
 0x2ab   :  { %v1873_v58 = vpack.c.bf16 %v1685_v26, %v1636_v57 }
 0x2ac   :  { %v1732_v8 = vpop.f32.mrf.mxu3  ;;  %v6958_v63 = vpop.f32.mrf.mxu0 }
 0x2ad   :  { %v6960_v31 = vpack.c.bf16 %v1781_v29, %v1732_v8  ;;  %v2051_v20 = vunpack.c.l.bf16 %v1873_v58  ;;  %v2052_v34 = vunpack.c.h.bf16 %v1873_v58  ;;  %1834 = vmatmul.bf16.gmra.mxu1 %v6837_v28  ;;  %v1941_v28 = vperm.slane %v1936_v7, %v8868_v3 }
 0x2af   :  { %v2147_v51 = vadd.f32 %v6956_v48, %v2051_v20  ;;  %v2148_v13 = vadd.f32 %v6956_v48, %v2052_v34  ;;  %v6975_v38 = vunpack.c.l.bf16 %v1941_v28  ;;  %v1997_v48 = vperm.slane %v6950_v37, %v8868_v3 }
 0x2b1   :  { %v6967_v61 = vpack.c.bf16 %v2147_v51, %v2142_v59  ;;  %v6969_v10 = vpack.c.bf16 %v2148_v13, %v2143_v54  ;;  %8871 = vst [vmem:[#allocation36_spill] sm:$0xff] %v6975_v38 }
 0x2b2   :  { %v1688_v52 = vpop.f32.mrf.mxu2  ;;  %v1641_v55 = vpop.f32.mrf.mxu1 }
 0x2b3   :  { %v1876_v14 = vpack.c.bf16 %v1688_v52, %v1639_v30  ;;  %v1965_v52 = vperm.slane %v6947_v11, %v8868_v3  ;;  %v2263_v17 = vunpack.c.l.bf16 %v6969_v10 }
 0x2b4   :  { %v6971_v0 = vpop.f32.mrf.mxu3  ;;  %v1786_v32 = vpop.f32.mrf.mxu0 }
 0x2b5   :  { %v2056_v62 = vunpack.c.l.bf16 %v1876_v14  ;;  %v2057_v23 = vunpack.c.h.bf16 %v1876_v14  ;;  %v6997_v28 = vunpack.c.l.bf16 %v1965_v52  ;;  %v1981_v52 = vperm.slane %v6941_v42, %v8868_v3 }
 0x2b7   :  { %v2152_v9 = vadd.f32 %v6975_v38, %v2056_v62  ;;  %v2153_v58 = vadd.f32 %v6975_v38, %v2057_v23 }
 0x2ba   :  { %v1690_v27 = vpop.f32.mrf.mxu2  ;;  %v1644_v53 = vpop.f32.mrf.mxu1 }
 0x2bb   :  { %v1879_v57 = vpack.c.bf16 %v1690_v27, %v1641_v55  ;;  %v1957_v55 = vperm.slane %v1952_v50, %v8868_v3 }
 0x2bc   :  { %v1737_v29 = vpop.f32.mrf.mxu3  ;;  %v6979_v39 = vpop.f32.mrf.mxu0 }
 0x2bd   :  { %1839 = vmatmul.bf16.gmra.mxu1 %v6846_v5  ;;  %v6982_v26 = vpack.c.bf16 %v1786_v32, %v1737_v29  ;;  %v2061_v30 = vunpack.c.l.bf16 %v1879_v57  ;;  %v2062_v7 = vunpack.c.h.bf16 %v1879_v57  ;;  %v6999_v40 = vunpack.c.l.bf16 %v1957_v55 }
 0x2bf   :  { %v2157_v56 = vadd.f32 %v6977_v18, %v2061_v30  ;;  %v2158_v8 = vadd.f32 %v6977_v18, %v2062_v7  ;;  %v2058_v33 = vunpack.c.l.bf16 %v6982_v26  ;;  %v2059_v37 = vunpack.c.h.bf16 %v6982_v26 }
 0x2c1   :  { %v6988_v20 = vpack.c.bf16 %v2157_v56, %v2152_v9  ;;  %v6990_v54 = vpack.c.bf16 %v2158_v8, %v2153_v58 }
 0x2c2   :  { %v1693_v34 = vpop.f32.mrf.mxu2  ;;  %v1646_v59 = vpop.f32.mrf.mxu1 }
 0x2c3   :  { %v1882_v51 = vpack.c.bf16 %v1693_v34, %v1644_v53  ;;  %v2272_v4 = vunpack.c.l.bf16 %v6988_v20  ;;  %v2273_v12 = vunpack.c.l.bf16 %v6990_v54 }
 0x2c4   :  { %v6992_v5 = vpop.f32.mrf.mxu3  ;;  %v1791_v13 = vpop.f32.mrf.mxu0 }
 0x2c5   :  { %v2066_v27 = vunpack.c.l.bf16 %v1882_v51  ;;  %v2067_v53 = vunpack.c.h.bf16 %v1882_v51 }
 0x2c7   :  { %v2162_v50 = vadd.f32 %v6999_v40, %v2066_v27  ;;  %v2163_v7 = vadd.f32 %v6999_v40, %v2067_v53 }
 0x2ca   :  { %v1695_v14 = vpop.f32.mrf.mxu2  ;;  %v1649_v32 = vpop.f32.mrf.mxu1 }
 0x2cb   :  { %v1885_v19 = vpack.c.bf16 %v1695_v14, %v1646_v59 }
 0x2cc   :  { %v1742_v57 = vpop.f32.mrf.mxu3  ;;  %v7001_v62 = vpop.f32.mrf.mxu0 }
 0x2cd   :  { %1844 = vmatmul.bf16.gmra.mxu1 %v6855_v49  ;;  %v7004_v29 = vpack.c.bf16 %v1791_v13, %v1742_v57  ;;  %v2071_v23 = vunpack.c.l.bf16 %v1885_v19  ;;  %v2072_v11 = vunpack.c.h.bf16 %v1885_v19  ;;  %v1973_v13 = vperm.slane %v6939_v22, %v8868_v3 }
 0x2ce   :  { %v7022_v57 = vunpack.c.l.bf16 %v1981_v52 }
 0x2cf   :  { %v2167_v30 = vadd.f32 %v6997_v28, %v2071_v23  ;;  %v2168_v9 = vadd.f32 %v6997_v28, %v2072_v11  ;;  %v7020_v27 = vunpack.c.l.bf16 %v1973_v13 }
 0x2d1   :  { %v7010_v56 = vpack.c.bf16 %v2167_v30, %v2162_v50  ;;  %v7012_v34 = vpack.c.bf16 %v2168_v9, %v2163_v7 }
 0x2d2   :  { %v1698_v58 = vpop.f32.mrf.mxu2  ;;  %v1651_v8 = vpop.f32.mrf.mxu1 }
 0x2d3   :  { %v1888_v59 = vpack.c.bf16 %v1698_v58, %v1649_v32 }
 0x2d4   :  { %v7014_v49 = vpop.f32.mrf.mxu3  ;;  %v1796_v51 = vpop.f32.mrf.mxu0 }
 0x2d5   :  { %v2076_v53 = vunpack.c.l.bf16 %v1888_v59  ;;  %v2077_v32 = vunpack.c.h.bf16 %v1888_v59 }
 0x2d7   :  { %v2172_v42 = vadd.f32 %v7020_v27, %v2076_v53  ;;  %v2173_v9 = vadd.f32 %v7020_v27, %v2077_v32 }
 0x2da   :  { %v1700_v55 = vpop.f32.mrf.mxu2  ;;  %v1654_v14 = vpop.f32.mrf.mxu1 }
 0x2db   :  { %v1891_v19 = vpack.c.bf16 %v1700_v55, %v1651_v8 }
 0x2dc   :  { %v1747_v23 = vpop.f32.mrf.mxu3  ;;  %v7024_v11 = vpop.f32.mrf.mxu0 }
 0x2dd   :  { %1849 = vmatmul.bf16.gmra.mxu1 %v6864_v24  ;;  %v7027_v50 = vpack.c.bf16 %v1796_v51, %v1747_v23  ;;  %v2081_v22 = vunpack.c.l.bf16 %v1891_v19  ;;  %v2082_v30 = vunpack.c.h.bf16 %v1891_v19 }
 0x2df   :  { %v2177_v7 = vadd.f32 %v7022_v57, %v2081_v22  ;;  %v2178_v58 = vadd.f32 %v7022_v57, %v2082_v30 }
 0x2e1   :  { %v7033_v8 = vpack.c.bf16 %v2177_v7, %v2172_v42  ;;  %v7035_v55 = vpack.c.bf16 %v2178_v58, %v2173_v9  ;;  %v2037_v9 = vperm.slane %v6889_v60, %v8868_v3  ;;  %v2029_v58 = vperm.slane %v6913_v47, %v8868_v3 }
 0x2e2   :  { %v1703_v13 = vpop.f32.mrf.mxu2  ;;  %v1656_v52 = vpop.f32.mrf.mxu1 }
 0x2e3   :  { %v7037_v59 = vpack.c.bf16 %v1703_v13, %v1654_v14  ;;  %v2045_v13 = vperm.slane %v6892_v25, %v8868_v3  ;;  %v7076_v47 = vunpack.c.l.bf16 %v2037_v9  ;;  %v2021_v25 = vperm.slane %v6944_v45, %v8868_v3 }
 0x2e4   :  { %v7039_v24 = vpop.f32.mrf.mxu3  ;;  %v1801_v51 = vpop.f32.mrf.mxu0  ;;  %v7082_v6 = vunpack.c.l.bf16 %v2029_v58  ;;  %v2048_v9 = vunpack.c.l.bf16 %v6960_v31  ;;  %v2267_v45 = vunpack.c.h.bf16 %v6967_v61  ;;  %v2268_v58 = vunpack.c.h.bf16 %v6969_v10 }
 0x2e5   :  { %v7084_v1 = vunpack.c.l.bf16 %v2045_v13  ;;  %v7101_v13 = vpack.c.bf16 %v6958_v63, %v6971_v0  ;;  %v7114_v63 = vunpack.c.l.bf16 %v1997_v48  ;;  %v7118_v0 = vpack.c.bf16 %v6979_v39, %v6992_v5 }
 0x2e6   :  { %v2278_v39 = vunpack.c.h.bf16 %v6990_v54  ;;  %v7135_v5 = vadd.f32 %v6975_v38, %v2059_v37  ;;  %v2287_v37 = vunpack.c.h.bf16 %v7010_v56 }
 0x2ea   :  { %v1705_v19 = vpop.f32.mrf.mxu2  ;;  %v7041_v23 = vpop.f32.mrf.mxu1 }
 0x2ec   :  { %v1752_v53 = vpop.f32.mrf.mxu3  ;;  %v7043_v22 = vpop.f32.mrf.mxu0 }
 0x2ed   :  { %1854 = vmatmul.bf16.gmra.mxu1 %v6873_v35  ;;  %v7046_v32 = vpack.c.bf16 %v1801_v51, %v1752_v53  ;;  %v2005_v35 = vperm.slane %v6918_v36, %v8868_v3  ;;  %v2262_v36 = vunpack.c.l.bf16 %v6967_v61  ;;  %v1897_v61 = vpack.c.bf16 %v1705_v19, %v1656_v52 }
 0x2ee   :  { %v7112_v3 = vadd.f32 %v6954_v15, %v2048_v9  ;;  %v2277_v52 = vunpack.c.h.bf16 %v6988_v20  ;;  %v2282_v9 = vunpack.c.l.bf16 %v7010_v56 }
 0x2ef   :  { %v7086_v16 = vunpack.c.l.bf16 %v2005_v35  ;;  %v7103_v35 = vunpack.c.l.bf16 %v2021_v25  ;;  %5202 = vtanh.f32 %v2262_v36  ;;  %v2092_v48 = vunpack.c.h.bf16 %v1897_v61 }
 0x2f0   :  { %5204 = vtanh.f32 %v2263_v17  ;;  %v7131_v17 = vadd.f32 %v6975_v38, %v2058_v33  ;;  %v7144_v33 = vpack.c.bf16 %v7001_v62, %v7014_v49 }
 0x2f1   :  { %8872 = vst [vmem:[#allocation34_spill] sm:$0xff] %v7103_v35  ;;  %5206 = vtanh.f32 %v2267_v45  ;;  %v2091_v45 = vunpack.c.l.bf16 %v1897_v61 }
 0x2f2   :  { %v7048_v30 = vpop.f32.mrf.mxu2  ;;  %v7050_v42 = vpop.f32.mrf.mxu1  ;;  %5208 = vtanh.f32 %v2268_v58  ;;  %v2283_v58 = vunpack.c.l.bf16 %v7012_v34 }
 0x2f3   :  { %5210 = vtanh.f32 %v2272_v4  ;;  %v2187_v56 = vadd.f32 %v7114_v63, %v2091_v45 }
 0x2f4   :  { %v7052_v7 = vpop.f32.mrf.mxu3  ;;  %v7054_v14 = vpop.f32.mrf.mxu0  ;;  %5212 = vtanh.f32 %v2273_v12  ;;  %v2086_v12 = vunpack.c.l.bf16 %v7037_v59 }
 0x2f5   :  { %v7138_v20 = vpop.eup %5202  ;;  %5214 = vtanh.f32 %v2277_v52  ;;  %v2288_v52 = vunpack.c.h.bf16 %v7012_v34 }
 0x2f6   :  { %8874 = vst [vmem:[#allocation33_spill] sm:$0xff] %v7138_v20  ;;  %v7146_v54 = vpop.eup %5204  ;;  %5216 = vtanh.f32 %v2278_v39  ;;  %v2182_v45 = vadd.f32 %v7095_v2, %v2086_v12 }
 0x2f7   :  { %8875 = vst [vmem:[#allocation31_spill] sm:$0xff] %v7146_v54  ;;  %v7151_v26 = vpop.eup %5206  ;;  %5218 = vtanh.f32 %v2282_v9  ;;  %v2292_v9 = vunpack.c.l.bf16 %v7033_v8 }
 0x2f8   :  { %8876 = vst [vmem:[#allocation32_spill] sm:$0xff] %v7151_v26  ;;  %v7157_v49 = vpop.eup %5208  ;;  %5220 = vtanh.f32 %v2283_v58  ;;  %v7178_v58 = vpack.c.bf16 %v7024_v11, %v7039_v24 }
 0x2f9   :  { %8877 = vst [vmem:[#allocation29_spill] sm:$0xff] %v7157_v49  ;;  %v7164_v39 = vpop.eup %5210  ;;  %5222 = vtanh.f32 %v2287_v37  ;;  %v2293_v49 = vunpack.c.l.bf16 %v7035_v55  ;;  %v2242_v37 = vpack.c.bf16 %v2187_v56, %v2182_v45 }
 0x2fa   :  { %v7064_v51 = vpop.f32.mrf.mxu2  ;;  %v7066_v53 = vpop.f32.mrf.mxu1  ;;  %8878 = vst [vmem:[#allocation30_spill] sm:$0xff] %v7164_v39  ;;  %5224 = vtanh.f32 %v2288_v52 }
 0x2fb   :  { %v1903_v62 = vpack.c.bf16 %v7064_v51, %v7050_v42  ;;  %v1900_v42 = vpack.c.bf16 %v7048_v30, %v7041_v23  ;;  %v7170_v51 = vpop.eup %5212  ;;  %v2297_v30 = vunpack.c.h.bf16 %v7033_v8  ;;  %5226 = vtanh.f32 %v2292_v9 }
 0x2fc   :  { %v7072_v60 = vpop.f32.mrf.mxu3  ;;  %v7074_v46 = vpop.f32.mrf.mxu0  ;;  %8879 = vst [vmem:[#allocation40_spill] sm:$0xff] %v7170_v51  ;;  %5228 = vtanh.f32 %v2293_v49  ;;  %v2302_v45 = vunpack.c.l.bf16 %v2242_v37 }
 0x2fd   :  { %1859 = vmatmul.bf16.gmra.mxu1 %v6910_v43  ;;  %v2049_v43 = vunpack.c.h.bf16 %v6960_v31  ;;  %v7182_v23 = vpop.eup %5214  ;;  %v2096_v11 = vunpack.c.l.bf16 %v1900_v42  ;;  %v2102_v24 = vunpack.c.h.bf16 %v1903_v62  ;;  %5230 = vtanh.f32 %v2297_v30 }
 0x2fe   :  { %8880 = vst [vmem:[#allocation39_spill] sm:$0xff] %v7182_v23  ;;  %v7185_v54 = vpop.eup %5216 }
 0x2ff   :  { %v7121_v25 = vadd.f32 %v6954_v15, %v2049_v43  ;;  %v2087_v15 = vunpack.c.h.bf16 %v7037_v59  ;;  %v2188_v43 = vadd.f32 %v7114_v63, %v2092_v48  ;;  %v2101_v59 = vunpack.c.l.bf16 %v1903_v62  ;;  %8881 = vst [vmem:[#allocation47_spill] sm:$0xff] %v7185_v54  ;;  %v7188_v51 = vpop.eup %5218 }
 0x300   :  { %8882 = vst [vmem:[#allocation48_spill] sm:$0xff] %v7188_v51  ;;  %v7194_v52 = vpop.eup %5220 }
 0x301   :  { %8873 = vst [vmem:[#allocation35_spill] sm:$0xff] %v7121_v25  ;;  %v2183_v48 = vadd.f32 %v7095_v2, %v2087_v15  ;;  %v7198_v56 = vpop.eup %5222 }
 0x302   :  { %v7109_v31 = vpop.f32.mrf.mxu2  ;;  %v1666_v10 = vpop.f32.mrf.mxu1  ;;  %8883 = vst [vmem:[#allocation45_spill] sm:$0xff] %v7194_v52 }
 0x303   :  { %v2243_v20 = vpack.c.bf16 %v2188_v43, %v2183_v48  ;;  %v1906_v8 = vpack.c.bf16 %v7109_v31, %v7066_v53  ;;  %v2197_v43 = vadd.f32 %v7089_v21, %v2101_v59  ;;  %8884 = vst [vmem:[#allocation46_spill] sm:$0xff] %v7198_v56  ;;  %v2192_v53 = vadd.f32 %v7086_v16, %v2096_v11  ;;  %v7203_v26 = vpop.eup %5224 }
 0x304   :  { %v7125_v19 = vpop.f32.mrf.mxu3  ;;  %v7127_v36 = vpop.f32.mrf.mxu0  ;;  %v2198_v31 = vadd.f32 %v7089_v21, %v2102_v24  ;;  %8885 = vst [vmem:[#allocation43_spill] sm:$0xff] %v7203_v26 }
 0x305   :  { %v2303_v15 = vunpack.c.l.bf16 %v2243_v20  ;;  %v2106_v30 = vunpack.c.l.bf16 %v1906_v8  ;;  %v2247_v23 = vpack.c.bf16 %v2197_v43, %v2192_v53  ;;  %v2107_v39 = vunpack.c.h.bf16 %v1906_v8  ;;  %v7211_v11 = vpop.eup %5226 }
 0x306   :  { %v2308_v24 = vunpack.c.h.bf16 %v2243_v20  ;;  %v7218_v59 = vpop.eup %5228 }
 0x307   :  { %v7224_v8 = vpop.eup %5230 }
 0x30a   :  { %v1715_v4 = vpop.f32.mrf.mxu2  ;;  %v7162_v38 = vpop.f32.mrf.mxu1 }
 0x30b   :  { %v1909_v34 = vpack.c.bf16 %v1715_v4, %v1666_v10  ;;  %v2097_v4 = vunpack.c.h.bf16 %v1900_v42  ;;  %v7208_v42 = vpack.c.bf16 %v7054_v14, %v7072_v60  ;;  %v2307_v10 = vunpack.c.h.bf16 %v2242_v37 }
 0x30c   :  { %v1762_v61 = vpop.f32.mrf.mxu3  ;;  %v1813_v12 = vpop.f32.mrf.mxu0 }
 0x30d   :  { %1864 = vmatmul.bf16.gmra.mxu1 %v6935_v44  ;;  %v2298_v44 = vunpack.c.h.bf16 %v7035_v55  ;;  %v2111_v48 = vunpack.c.l.bf16 %v1909_v34  ;;  %v2112_v49 = vunpack.c.h.bf16 %v1909_v34  ;;  %v2193_v54 = vadd.f32 %v7086_v16, %v2097_v4 }
 0x30e   :  { %v7215_v34 = vpack.c.bf16 %v7043_v22, %v7052_v7  ;;  %v1907_v60 = vpack.c.bf16 %v7127_v36, %v1762_v61  ;;  %v2098_v20 = vunpack.c.l.bf16 %v7208_v42  ;;  %v2202_v4 = vadd.f32 %v7103_v35, %v2106_v30 }
 0x30f   :  { %5232 = vtanh.f32 %v2298_v44  ;;  %v2207_v44 = vadd.f32 %v7082_v6, %v2111_v48  ;;  %v7220_v14 = vpack.c.bf16 %v2198_v31, %v2193_v54  ;;  %v2208_v37 = vadd.f32 %v7082_v6, %v2112_v49 }
 0x310   :  { %5234 = vtanh.f32 %v2302_v45  ;;  %v2203_v54 = vadd.f32 %v7103_v35, %v2107_v39  ;;  %v7246_v30 = vadd.f32 %v7086_v16, %v2098_v20  ;;  %v2317_v36 = vunpack.c.h.bf16 %v2247_v23 }
 0x311   :  { %5236 = vtanh.f32 %v2303_v15  ;;  %v2312_v15 = vunpack.c.l.bf16 %v2247_v23  ;;  %v7235_v53 = vpack.c.bf16 %v2207_v44, %v2202_v4  ;;  %v2109_v45 = vunpack.c.h.bf16 %v1907_v60 }
 0x312   :  { %v1718_v55 = vpop.f32.mrf.mxu2  ;;  %v1671_v9 = vpop.f32.mrf.mxu1  ;;  %5238 = vtanh.f32 %v2307_v10  ;;  %v1904_v20 = vpack.c.bf16 %v7074_v46, %v7125_v19 }
 0x313   :  { %v1912_v22 = vpack.c.bf16 %v1718_v55, %v7162_v38  ;;  %5240 = vtanh.f32 %v2308_v24  ;;  %v2313_v38 = vunpack.c.l.bf16 %v7220_v14  ;;  %v7240_v55 = vpack.c.bf16 %v2208_v37, %v2203_v54 }
 0x314   :  { %v1764_v62 = vpop.f32.mrf.mxu3  ;;  %v1816_v7 = vpop.f32.mrf.mxu0  ;;  %5242 = vtanh.f32 %v2312_v15  ;;  %v2322_v37 = vunpack.c.l.bf16 %v7235_v53  ;;  %v2318_v15 = vunpack.c.h.bf16 %v7220_v14  ;;  %v2205_v19 = vadd.f32 %v7103_v35, %v2109_v45 }
 0x315   :  { %v1910_v43 = vpack.c.bf16 %v1813_v12, %v1764_v62  ;;  %v7231_v48 = vpop.eup %5232  ;;  %v2108_v62 = vunpack.c.l.bf16 %v1907_v60  ;;  %v2116_v61 = vunpack.c.l.bf16 %v1912_v22  ;;  %5244 = vtanh.f32 %v2313_v38 }
 0x316   :  { %v7242_v49 = vpop.eup %5234  ;;  %v2323_v52 = vunpack.c.l.bf16 %v7240_v55  ;;  %5246 = vtanh.f32 %v2317_v36 }
 0x317   :  { %v2113_v24 = vunpack.c.l.bf16 %v1910_v43  ;;  %v7248_v4 = vpop.eup %5236  ;;  %v2114_v54 = vunpack.c.h.bf16 %v1910_v43  ;;  %v2204_v39 = vadd.f32 %v7103_v35, %v2108_v62  ;;  %v2212_v60 = vadd.f32 %v7076_v47, %v2116_v61 }
 0x318   :  { %v7251_v26 = vpop.eup %5238  ;;  %5248 = vtanh.f32 %v2322_v37 }
 0x319   :  { %v7257_v56 = vpop.eup %5240  ;;  %v2209_v23 = vadd.f32 %v7082_v6, %v2113_v24  ;;  %v2210_v62 = vadd.f32 %v7082_v6, %v2114_v54  ;;  %5250 = vtanh.f32 %v2323_v52  ;;  %v2328_v52 = vunpack.c.h.bf16 %v7240_v55 }
 0x31a   :  { %v1720_v31 = vpop.f32.mrf.mxu2  ;;  %v7237_v12 = vpop.f32.mrf.mxu1 }
 0x31b   :  { %8886 = vst [vmem:[#allocation44_spill] sm:$0xff] %v7237_v12  ;;  %v1915_v10 = vpack.c.bf16 %v1720_v31, %v1671_v9  ;;  %v2117_v12 = vunpack.c.h.bf16 %v1912_v22  ;;  %v7269_v61 = vpop.eup %5242  ;;  %v7271_v36 = vpack.c.bf16 %v2209_v23, %v2204_v39  ;;  %v7276_v35 = vpack.c.bf16 %v2210_v62, %v2205_v19  ;;  %v8889_v19 = vld [vmem:[#allocation13_spill] sm:$0xff] }
 0x31c   :  { %v1767_v44 = vpop.f32.mrf.mxu3  ;;  %v1818_v51 = vpop.f32.mrf.mxu0 }
 0x31d   :  { %v2121_v9 = vunpack.c.l.bf16 %v1915_v10  ;;  %v2122_v31 = vunpack.c.h.bf16 %v1915_v10  ;;  %v1913_v22 = vpack.c.bf16 %v1816_v7, %v1767_v44  ;;  %v2213_v38 = vadd.f32 %v7076_v47, %v2117_v12  ;;  %v7273_v45 = vpop.eup %5244 }
 0x31e   :  { %v2103_v7 = vunpack.c.l.bf16 %v1904_v20  ;;  %v2104_v44 = vunpack.c.h.bf16 %v1904_v20  ;;  %v7278_v20 = vpop.eup %5246 }
 0x31f   :  { %v2217_v43 = vadd.f32 %v7084_v1, %v2121_v9  ;;  %v2218_v46 = vadd.f32 %v7084_v1, %v2122_v31  ;;  %v2118_v12 = vunpack.c.l.bf16 %v1913_v22  ;;  %v2119_v37 = vunpack.c.h.bf16 %v1913_v22 }
 0x320   :  { %v2199_v22 = vadd.f32 %v7089_v21, %v2103_v7  ;;  %v8890_v7 = vunpack.c.h.bf16 %v7208_v42  ;;  %v8894_v42 = vunpack.c.h.bf16 %v7046_v32 }
 0x321   :  { %v2257_v10 = vpack.c.bf16 %v2217_v43, %v2212_v60  ;;  %v2258_v14 = vpack.c.bf16 %v2218_v46, %v2213_v38  ;;  %v5792_v38 = vmov 3   ;;  %v7281_v46 = vpop.eup %5248  ;;  %v2215_v62 = vadd.f32 %v7076_v47, %v2119_v37 }
 0x322   :  { %v7267_v24 = vpop.f32.mrf.mxu1  ;;  %4872 = vset.pattern.permute.xlu0 %v5792_v38  ;;  %4873 = vset.pattern.permute.xlu1 %v5792_v38  ;;  %v7288_v55 = vpop.eup %5250  ;;  %v8893_v37 = vunpack.c.l.bf16 %v7046_v32 }
 0x323   :  { %8887 = vst [vmem:[#allocation41_spill] sm:$0xff] %v7267_v24  ;;  %v2332_v9 = vunpack.c.l.bf16 %v2257_v10  ;;  %v2337_v31 = vunpack.c.h.bf16 %v2257_v10  ;;  %v2333_v54 = vunpack.c.l.bf16 %v2258_v14  ;;  %v2338_v60 = vunpack.c.h.bf16 %v2258_v14  ;;  %2940 = vperm.xlu1 %4873, %v8889_v19   ;;  %4874 = vset.pattern.permute.xlu2 %v5792_v38 }
 0x324   :  { %v1769_v25 = vpop.f32.mrf.mxu3  ;;  %v2327_v24 = vunpack.c.h.bf16 %v7235_v53  ;;  %v8888_v53 = vld [vmem:[#allocation14_spill] sm:$0xff] }
 0x325   :  { %v1916_v43 = vpack.c.bf16 %v1818_v51, %v1769_v25  ;;  %5252 = vtanh.f32 %v2332_v9  ;;  %v2324_v25 = vunpack.c.l.bf16 %v7271_v36  ;;  %v2214_v51 = vadd.f32 %v7076_v47, %v2118_v12  ;;  %2932 = vperm.xlu0 %4872, %v8888_v53  }
 0x326   :  { %5254 = vtanh.f32 %v2333_v54  ;;  %v2195_v9 = vadd.f32 %v7086_v16, %v8890_v7  ;;  %v2200_v12 = vadd.f32 %v7089_v21, %v2104_v44  ;;  %v2185_v7 = vadd.f32 %v7095_v2, %v8894_v42 }
 0x327   :  { %v2123_v39 = vunpack.c.l.bf16 %v1916_v43  ;;  %v2124_v23 = vunpack.c.h.bf16 %v1916_v43  ;;  %5256 = vtanh.f32 %v2337_v31  ;;  %v2325_v31 = vunpack.c.l.bf16 %v7276_v35  ;;  %v8892_v43 = vld [vmem:[#allocation18_spill] sm:$0xff] }
 0x328   :  { %5258 = vtanh.f32 %v2338_v60  ;;  %2916 = vperm.xlu2 %4874, %v8892_v43   ;;  %v2184_v60 = vadd.f32 %v7095_v2, %v8893_v37  ;;  %v2249_v53 = vpack.c.bf16 %v2199_v22, %v7246_v30  ;;  %v2250_v32 = vpack.c.bf16 %v2200_v12, %v2195_v9  ;;  %v8899_v12 = vld [vmem:[#allocation16_spill] sm:$0xff] }
 0x329   :  { %v2219_v10 = vadd.f32 %v7084_v1, %v2123_v39  ;;  %v2220_v14 = vadd.f32 %v7084_v1, %v2124_v23  ;;  %5260 = vtanh.f32 %v2327_v24  ;;  %v8895_v24 = vunpack.c.l.bf16 %v7215_v34 }
 0x32a   :  { %v7298_v54 = vpop.f32.mrf.mxu1  ;;  %5262 = vtanh.f32 %v2328_v52  ;;  %v8897_v42 = vunpack.c.l.bf16 %v7027_v50  ;;  %v2329_v30 = vunpack.c.h.bf16 %v7271_v36 }
 0x32b   :  { %8891 = vst [vmem:[#allocation42_spill] sm:$0xff] %v7298_v54  ;;  %v2259_v39 = vpack.c.bf16 %v2219_v10, %v2214_v51  ;;  %v2260_v23 = vpack.c.bf16 %v2220_v14, %v2215_v62  ;;  %v5253_v38 = vpop.eup %5252  ;;  %v2189_v44 = vadd.f32 %v7114_v63, %v8895_v24  ;;  %5264 = vtanh.f32 %v2318_v15  ;;  %2924 = vperm.xlu1 %4873, %v8899_v12  }
 0x32c   :  { %v5255_v19 = vpop.eup %5254  ;;  %5266 = vtanh.f32 %v2324_v25  ;;  %v8896_v51 = vunpack.c.h.bf16 %v7215_v34  ;;  %v2174_v15 = vadd.f32 %v7020_v27, %v8897_v42  ;;  %v2330_v34 = vunpack.c.h.bf16 %v7276_v35 }
 0x32d   :  { %v2334_v43 = vunpack.c.l.bf16 %v2259_v39  ;;  %v2335_v54 = vunpack.c.l.bf16 %v2260_v23  ;;  %v2339_v37 = vunpack.c.h.bf16 %v2259_v39  ;;  %v5257_v52 = vpop.eup %5256  ;;  %5268 = vtanh.f32 %v2325_v31  ;;  %2908 = vperm.xlu0 %4872, %v6224_v41  }
 0x32e   :  { %v2190_v62 = vadd.f32 %v7114_v63, %v8896_v51  ;;  %v2340_v10 = vunpack.c.h.bf16 %v2260_v23  ;;  %v5259_v14 = vpop.eup %5258  ;;  %v2457_v22 = vpack.c.bf16 %v5257_v52, %v5253_v38  ;;  %v8898_v39 = vunpack.c.h.bf16 %v7027_v50 }
 0x32f   :  { %5270 = vtanh.f32 %v2334_v43  ;;  %v5261_v25 = vpop.eup %5260  ;;  %v2458_v9 = vpack.c.bf16 %v5259_v14, %v5255_v19  ;;  %v8900_v23 = vunpack.c.l.bf16 %v7178_v58  ;;  %v7327_v43 = vpack.c.bf16 %v2189_v44, %v2184_v60  ;;  %v8902_v14 = vld [vmem:[#allocation20_spill] sm:$0xff] }
 0x330   :  { %v2175_v24 = vadd.f32 %v7020_v27, %v8898_v39  ;;  %5272 = vtanh.f32 %v2335_v54  ;;  %v5263_v31 = vpop.eup %5262  ;;  %v2314_v38 = vunpack.c.l.bf16 %v2249_v53  ;;  %2526 = vmatpush.bf16.msra.mxu2 %v2457_v22  ;;  %v8901_v52 = vunpack.c.h.bf16 %v7178_v58  ;;  %2900 = vperm.xlu2 %4874, %v8902_v14  }
 0x331   :  { %v2179_v36 = vadd.f32 %v7022_v57, %v8900_v23  ;;  %5274 = vtanh.f32 %v2339_v37  ;;  %v5265_v50 = vpop.eup %5264  ;;  %v7332_v19 = vpack.c.bf16 %v2190_v62, %v2185_v7  ;;  %v2315_v54 = vunpack.c.l.bf16 %v2250_v32  ;;  %2575 = vmatpush.bf16.msra.mxu3 %v2458_v9 }
 0x332   :  { %v2180_v35 = vadd.f32 %v7022_v57, %v8901_v52  ;;  %5276 = vtanh.f32 %v2340_v10  ;;  %v7334_v51 = vpop.f32.mrf.mxu1  ;;  %v7337_v42 = vpop.eup %5266  ;;  %v8903_v60 = vunpack.c.l.bf16 %v7004_v29  ;;  %v2319_v37 = vunpack.c.h.bf16 %v2249_v53 }
 0x333   :  { %5278 = vtanh.f32 %v2329_v30  ;;  %v2452_v58 = vpack.c.bf16 %v5261_v25, %v7281_v46  ;;  %v7343_v22 = vpop.eup %5268  ;;  %v8904_v7 = vunpack.c.h.bf16 %v7004_v29  ;;  %v2320_v10 = vunpack.c.h.bf16 %v2250_v32 }
 0x334   :  { %v2164_v44 = vadd.f32 %v6999_v40, %v8903_v60  ;;  %5280 = vtanh.f32 %v2330_v34  ;;  %v2453_v39 = vpack.c.bf16 %v5263_v31, %v7288_v55  ;;  %v8905_v23 = vunpack.c.l.bf16 %v7144_v33 }
 0x335   :  { %v2165_v62 = vadd.f32 %v6999_v40, %v8904_v7  ;;  %v5271_v9 = vpop.eup %5270  ;;  %v7352_v60 = vpack.c.bf16 %v2179_v36, %v2174_v15  ;;  %v2304_v53 = vunpack.c.l.bf16 %v7327_v43  ;;  %5282 = vtanh.f32 %v2314_v38  ;;  %2527 = vmatpush.bf16.msra.mxu2 %v2452_v58  ;;  %v8909_v58 = vld [vmem:[#allocation15_spill] sm:$0xff] }
 0x336   :  { %v2169_v52 = vadd.f32 %v6997_v28, %v8905_v23  ;;  %v5273_v46 = vpop.eup %5272  ;;  %v8906_v29 = vunpack.c.h.bf16 %v7144_v33  ;;  %v2240_v32 = vpack.c.bf16 %v2180_v35, %v2175_v24  ;;  %v2305_v25 = vunpack.c.l.bf16 %v7332_v19  ;;  %2576 = vmatpush.bf16.msra.mxu3 %v2453_v39  ;;  %2884 = vperm.xlu1 %4873, %v8909_v58   ;;  %v8912_v23 = vld [vmem:[#allocation37_spill] sm:$0xff] }
 0x337   :  { %5284 = vtanh.f32 %v2315_v54  ;;  %v5275_v55 = vpop.eup %5274  ;;  %v8907_v34 = vunpack.c.l.bf16 %v7118_v0  ;;  %v2309_v31 = vunpack.c.h.bf16 %v7327_v43  ;;  %v2447_v36 = vpack.c.bf16 %v7278_v20, %v7269_v61  ;;  %v8908_v54 = vld [vmem:[#allocation21_spill] sm:$0xff] }
 0x338   :  { %v2170_v30 = vadd.f32 %v6997_v28, %v8906_v29  ;;  %5286 = vtanh.f32 %v2319_v37  ;;  %v5277_v38 = vpop.eup %5276  ;;  %v2310_v33 = vunpack.c.h.bf16 %v7332_v19  ;;  %v2459_v24 = vpack.c.bf16 %v5275_v55, %v5271_v9  ;;  %2868 = vperm.xlu0 %4872, %v8908_v54  }
 0x339   :  { %v2159_v15 = vadd.f32 %v6977_v18, %v8907_v34  ;;  %5288 = vtanh.f32 %v2320_v10  ;;  %v2448_v35 = vpack.c.bf16 %v5265_v50, %v7273_v45  ;;  %v5279_v7 = vpop.eup %5278  ;;  %v7369_v39 = vpack.c.bf16 %v2169_v52, %v2164_v44  ;;  %2528 = vmatpush.bf16.msra.mxu2 %v2447_v36 }
 0x33a   :  { %v2294_v43 = vunpack.c.l.bf16 %v7352_v60  ;;  %5290 = vtanh.f32 %v2304_v53  ;;  %v2460_v37 = vpack.c.bf16 %v5277_v38, %v5273_v46  ;;  %v5281_v61 = vpop.eup %5280  ;;  %v8910_v20 = vunpack.c.h.bf16 %v7118_v0  ;;  %2624 = vmatpush.bf16.msrb.mxu0 %v2459_v24  ;;  %v7377_v50 = vpop.f32.mrf.mxu1  ;;  %v8915_v38 = vld [vmem:[#allocation23_spill] sm:$0xff] }
 0x33b   :  { %v7375_v10 = vpack.c.bf16 %v2170_v30, %v2165_v62  ;;  %v2295_v45 = vunpack.c.l.bf16 %v2240_v32  ;;  %5292 = vtanh.f32 %v2305_v25  ;;  %2577 = vmatpush.bf16.msra.mxu3 %v2448_v35  ;;  %v5283_v44 = vpop.eup %5282  ;;  %v8911_v9 = vunpack.c.l.bf16 %v7101_v13  ;;  %v8913_v62 = vld [vmem:[#allocation22_spill] sm:$0xff] }
 0x33c   :  { %v2160_v19 = vadd.f32 %v6977_v18, %v8910_v20  ;;  %v2299_v53 = vunpack.c.h.bf16 %v7352_v60  ;;  %5294 = vtanh.f32 %v2309_v31  ;;  %2673 = vmatpush.bf16.msrb.mxu1 %v2460_v37  ;;  %v2442_v0 = vpack.c.bf16 %v7251_v26, %v7242_v49  ;;  %2892 = vperm.xlu2 %4874, %v8913_v62   ;;  %v8918_v20 = vld [vmem:[#allocation48_spill] sm:$0xff] }
 0x33d   :  { %v2149_v52 = vadd.f32 %v8912_v23, %v8911_v9  ;;  %v5285_v46 = vpop.eup %5284  ;;  %v2300_v29 = vunpack.c.h.bf16 %v2240_v32  ;;  %5296 = vtanh.f32 %v2310_v33  ;;  %v2454_v30 = vpack.c.bf16 %v5279_v7, %v7337_v42  ;;  %v8916_v33 = vld [vmem:[#allocation17_spill] sm:$0xff] }
 0x33e   :  { %v2443_v25 = vpack.c.bf16 %v7257_v56, %v7248_v4  ;;  %v5287_v55 = vpop.eup %5286  ;;  %v2229_v34 = vpack.c.bf16 %v2159_v15, %v7131_v17  ;;  %v2284_v60 = vunpack.c.l.bf16 %v7369_v39  ;;  %5298 = vtanh.f32 %v2294_v43  ;;  %2529 = vmatpush.bf16.msra.mxu2 %v2442_v0  ;;  %2876 = vperm.xlu1 %4873, %v8916_v33  }
 0x33f   :  { %v2455_v31 = vpack.c.bf16 %v5281_v61, %v7343_v22  ;;  %v5289_v26 = vpop.eup %5288  ;;  %v8914_v49 = vunpack.c.h.bf16 %v7101_v13  ;;  %v2230_v36 = vpack.c.bf16 %v2160_v19, %v7135_v5  ;;  %v2285_v42 = vunpack.c.l.bf16 %v7375_v10  ;;  %2625 = vmatpush.bf16.msrb.mxu0 %v2454_v30  ;;  %v8919_v19 = vld [vmem:[#allocation46_spill] sm:$0xff] }
 0x340   :  { %5300 = vtanh.f32 %v2295_v45  ;;  %2578 = vmatpush.bf16.msra.mxu3 %v2443_v25  ;;  %v5291_v56 = vpop.eup %5290  ;;  %v2289_v17 = vunpack.c.h.bf16 %v7369_v39  ;;  %v2437_v4 = vpack.c.bf16 %v7224_v8, %v7211_v11  ;;  %v2290_v13 = vunpack.c.h.bf16 %v7375_v10  ;;  %2860 = vperm.xlu0 %4872, %v8915_v38   ;;  %v8917_v8 = vld [vmem:[#allocation35_spill] sm:$0xff]  ;;  %v8920_v10 = vld [vmem:[#allocation24_spill] sm:$0xff] }
 0x341   :  { %v2150_v32 = vadd.f32 %v8912_v23, %v8914_v49  ;;  %5302 = vtanh.f32 %v2299_v53  ;;  %2674 = vmatpush.bf16.msrb.mxu1 %v2455_v31  ;;  %v5293_v22 = vpop.eup %5292  ;;  %v2449_v15 = vpack.c.bf16 %v5287_v55, %v5283_v44  ;;  %v2438_v5 = vpack.c.bf16 %v7231_v48, %v7218_v59  ;;  %v8922_v53 = vld [vmem:[#allocation43_spill] sm:$0xff]  ;;  %v8923_v31 = vld [vmem:[#allocation30_spill] sm:$0xff] }
 0x342   :  { %5304 = vtanh.f32 %v2300_v29  ;;  %v5295_v24 = vpop.eup %5294  ;;  %v2224_v35 = vpack.c.bf16 %v2149_v52, %v7112_v3  ;;  %v2274_v7 = vunpack.c.l.bf16 %v2229_v34  ;;  %v2450_v39 = vpack.c.bf16 %v5289_v26, %v5285_v46  ;;  %2530 = vmatpush.bf16.msra.mxu2 %v2437_v4  ;;  %v7407_v61 = vpop.f32.mrf.mxu1  ;;  %v8921_v52 = vld [vmem:[#allocation45_spill] sm:$0xff]  ;;  %v8924_v26 = vld [vmem:[#allocation39_spill] sm:$0xff] }
 0x343   :  { %5306 = vtanh.f32 %v2284_v60  ;;  %v5297_v11 = vpop.eup %5296  ;;  %v2225_v43 = vpack.c.bf16 %v2150_v32, %v8917_v8  ;;  %v2275_v37 = vunpack.c.l.bf16 %v2230_v36  ;;  %2626 = vmatpush.bf16.msrb.mxu0 %v2449_v15  ;;  %v2279_v48 = vunpack.c.h.bf16 %v2229_v34 }
 0x344   :  { %5308 = vtanh.f32 %v2285_v42  ;;  %2579 = vmatpush.bf16.msra.mxu3 %v2438_v5  ;;  %v5299_v59 = vpop.eup %5298  ;;  %v2432_v3 = vpack.c.bf16 %v8919_v19, %v8918_v20  ;;  %2852 = vperm.xlu2 %4874, %v8920_v10   ;;  %v2280_v44 = vunpack.c.h.bf16 %v2230_v36  ;;  %v2444_v9 = vpack.c.bf16 %v5295_v24, %v5291_v56  ;;  %v8925_v56 = vld [vmem:[#allocation40_spill] sm:$0xff]  ;;  %v8933_v20 = vld [vmem:[#allocation29_spill] sm:$0xff] }
 0x345   :  { %5310 = vtanh.f32 %v2289_v17  ;;  %2675 = vmatpush.bf16.msrb.mxu1 %v2450_v39  ;;  %v2433_v0 = vpack.c.bf16 %v8922_v53, %v8921_v52  ;;  %v2264_v29 = vunpack.c.l.bf16 %v2224_v35  ;;  %v2445_v30 = vpack.c.bf16 %v5297_v11, %v5293_v22  ;;  %v8926_v17 = vld [vmem:[#allocation47_spill] sm:$0xff]  ;;  %v8927_v22 = vld [vmem:[#allocation25_spill] sm:$0xff]  ;;  %v8930_v11 = vld [vmem:[#allocation32_spill] sm:$0xff] }
 0x346   :  { %v5301_v45 = vpop.eup %5300  ;;  %5312 = vtanh.f32 %v2290_v13  ;;  %2531 = vmatpush.bf16.msra.mxu2 %v2432_v3  ;;  %v2265_v55 = vunpack.c.l.bf16 %v2225_v43  ;;  %v2269_v60 = vunpack.c.h.bf16 %v2224_v35  ;;  %v2427_v49 = vpack.c.bf16 %v8924_v26, %v8923_v31  ;;  %v8928_v13 = vld [vmem:[#allocation11_spill] sm:$0xff]  ;;  %v8929_v39 = vld [vmem:[#allocation33_spill] sm:$0xff] }
 0x347   :  { %v5303_v46 = vpop.eup %5302  ;;  %5314 = vtanh.f32 %v2274_v7  ;;  %2627 = vmatpush.bf16.msrb.mxu0 %v2444_v9  ;;  %v2270_v36 = vunpack.c.h.bf16 %v2225_v43  ;;  %v2428_v4 = vpack.c.bf16 %v8926_v17, %v8925_v56  ;;  %2836 = vperm.xlu1 %4873, %v8928_v13   ;;  %v2422_v8 = vpack.c.bf16 %v8930_v11, %v8929_v39  ;;  %v8931_v43 = vld [vmem:[#allocation26_spill] sm:$0xff]  ;;  %v7434_v26 = vld [vmem:[#allocation2 + $0x8] sm:$0xff] }
 0x348   :  { %v5305_v25 = vpop.eup %5304  ;;  %5316 = vtanh.f32 %v2275_v37  ;;  %2580 = vmatpush.bf16.msra.mxu3 %v2433_v0  ;;  %v2439_v42 = vpack.c.bf16 %v5303_v46, %v5299_v59  ;;  %2820 = vperm.xlu0 %4872, %v8927_v22   ;;  %v7427_v3 = vld [vmem:[#allocation2] sm:$0xff]  ;;  %v8934_v46 = vld [vmem:[#allocation12_spill] sm:$0xff]  ;;  %v7446_v17 = vld [vmem:[#allocation2 + $0x18] sm:$0xff] }
 0x349   :  { %v5307_v34 = vpop.eup %5306  ;;  %5318 = vtanh.f32 %v2279_v48  ;;  %2676 = vmatpush.bf16.msrb.mxu1 %v2445_v30  ;;  %v2440_v5 = vpack.c.bf16 %v5305_v25, %v5301_v45  ;;  %v8932_v48 = vld [vmem:[#allocation31_spill] sm:$0xff] }
 0x34a   :  { %v5309_v32 = vpop.eup %5308  ;;  %5320 = vtanh.f32 %v2280_v44  ;;  %2532 = vmatpush.bf16.msra.mxu2 %v2427_v49  ;;  %v7420_v35 = vpop.f32.mrf.mxu1  ;;  %v2423_v19 = vpack.c.bf16 %v8933_v20, %v8932_v48 }
 0x34b   :  { %v5311_v15 = vpop.eup %5310  ;;  %5322 = vtanh.f32 %v2264_v29  ;;  %2628 = vmatpush.bf16.msrb.mxu0 %v2439_v42 }
 0x34c   :  { %v5313_v24 = vpop.eup %5312  ;;  %5324 = vtanh.f32 %v2265_v55  ;;  %2581 = vmatpush.bf16.msra.mxu3 %v2428_v4  ;;  %2844 = vperm.xlu2 %4874, %v8931_v43   ;;  %v2434_v59 = vpack.c.bf16 %v5311_v15, %v5307_v34 }
 0x34d   :  { %v5315_v7 = vpop.eup %5314  ;;  %5326 = vtanh.f32 %v2269_v60  ;;  %2677 = vmatpush.bf16.msrb.mxu1 %v2440_v5  ;;  %v2435_v44 = vpack.c.bf16 %v5313_v24, %v5309_v32  ;;  %v7452_v24 = vld [vmem:[#allocation2 + $0x20] sm:$0xff] }
 0x34e   :  { %v5317_v37 = vpop.eup %5316  ;;  %5328 = vtanh.f32 %v2270_v36  ;;  %2533 = vmatpush.bf16.msra.mxu2 %v2422_v8  ;;  %v7440_v36 = vld [vmem:[#allocation2 + $0x10] sm:$0xff] }
 0x34f   :  { %v5319_v45 = vpop.eup %5318  ;;  %2629 = vmatpush.bf16.msrb.mxu0 %v2434_v59  ;;  %2828 = vperm.xlu1 %4873, %v8934_v46  }
 0x350   :  { %v5321_v9 = vpop.eup %5320  ;;  %2582 = vmatpush.bf16.msra.mxu3 %v2423_v19  ;;  %v2429_v0 = vpack.c.bf16 %v5319_v45, %v5315_v7 }
 0x351   :  { %v5323_v52 = vpop.eup %5322  ;;  %2678 = vmatpush.bf16.msrb.mxu1 %v2435_v44  ;;  %2534 = vmatmul.bf16.vlgmr.msra.gmra.mxu2 %v7427_v3  ;;  %v2430_v30 = vpack.c.bf16 %v5321_v9, %v5317_v37 }
 0x352   :  { %v5325_v53 = vpop.eup %5324  ;;  %v1847_v55 = vpop.f32.mrf.mxu1 }
 0x353   :  { %v5327_v29 = vpop.eup %5326  ;;  %2583 = vmatmul.bf16.vlgmr.msra.gmra.mxu3 %v7427_v3  ;;  %2630 = vmatpush.bf16.msrb.mxu0 %v2429_v0  ;;  %v8935_v0 = vld [vmem:[#allocation34_spill] sm:$0xff] }
 0x354   :  { %v5329_v25 = vpop.eup %5328  ;;  %v2424_v34 = vpack.c.bf16 %v5327_v29, %v5323_v52 }
 0x355   :  { %2679 = vmatpush.bf16.msrb.mxu1 %v2430_v30  ;;  %v2425_v60 = vpack.c.bf16 %v5329_v25, %v5325_v53  ;;  %v1893_v25 = vpack.c.bf16 %v1847_v55, %v1847_v55  ;;  %v1887_v55 = vpack.c.bf16 %v7407_v61, %v7407_v61  ;;  %v1881_v61 = vpack.c.bf16 %v7334_v51, %v7334_v51  ;;  %v8937_v51 = vld [vmem:[#allocation41_spill] sm:$0xff] }
 0x357   :  { %2631 = vmatpush.bf16.msrb.mxu0 %v2424_v34 }
 0x359   :  { %2680 = vmatpush.bf16.msrb.mxu1 %v2425_v60 }
 0x35a   :  { %2632 = vmatmul.bf16.vlgmr.msrb.gmra.mxu0 %v7427_v3  ;;  %v1850_v31 = vpop.f32.mrf.mxu1 }
 0x35b   :  { %v1896_v52 = vpack.c.bf16 %v1850_v31, %v1850_v31 }
 0x35c   :  { %2681 = vmatmul.bf16.vlgmr.msrb.gmra.mxu1 %v7427_v3 }
 0x361   :  { %2539 = vmatmul.bf16.gmra.mxu2 %v7434_v26 }
 0x362   :  { %v1852_v49 = vpop.f32.mrf.mxu1 }
 0x363   :  { %2588 = vmatmul.bf16.gmra.mxu3 %v7434_v26  ;;  %v1899_v48 = vpack.c.bf16 %v1852_v49, %v1852_v49 }
 0x365   :  { %v2095_v34 = vunpack.c.l.bf16 %v1899_v48 }
 0x36a   :  { %2637 = vmatmul.bf16.gmra.mxu0 %v7434_v26  ;;  %v1855_v32 = vpop.f32.mrf.mxu1 }
 0x36b   :  { %v1902_v37 = vpack.c.bf16 %v1855_v32, %v1855_v32 }
 0x36c   :  { %2686 = vmatmul.bf16.gmra.mxu1 %v7434_v26 }
 0x36d   :  { %v2100_v53 = vunpack.c.l.bf16 %v1902_v37 }
 0x371   :  { %2544 = vmatmul.bf16.gmra.mxu2 %v7440_v36 }
 0x372   :  { %v1857_v42 = vpop.f32.mrf.mxu1 }
 0x373   :  { %2593 = vmatmul.bf16.gmra.mxu3 %v7440_v36  ;;  %v1905_v39 = vpack.c.bf16 %v1857_v42, %v1857_v42 }
 0x375   :  { %v2105_v19 = vunpack.c.l.bf16 %v1905_v39 }
 0x377   :  { %v2201_v60 = vadd.f32 %v7089_v21, %v2105_v19  ;;  %v2191_v21 = vadd.f32 %v7114_v63, %v2095_v34  ;;  %v2075_v63 = vunpack.c.l.bf16 %v1887_v55  ;;  %v8936_v19 = vld [vmem:[#allocation42_spill] sm:$0xff] }
 0x37a   :  { %2642 = vmatmul.bf16.gmra.mxu0 %v7440_v36  ;;  %v1860_v56 = vpop.f32.mrf.mxu1 }
 0x37b   :  { %v1908_v7 = vpack.c.bf16 %v1860_v56, %v1860_v56  ;;  %v1890_v56 = vpack.c.bf16 %v7420_v35, %v7420_v35  ;;  %v7469_v35 = vld [vmem:[#allocation2 + $0x28] sm:$0xff] }
 0x37c   :  { %2691 = vmatmul.bf16.gmra.mxu1 %v7440_v36 }
 0x37d   :  { %v2110_v59 = vunpack.c.l.bf16 %v1908_v7 }
 0x37f   :  { %v2206_v29 = vadd.f32 %v8935_v0, %v2110_v59 }
 0x381   :  { %2549 = vmatmul.bf16.gmra.mxu2 %v7446_v17 }
 0x382   :  { %v1862_v4 = vpop.f32.mrf.mxu1 }
 0x383   :  { %2598 = vmatmul.bf16.gmra.mxu3 %v7446_v17  ;;  %v1911_v5 = vpack.c.bf16 %v1862_v4, %v1862_v4  ;;  %v2196_v4 = vadd.f32 %v7086_v16, %v2100_v53  ;;  %v1884_v16 = vpack.c.bf16 %v7377_v50, %v7377_v50  ;;  %v1878_v50 = vpack.c.bf16 %v8936_v19, %v8936_v19 }
 0x385   :  { %v2115_v11 = vunpack.c.l.bf16 %v1911_v5 }
 0x387   :  { %v2211_v45 = vadd.f32 %v7082_v6, %v2115_v11  ;;  %v2090_v6 = vunpack.c.l.bf16 %v1896_v52  ;;  %v2080_v11 = vunpack.c.l.bf16 %v1890_v56  ;;  %v2171_v52 = vadd.f32 %v6997_v28, %v2075_v63 }
 0x389   :  { %v2256_v32 = vpack.c.bf16 %v2211_v45, %v2206_v29  ;;  %v2070_v45 = vunpack.c.l.bf16 %v1884_v16 }
 0x38a   :  { %2647 = vmatmul.bf16.gmra.mxu0 %v7446_v17  ;;  %v1865_v15 = vpop.f32.mrf.mxu1 }
 0x38b   :  { %v1914_v8 = vpack.c.bf16 %v1865_v15, %v1865_v15  ;;  %v2085_v15 = vunpack.c.l.bf16 %v1893_v25  ;;  %v2326_v5 = vunpack.c.l.bf16 %v2256_v32  ;;  %v2331_v39 = vunpack.c.h.bf16 %v2256_v32 }
 0x38c   :  { %2696 = vmatmul.bf16.gmra.mxu1 %v7446_v17  ;;  %v2060_v32 = vunpack.c.l.bf16 %v1878_v50 }
 0x38d   :  { %v2120_v44 = vunpack.c.l.bf16 %v1914_v8  ;;  %v2186_v8 = vadd.f32 %v7095_v2, %v2090_v6  ;;  %v2181_v37 = vadd.f32 %v7022_v57, %v2085_v15  ;;  %v2176_v2 = vadd.f32 %v7020_v27, %v2080_v11  ;;  %v7495_v11 = vld [vmem:[#allocation2 + $0x30] sm:$0xff] }
 0x38f   :  { %v2216_v42 = vadd.f32 %v7076_v47, %v2120_v44  ;;  %v2251_v47 = vpack.c.bf16 %v2201_v60, %v2196_v4  ;;  %v2246_v59 = vpack.c.bf16 %v2191_v21, %v2186_v8  ;;  %v1875_v44 = vpack.c.bf16 %v8937_v51, %v8937_v51  ;;  %v8938_v60 = vld [vmem:[#allocation44_spill] sm:$0xff] }
 0x390   :  { %v2241_v53 = vpack.c.bf16 %v2181_v37, %v2176_v2  ;;  %v1872_v27 = vpack.c.bf16 %v8938_v60, %v8938_v60 }
 0x391   :  { %2554 = vmatmul.bf16.gmra.mxu2 %v7452_v24  ;;  %v2316_v48 = vunpack.c.l.bf16 %v2251_v47  ;;  %v2306_v0 = vunpack.c.l.bf16 %v2246_v59  ;;  %v2055_v6 = vunpack.c.l.bf16 %v1875_v44 }
 0x392   :  { %v1867_v20 = vpop.f32.mrf.mxu1  ;;  %v2301_v55 = vunpack.c.h.bf16 %v2241_v53  ;;  %v2050_v21 = vunpack.c.l.bf16 %v1872_v27  ;;  %v7510_v27 = vld [vmem:[#allocation2 + $0x38] sm:$0xff] }
 0x393   :  { %2603 = vmatmul.bf16.gmra.mxu3 %v7452_v24  ;;  %v1917_v9 = vpack.c.bf16 %v1867_v20, %v1867_v20  ;;  %v2321_v20 = vunpack.c.h.bf16 %v2251_v47  ;;  %v8939_v47 = vld [vmem:[#allocation36_spill] sm:$0xff] }
 0x395   :  { %v2125_v30 = vunpack.c.l.bf16 %v1917_v9  ;;  %v2065_v9 = vunpack.c.l.bf16 %v1881_v61  ;;  %v7485_v25 = vpop.permute.xlu1 %2940  ;;  %v8940_v61 = vld [vmem:[#allocation38_spill] sm:$0xff] }
 0x396   :  { %v2146_v63 = vadd.f32 %v8940_v61, %v2050_v21 }
 0x397   :  { %v2221_v49 = vadd.f32 %v7084_v1, %v2125_v30  ;;  %v2311_v30 = vunpack.c.h.bf16 %v2246_v59  ;;  %v2161_v28 = vadd.f32 %v6977_v18, %v2065_v9  ;;  %v7498_v37 = vpop.permute.xlu0 %2932 }
 0x399   :  { %v2261_v31 = vpack.c.bf16 %v2221_v49, %v2216_v42  ;;  %v2166_v42 = vadd.f32 %v6999_v40, %v2070_v45  ;;  %v2151_v40 = vadd.f32 %v8912_v23, %v2055_v6 }
 0x39a   :  { %2652 = vmatmul.bf16.gmra.mxu0 %v7452_v24 }
 0x39b   :  { %v2336_v1 = vunpack.c.l.bf16 %v2261_v31  ;;  %v2341_v7 = vunpack.c.h.bf16 %v2261_v31  ;;  %v2236_v4 = vpack.c.bf16 %v2171_v52, %v2166_v42  ;;  %v2296_v31 = vunpack.c.l.bf16 %v2241_v53 }
 0x39c   :  { %2701 = vmatmul.bf16.gmra.mxu1 %v7452_v24  ;;  %v2226_v19 = vpack.c.bf16 %v2151_v40, %v2146_v63 }
 0x39d   :  { %5330 = vtanh.f32 %v2336_v1  ;;  %v2286_v18 = vunpack.c.l.bf16 %v2236_v4  ;;  %v2291_v16 = vunpack.c.h.bf16 %v2236_v4 }
 0x39e   :  { %5332 = vtanh.f32 %v2341_v7  ;;  %v2266_v44 = vunpack.c.l.bf16 %v2226_v19  ;;  %v2271_v9 = vunpack.c.h.bf16 %v2226_v19 }
 0x39f   :  { %5334 = vtanh.f32 %v2326_v5  ;;  %v2156_v5 = vadd.f32 %v8939_v47, %v2060_v32 }
 0x3a0   :  { %5336 = vtanh.f32 %v2331_v39 }
 0x3a1   :  { %2559 = vmatmul.bf16.gmra.mxu2 %v7469_v35  ;;  %5338 = vtanh.f32 %v2316_v48  ;;  %v2231_v39 = vpack.c.bf16 %v2161_v28, %v2156_v5 }
 0x3a2   :  { %5340 = vtanh.f32 %v2321_v20  ;;  %v7500_v20 = vpop.permute.xlu1 %2924 }
 0x3a3   :  { %2608 = vmatmul.bf16.gmra.mxu3 %v7469_v35  ;;  %v5331_v57 = vpop.eup %5330  ;;  %5342 = vtanh.f32 %v2306_v0  ;;  %v2276_v50 = vunpack.c.l.bf16 %v2231_v39  ;;  %v2281_v23 = vunpack.c.h.bf16 %v2231_v39  ;;  %v7504_v0 = vpop.permute.xlu0 %2908 }
 0x3a4   :  { %v5333_v29 = vpop.eup %5332  ;;  %5344 = vtanh.f32 %v2311_v30 }
 0x3a5   :  { %v5335_v34 = vpop.eup %5334  ;;  %v2461_v49 = vpack.c.bf16 %v5333_v29, %v5331_v57  ;;  %5346 = vtanh.f32 %v2296_v31 }
 0x3a6   :  { %v5337_v56 = vpop.eup %5336  ;;  %5348 = vtanh.f32 %v2301_v55 }
 0x3a7   :  { %2722 = vmatpush.bf16.msrb.mxu2 %v2461_v49  ;;  %v5339_v15 = vpop.eup %5338  ;;  %v2456_v1 = vpack.c.bf16 %v5337_v56, %v5335_v34  ;;  %5350 = vtanh.f32 %v2286_v18  ;;  %v7512_v56 = vpop.permute.xlu2 %2916 }
 0x3a8   :  { %v5341_v7 = vpop.eup %5340  ;;  %5352 = vtanh.f32 %v2291_v16  ;;  %v8941_v16 = vld [vmem:[#allocation27_spill] sm:$0xff] }
 0x3a9   :  { %v5343_v8 = vpop.eup %5342  ;;  %v2451_v59 = vpack.c.bf16 %v5341_v7, %v5339_v15  ;;  %5354 = vtanh.f32 %v2276_v50 }
 0x3aa   :  { %2657 = vmatmul.bf16.gmra.mxu0 %v7469_v35  ;;  %v5345_v48 = vpop.eup %5344  ;;  %5356 = vtanh.f32 %v2281_v23  ;;  %v7506_v29 = vpop.permute.xlu1 %2884 }
 0x3ab   :  { %2723 = vmatpush.bf16.msrb.mxu2 %v2456_v1  ;;  %v5347_v45 = vpop.eup %5346  ;;  %v2446_v2 = vpack.c.bf16 %v5345_v48, %v5343_v8  ;;  %5358 = vtanh.f32 %v2266_v44  ;;  %v7516_v6 = vpop.permute.xlu0 %2868 }
 0x3ac   :  { %2706 = vmatmul.bf16.gmra.mxu1 %v7469_v35  ;;  %v5349_v51 = vpop.eup %5348  ;;  %5360 = vtanh.f32 %v2271_v9 }
 0x3ad   :  { %v5351_v57 = vpop.eup %5350  ;;  %v2441_v52 = vpack.c.bf16 %v5349_v51, %v5347_v45 }
 0x3ae   :  { %v5353_v53 = vpop.eup %5352 }
 0x3af   :  { %2724 = vmatpush.bf16.msrb.mxu2 %v2451_v59  ;;  %v5355_v30 = vpop.eup %5354  ;;  %v2436_v34 = vpack.c.bf16 %v5353_v53, %v5351_v57  ;;  %v7520_v31 = vpop.permute.xlu2 %2900 }
 0x3b0   :  { %v5357_v60 = vpop.eup %5356 }
 0x3b1   :  { %2564 = vmatmul.bf16.gmra.mxu2 %v7495_v11  ;;  %v5359_v32 = vpop.eup %5358  ;;  %v2431_v42 = vpack.c.bf16 %v5357_v60, %v5355_v30 }
 0x3b2   :  { %v5361_v49 = vpop.eup %5360  ;;  %v7518_v4 = vpop.permute.xlu1 %2876 }
 0x3b3   :  { %2613 = vmatmul.bf16.gmra.mxu3 %v7495_v11  ;;  %2725 = vmatpush.bf16.msrb.mxu2 %v2446_v2  ;;  %v2426_v28 = vpack.c.bf16 %v5361_v49, %v5359_v32  ;;  %v7524_v55 = vpop.permute.xlu0 %2860 }
 0x3b7   :  { %2726 = vmatpush.bf16.msrb.mxu2 %v2441_v52  ;;  %v7527_v21 = vpop.permute.xlu2 %2892 }
 0x3ba   :  { %2662 = vmatmul.bf16.gmra.mxu0 %v7495_v11  ;;  %v2837_v15 = vpop.permute.xlu1 %2836 }
 0x3bb   :  { %2727 = vmatpush.bf16.msrb.mxu2 %v2436_v34  ;;  %v2821_v1 = vpop.permute.xlu0 %2820 }
 0x3bc   :  { %2711 = vmatmul.bf16.gmra.mxu1 %v7495_v11  ;;  %v2826_v8 = vperm.slane %v2821_v1, %v8941_v16 }
 0x3be   :  { %v7533_v48 = vunpack.c.l.bf16 %v2826_v8 }
 0x3bf   :  { %2728 = vmatpush.bf16.msrb.mxu2 %v2431_v42 }
 0x3c0   :  { %8942 = vst [vmem:[#allocation49_spill] sm:$0xff] %v7533_v48 }
 0x3c1   :  { %2569 = vmatmul.bf16.gmra.mxu2 %v7510_v27 }
 0x3c2   :  { %v2829_v39 = vpop.permute.xlu1 %2828 }
 0x3c3   :  { %2618 = vmatmul.bf16.gmra.mxu3 %v7510_v27  ;;  %2729 = vmatpush.bf16.msrb.mxu2 %v2426_v28  ;;  %v2834_v63 = vperm.slane %v2829_v39, %v8941_v16 }
 0x3c5   :  { %v7535_v45 = vunpack.c.l.bf16 %v2834_v63 }
 0x3ca   :  { %2667 = vmatmul.bf16.gmra.mxu0 %v7510_v27 }
 0x3cc   :  { %2716 = vmatmul.bf16.gmra.mxu1 %v7510_v27 }
 0x3d1   :  { %2730 = vmatmul.bf16.vlgmr.msrb.gmra.mxu2 %v7427_v3  ;;  %v2853_v3 = vpop.permute.xlu2 %2852 }
 0x3d4   :  { %v2535_v47 = vpop.f32.mrf.mxu2 }
 0x3d6   :  { %v2584_v5 = vpop.f32.mrf.mxu3 }
 0x3d7   :  { %v2771_v7 = vpack.c.bf16 %v2584_v5, %v2535_v47  ;;  %v2633_v40 = vpop.f32.mrf.mxu0 }
 0x3d9   :  { %v2682_v18 = vpop.f32.mrf.mxu1  ;;  %v2947_v50 = vunpack.c.l.bf16 %v2771_v7  ;;  %v2948_v23 = vunpack.c.h.bf16 %v2771_v7  ;;  %v2845_v5 = vpop.permute.xlu2 %2844 }
 0x3da   :  { %v7530_v61 = vpack.c.bf16 %v2682_v18, %v2633_v40  ;;  %v2850_v7 = vperm.slane %v2845_v5, %v8941_v16 }
 0x3db   :  { %v3043_v52 = vadd.f32 %v7533_v48, %v2947_v50  ;;  %v3044_v53 = vadd.f32 %v7533_v48, %v2948_v23 }
 0x3dc   :  { %v2537_v59 = vpop.f32.mrf.mxu2 }
 0x3de   :  { %v2586_v19 = vpop.f32.mrf.mxu3 }
 0x3df   :  { %v2774_v2 = vpack.c.bf16 %v2586_v19, %v2537_v59  ;;  %v7537_v51 = vpop.f32.mrf.mxu0  ;;  %v7556_v19 = vunpack.c.l.bf16 %v2850_v7 }
 0x3e1   :  { %v2952_v44 = vunpack.c.l.bf16 %v2774_v2  ;;  %v2953_v9 = vunpack.c.h.bf16 %v2774_v2  ;;  %v7539_v57 = vpop.f32.mrf.mxu1  ;;  %2735 = vmatmul.bf16.gmra.mxu2 %v7434_v26  ;;  %v2842_v26 = vperm.slane %v2837_v15, %v8941_v16 }
 0x3e3   :  { %v3048_v30 = vadd.f32 %v7535_v45, %v2952_v44  ;;  %v3049_v34 = vadd.f32 %v7535_v45, %v2953_v9  ;;  %v7554_v18 = vunpack.c.l.bf16 %v2842_v26  ;;  %v2858_v26 = vperm.slane %v2853_v3, %v8941_v16 }
 0x3e4   :  { %v2540_v42 = vpop.f32.mrf.mxu2 }
 0x3e5   :  { %v7546_v60 = vpack.c.bf16 %v3048_v30, %v3043_v52  ;;  %v7548_v32 = vpack.c.bf16 %v3049_v34, %v3044_v53  ;;  %8943 = vst [vmem:[#allocation28_spill] sm:$0xff] %v7554_v18 }
 0x3e6   :  { %v2589_v49 = vpop.f32.mrf.mxu3 }
 0x3e7   :  { %v2777_v28 = vpack.c.bf16 %v2589_v49, %v2540_v42  ;;  %v2638_v47 = vpop.f32.mrf.mxu0 }
 0x3e9   :  { %v2687_v1 = vpop.f32.mrf.mxu1  ;;  %v2957_v63 = vunpack.c.l.bf16 %v2777_v28  ;;  %v2958_v59 = vunpack.c.h.bf16 %v2777_v28 }
 0x3ea   :  { %v7552_v40 = vpack.c.bf16 %v2687_v1, %v2638_v47 }
 0x3eb   :  { %v3053_v15 = vadd.f32 %v7554_v18, %v2957_v63  ;;  %v3054_v52 = vadd.f32 %v7554_v18, %v2958_v59  ;;  %v7578_v59 = vunpack.c.l.bf16 %v2858_v26 }
 0x3ec   :  { %v2542_v39 = vpop.f32.mrf.mxu2 }
 0x3ee   :  { %v2591_v8 = vpop.f32.mrf.mxu3 }
 0x3ef   :  { %v2780_v50 = vpack.c.bf16 %v2591_v8, %v2542_v39  ;;  %v7558_v23 = vpop.f32.mrf.mxu0 }
 0x3f1   :  { %v2962_v2 = vunpack.c.l.bf16 %v2780_v50  ;;  %v2963_v44 = vunpack.c.h.bf16 %v2780_v50  ;;  %v7560_v9 = vpop.f32.mrf.mxu1  ;;  %2740 = vmatmul.bf16.gmra.mxu2 %v7440_v36  ;;  %v2866_v36 = vperm.slane %v7524_v55, %v8941_v16 }
 0x3f3   :  { %v3058_v53 = vadd.f32 %v7556_v19, %v2962_v2  ;;  %v3059_v30 = vadd.f32 %v7556_v19, %v2963_v44  ;;  %v7576_v8 = vunpack.c.l.bf16 %v2866_v36 }
 0x3f4   :  { %v2545_v49 = vpop.f32.mrf.mxu2 }
 0x3f5   :  { %v7567_v34 = vpack.c.bf16 %v3058_v53, %v3053_v15  ;;  %v7569_v42 = vpack.c.bf16 %v3059_v30, %v3054_v52 }
 0x3f6   :  { %v2594_v28 = vpop.f32.mrf.mxu3 }
 0x3f7   :  { %v2783_v47 = vpack.c.bf16 %v2594_v28, %v2545_v49  ;;  %v2643_v5 = vpop.f32.mrf.mxu0 }
 0x3f9   :  { %v2692_v1 = vpop.f32.mrf.mxu1  ;;  %v2967_v50 = vunpack.c.l.bf16 %v2783_v47  ;;  %v2968_v2 = vunpack.c.h.bf16 %v2783_v47 }
 0x3fa   :  { %v7574_v7 = vpack.c.bf16 %v2692_v1, %v2643_v5 }
 0x3fb   :  { %v3063_v55 = vadd.f32 %v7578_v59, %v2967_v50  ;;  %v3064_v3 = vadd.f32 %v7578_v59, %v2968_v2  ;;  %v2882_v50 = vperm.slane %v7518_v4, %v8941_v16 }
 0x3fc   :  { %v2547_v39 = vpop.f32.mrf.mxu2 }
 0x3fe   :  { %v2596_v63 = vpop.f32.mrf.mxu3 }
 0x3ff   :  { %v2786_v44 = vpack.c.bf16 %v2596_v63, %v2547_v39  ;;  %v7580_v15 = vpop.f32.mrf.mxu0 }
 0x401   :  { %v2972_v52 = vunpack.c.l.bf16 %v2786_v44  ;;  %v2973_v53 = vunpack.c.h.bf16 %v2786_v44  ;;  %v7582_v30 = vpop.f32.mrf.mxu1  ;;  %2745 = vmatmul.bf16.gmra.mxu2 %v7446_v17  ;;  %v2874_v17 = vperm.slane %v7516_v6, %v8941_v16 }
 0x403   :  { %v3068_v49 = vadd.f32 %v7576_v8, %v2972_v52  ;;  %v3069_v28 = vadd.f32 %v7576_v8, %v2973_v53  ;;  %v7599_v52 = vunpack.c.l.bf16 %v2874_v17 }
 0x404   :  { %v2550_v1 = vpop.f32.mrf.mxu2 }
 0x405   :  { %v7589_v5 = vpack.c.bf16 %v3068_v49, %v3063_v55  ;;  %v7591_v47 = vpack.c.bf16 %v3069_v28, %v3064_v3  ;;  %8944 = vst [vmem:[#allocation37_spill] sm:$0xff] %v7599_v52  ;;  %v7601_v55 = vunpack.c.l.bf16 %v2882_v50 }
 0x406   :  { %v2599_v36 = vpop.f32.mrf.mxu3 }
 0x407   :  { %v2789_v26 = vpack.c.bf16 %v2599_v36, %v2550_v1  ;;  %v2648_v39 = vpop.f32.mrf.mxu0  ;;  %8945 = vst [vmem:[#allocation35_spill] sm:$0xff] %v7601_v55 }
 0x409   :  { %v2697_v63 = vpop.f32.mrf.mxu1  ;;  %v2977_v3 = vunpack.c.l.bf16 %v2789_v26  ;;  %v2978_v49 = vunpack.c.h.bf16 %v2789_v26 }
 0x40a   :  { %v7597_v2 = vpack.c.bf16 %v2697_v63, %v2648_v39 }
 0x40b   :  { %v3073_v6 = vadd.f32 %v7599_v52, %v2977_v3  ;;  %v3074_v4 = vadd.f32 %v7599_v52, %v2978_v49 }
 0x40c   :  { %v2552_v44 = vpop.f32.mrf.mxu2 }
 0x40e   :  { %v2601_v53 = vpop.f32.mrf.mxu3 }
 0x40f   :  { %v2792_v28 = vpack.c.bf16 %v2601_v53, %v2552_v44  ;;  %v7603_v1 = vpop.f32.mrf.mxu0 }
 0x411   :  { %v2982_v36 = vunpack.c.l.bf16 %v2792_v28  ;;  %v2983_v41 = vunpack.c.h.bf16 %v2792_v28  ;;  %v7605_v12 = vpop.f32.mrf.mxu1  ;;  %2750 = vmatmul.bf16.gmra.mxu2 %v7452_v24 }
 0x413   :  { %v3078_v39 = vadd.f32 %v7601_v55, %v2982_v36  ;;  %v3079_v63 = vadd.f32 %v7601_v55, %v2983_v41 }
 0x414   :  { %v2555_v50 = vpop.f32.mrf.mxu2 }
 0x415   :  { %v7612_v17 = vpack.c.bf16 %v3078_v39, %v3073_v6  ;;  %v7614_v26 = vpack.c.bf16 %v3079_v63, %v3074_v4  ;;  %v2938_v6 = vperm.slane %v7498_v37, %v8941_v16  ;;  %v2914_v39 = vperm.slane %v7504_v0, %v8941_v16 }
 0x416   :  { %v2604_v44 = vpop.f32.mrf.mxu3  ;;  %v2930_v63 = vperm.slane %v7500_v20, %v8941_v16  ;;  %v2906_v37 = vperm.slane %v7520_v31, %v8941_v16  ;;  %v3163_v0 = vunpack.c.l.bf16 %v7546_v60  ;;  %v2949_v31 = vunpack.c.l.bf16 %v7530_v61 }
 0x417   :  { %v7616_v53 = vpack.c.bf16 %v2604_v44, %v2555_v50  ;;  %v2653_v28 = vpop.f32.mrf.mxu0  ;;  %v2922_v44 = vperm.slane %v7512_v56, %v8941_v16  ;;  %v7654_v20 = vunpack.c.l.bf16 %v2914_v39  ;;  %v3169_v39 = vunpack.c.h.bf16 %v7548_v32 }
 0x418   :  { %v7656_v33 = vunpack.c.l.bf16 %v2930_v63  ;;  %v7671_v63 = vpack.c.bf16 %v7539_v57, %v7537_v51  ;;  %5362 = vtanh.f32 %v3163_v0  ;;  %v7684_v51 = vadd.f32 %v7533_v48, %v2949_v31 }
 0x419   :  { %v2702_v58 = vpop.f32.mrf.mxu1  ;;  %v7661_v54 = vunpack.c.l.bf16 %v2922_v44  ;;  %v3173_v44 = vunpack.c.l.bf16 %v7567_v34  ;;  %v3178_v57 = vunpack.c.h.bf16 %v7567_v34  ;;  %v3183_v34 = vunpack.c.l.bf16 %v7589_v5 }
 0x41a   :  { %v7618_v14 = vpack.c.bf16 %v2702_v58, %v2653_v28  ;;  %v2946_v58 = vperm.slane %v7485_v25, %v8941_v16  ;;  %v7647_v28 = vunpack.c.l.bf16 %v2938_v6  ;;  %v2898_v25 = vperm.slane %v7527_v21, %v8941_v16  ;;  %8947 = vst [vmem:[#allocation46_spill] sm:$0xff] %v7656_v33 }
 0x41b   :  { %8949 = vst [vmem:[#allocation43_spill] sm:$0xff] %v7661_v54  ;;  %v3168_v6 = vunpack.c.h.bf16 %v7546_v60  ;;  %v2960_v60 = vunpack.c.h.bf16 %v7552_v40 }
 0x41c   :  { %v2557_v24 = vpop.f32.mrf.mxu2  ;;  %v7652_v62 = vunpack.c.l.bf16 %v2946_v58  ;;  %v2950_v58 = vunpack.c.h.bf16 %v7530_v61  ;;  %v7673_v10 = vunpack.c.l.bf16 %v2898_v25  ;;  %v3174_v61 = vunpack.c.l.bf16 %v7569_v42 }
 0x41d   :  { %v7689_v25 = vpack.c.bf16 %v7560_v9, %v7558_v23  ;;  %v7703_v23 = vadd.f32 %v7554_v18, %v2960_v60  ;;  %v3189_v60 = vunpack.c.h.bf16 %v7591_v47 }
 0x41e   :  { %v2606_v3 = vpop.f32.mrf.mxu3  ;;  %8946 = vst [vmem:[#allocation48_spill] sm:$0xff] %v7652_v62  ;;  %v7693_v0 = vadd.f32 %v7533_v48, %v2950_v58  ;;  %v7728_v48 = vpack.c.bf16 %v7582_v30, %v7580_v15  ;;  %v3199_v30 = vunpack.c.h.bf16 %v7614_v26 }
 0x41f   :  { %v7620_v38 = vpop.f32.mrf.mxu0  ;;  %8951 = vst [vmem:[#allocation39_spill] sm:$0xff] %v7673_v10 }
 0x421   :  { %v7622_v49 = vpop.f32.mrf.mxu1  ;;  %2755 = vmatmul.bf16.gmra.mxu2 %v7469_v35  ;;  %v2890_v35 = vperm.slane %v7506_v29, %v8941_v16  ;;  %v3164_v29 = vunpack.c.l.bf16 %v7548_v32  ;;  %v7665_v16 = vunpack.c.l.bf16 %v2906_v37  ;;  %v2798_v37 = vpack.c.bf16 %v2606_v3, %v2557_v24 }
 0x422   :  { %v3179_v24 = vunpack.c.h.bf16 %v7569_v42 }
 0x423   :  { %v7659_v56 = vunpack.c.l.bf16 %v2890_v35  ;;  %8950 = vst [vmem:[#allocation30_spill] sm:$0xff] %v7665_v16  ;;  %v2959_v35 = vunpack.c.l.bf16 %v7552_v40  ;;  %5364 = vtanh.f32 %v3164_v29  ;;  %v2992_v9 = vunpack.c.l.bf16 %v2798_v37 }
 0x424   :  { %v7625_v41 = vpop.f32.mrf.mxu2  ;;  %5366 = vtanh.f32 %v3168_v6  ;;  %v7706_v6 = vpop.eup %5362  ;;  %v2993_v3 = vunpack.c.h.bf16 %v2798_v37 }
 0x425   :  { %8948 = vst [vmem:[#allocation45_spill] sm:$0xff] %v7659_v56  ;;  %5368 = vtanh.f32 %v3169_v39  ;;  %v7699_v29 = vadd.f32 %v7554_v18, %v2959_v35  ;;  %v3188_v39 = vunpack.c.h.bf16 %v7589_v5  ;;  %v3193_v5 = vunpack.c.l.bf16 %v7612_v17 }
 0x426   :  { %v7627_v36 = vpop.f32.mrf.mxu3  ;;  %5370 = vtanh.f32 %v3173_v44  ;;  %8952 = vst [vmem:[#allocation40_spill] sm:$0xff] %v7706_v6 }
 0x427   :  { %v7631_v4 = vpop.f32.mrf.mxu0  ;;  %5372 = vtanh.f32 %v3174_v61  ;;  %v2987_v61 = vunpack.c.l.bf16 %v7616_v53 }
 0x428   :  { %5374 = vtanh.f32 %v3178_v57 }
 0x429   :  { %v7639_v50 = vpop.f32.mrf.mxu1  ;;  %v7711_v44 = vpop.eup %5364  ;;  %5376 = vtanh.f32 %v3179_v24  ;;  %v2988_v24 = vunpack.c.h.bf16 %v7616_v53  ;;  %v3198_v53 = vunpack.c.h.bf16 %v7612_v17 }
 0x42a   :  { %8953 = vst [vmem:[#allocation47_spill] sm:$0xff] %v7711_v44  ;;  %v7715_v40 = vpop.eup %5366  ;;  %5378 = vtanh.f32 %v3183_v34 }
 0x42b   :  { %8954 = vst [vmem:[#allocation33_spill] sm:$0xff] %v7715_v40  ;;  %v7719_v18 = vpop.eup %5368 }
 0x42c   :  { %v2562_v43 = vpop.f32.mrf.mxu2  ;;  %8955 = vst [vmem:[#allocation32_spill] sm:$0xff] %v7719_v18  ;;  %v7724_v37 = vpop.eup %5370 }
 0x42d   :  { %8956 = vst [vmem:[#allocation31_spill] sm:$0xff] %v7724_v37  ;;  %v7733_v34 = vpop.eup %5372 }
 0x42e   :  { %v2611_v21 = vpop.f32.mrf.mxu3  ;;  %8957 = vst [vmem:[#allocation29_spill] sm:$0xff] %v7733_v34  ;;  %v7738_v57 = vpop.eup %5374 }
 0x42f   :  { %v7677_v22 = vpop.f32.mrf.mxu0  ;;  %v2804_v42 = vpack.c.bf16 %v2611_v21, %v2562_v43  ;;  %v3194_v43 = vunpack.c.l.bf16 %v7614_v26  ;;  %v2801_v21 = vpack.c.bf16 %v7627_v36, %v7625_v41  ;;  %8958 = vst [vmem:[#allocation34_spill] sm:$0xff] %v7738_v57  ;;  %v7743_v18 = vpop.eup %5376  ;;  %v3084_v41 = vadd.f32 %v7659_v56, %v2988_v24 }
 0x430   :  { %8959 = vst [vmem:[#allocation42_spill] sm:$0xff] %v7743_v18 }
 0x431   :  { %v7681_v32 = vpop.f32.mrf.mxu1  ;;  %2760 = vmatmul.bf16.gmra.mxu2 %v7495_v11  ;;  %v3184_v11 = vunpack.c.l.bf16 %v7591_v47  ;;  %v3088_v47 = vadd.f32 %v7673_v10, %v2992_v9  ;;  %v3089_v9 = vadd.f32 %v7673_v10, %v2993_v3  ;;  %v3002_v13 = vunpack.c.l.bf16 %v2804_v42 }
 0x432   :  { %v3003_v17 = vunpack.c.h.bf16 %v2804_v42  ;;  %v7752_v3 = vpack.c.bf16 %v7605_v12, %v7603_v1  ;;  %v2997_v15 = vunpack.c.l.bf16 %v2801_v21  ;;  %v2998_v40 = vunpack.c.h.bf16 %v2801_v21 }
 0x433   :  { %5380 = vtanh.f32 %v3184_v11  ;;  %v3083_v11 = vadd.f32 %v7659_v56, %v2987_v61  ;;  %v7748_v61 = vpop.eup %5378  ;;  %v3098_v12 = vadd.f32 %v7654_v20, %v3002_v13 }
 0x434   :  { %v2565_v31 = vpop.f32.mrf.mxu2  ;;  %5382 = vtanh.f32 %v3188_v39  ;;  %v3094_v42 = vadd.f32 %v7665_v16, %v2998_v40 }
 0x435   :  { %5384 = vtanh.f32 %v3189_v60  ;;  %v7746_v36 = vpack.c.bf16 %v3088_v47, %v3083_v11 }
 0x436   :  { %v2614_v35 = vpop.f32.mrf.mxu3  ;;  %5386 = vtanh.f32 %v3193_v5  ;;  %v3144_v5 = vpack.c.bf16 %v3089_v9, %v3084_v41 }
 0x437   :  { %v2663_v58 = vpop.f32.mrf.mxu0  ;;  %5388 = vtanh.f32 %v3194_v43  ;;  %v2807_v39 = vpack.c.bf16 %v2614_v35, %v2565_v31  ;;  %v7761_v43 = vpack.c.bf16 %v7622_v49, %v7620_v38  ;;  %v3203_v35 = vunpack.c.l.bf16 %v7746_v36 }
 0x438   :  { %5390 = vtanh.f32 %v3198_v53  ;;  %v3099_v53 = vadd.f32 %v7654_v20, %v3003_v17  ;;  %v3204_v49 = vunpack.c.l.bf16 %v3144_v5 }
 0x439   :  { %v2712_v46 = vpop.f32.mrf.mxu1  ;;  %v7754_v44 = vpop.eup %5380  ;;  %5392 = vtanh.f32 %v3199_v30  ;;  %v3093_v30 = vadd.f32 %v7665_v16, %v2997_v15  ;;  %v3007_v41 = vunpack.c.l.bf16 %v2807_v39  ;;  %v3008_v6 = vunpack.c.h.bf16 %v2807_v39 }
 0x43a   :  { %8960 = vst [vmem:[#allocation41_spill] sm:$0xff] %v7754_v44  ;;  %v7756_v47 = vpop.eup %5382  ;;  %5394 = vtanh.f32 %v3203_v35 }
 0x43b   :  { %8961 = vst [vmem:[#allocation44_spill] sm:$0xff] %v7756_v47  ;;  %v7764_v31 = vpop.eup %5384  ;;  %v3148_v15 = vpack.c.bf16 %v3098_v12, %v3093_v30  ;;  %v3103_v17 = vadd.f32 %v7661_v54, %v3007_v41  ;;  %5396 = vtanh.f32 %v3204_v49 }
 0x43c   :  { %v2567_v60 = vpop.f32.mrf.mxu2  ;;  %8962 = vst [vmem:[#allocation36_spill] sm:$0xff] %v7764_v31  ;;  %v7770_v38 = vpop.eup %5386 }
 0x43d   :  { %v7774_v18 = vpop.eup %5388  ;;  %v3218_v44 = vunpack.c.h.bf16 %v3148_v15 }
 0x43e   :  { %v2616_v26 = vpop.f32.mrf.mxu3 }
 0x43f   :  { %v2810_v24 = vpack.c.bf16 %v2616_v26, %v2567_v60  ;;  %v2665_v1 = vpop.f32.mrf.mxu0  ;;  %v2808_v60 = vpack.c.bf16 %v2712_v46, %v2663_v58  ;;  %v7779_v58 = vpop.eup %5390 }
 0x440   :  { %v7785_v13 = vpop.eup %5392 }
 0x441   :  { %v3012_v21 = vunpack.c.l.bf16 %v2810_v24  ;;  %v3013_v11 = vunpack.c.h.bf16 %v2810_v24  ;;  %v2714_v9 = vpop.f32.mrf.mxu1  ;;  %2765 = vmatmul.bf16.gmra.mxu2 %v7510_v27  ;;  %v3208_v27 = vunpack.c.h.bf16 %v7746_v36  ;;  %v3009_v24 = vunpack.c.l.bf16 %v2808_v60 }
 0x442   :  { %v2811_v26 = vpack.c.bf16 %v2714_v9, %v2665_v1  ;;  %v2802_v1 = vpack.c.bf16 %v7639_v50, %v7631_v4  ;;  %v3149_v9 = vpack.c.bf16 %v3099_v53, %v3094_v42  ;;  %v7790_v36 = vpack.c.bf16 %v7681_v32, %v7677_v22 }
 0x443   :  { %v3108_v46 = vadd.f32 %v7656_v33, %v3012_v21  ;;  %v3109_v40 = vadd.f32 %v7656_v33, %v3013_v11  ;;  %v3209_v21 = vunpack.c.h.bf16 %v3144_v5  ;;  %v3104_v4 = vadd.f32 %v7661_v54, %v3008_v6 }
 0x444   :  { %v2570_v39 = vpop.f32.mrf.mxu2  ;;  %v3014_v12 = vunpack.c.l.bf16 %v2811_v26  ;;  %v3213_v50 = vunpack.c.l.bf16 %v3148_v15  ;;  %v3010_v42 = vunpack.c.h.bf16 %v2808_v60  ;;  %v3015_v11 = vunpack.c.h.bf16 %v2811_v26  ;;  %v7796_v60 = vpop.eup %5394 }
 0x445   :  { %v3153_v53 = vpack.c.bf16 %v3108_v46, %v3103_v17  ;;  %v2999_v57 = vunpack.c.l.bf16 %v2802_v1  ;;  %v3000_v35 = vunpack.c.h.bf16 %v2802_v1  ;;  %v3214_v37 = vunpack.c.l.bf16 %v3149_v9  ;;  %v7800_v1 = vpop.eup %5396 }
 0x446   :  { %v2619_v30 = vpop.f32.mrf.mxu3  ;;  %v3154_v41 = vpack.c.bf16 %v3109_v40, %v3104_v4  ;;  %5398 = vtanh.f32 %v3208_v27  ;;  %v3105_v5 = vadd.f32 %v7661_v54, %v3009_v24  ;;  %v3110_v49 = vadd.f32 %v7656_v33, %v3014_v12 }
 0x447   :  { %v2668_v34 = vpop.f32.mrf.mxu0  ;;  %5400 = vtanh.f32 %v3209_v21  ;;  %v3219_v22 = vunpack.c.h.bf16 %v3149_v9  ;;  %v3004_v32 = vunpack.c.l.bf16 %v7790_v36  ;;  %v2813_v6 = vpack.c.bf16 %v2619_v30, %v2570_v39 }
 0x448   :  { %5402 = vtanh.f32 %v3213_v50  ;;  %v3106_v26 = vadd.f32 %v7661_v54, %v3010_v42  ;;  %v3223_v17 = vunpack.c.l.bf16 %v3153_v53  ;;  %v3111_v46 = vadd.f32 %v7656_v33, %v3015_v11 }
 0x449   :  { %v2717_v31 = vpop.f32.mrf.mxu1  ;;  %v7803_v15 = vadd.f32 %v7665_v16, %v2999_v57  ;;  %v7806_v24 = vadd.f32 %v7665_v16, %v3000_v35  ;;  %5404 = vtanh.f32 %v3214_v37  ;;  %v3224_v27 = vunpack.c.l.bf16 %v3154_v41 }
 0x44a   :  { %5406 = vtanh.f32 %v3218_v44  ;;  %v3005_v40 = vunpack.c.h.bf16 %v7790_v36  ;;  %v7809_v39 = vpack.c.bf16 %v3110_v49, %v3105_v5  ;;  %v2814_v12 = vpack.c.bf16 %v2717_v31, %v2668_v34 }
 0x44b   :  { %5408 = vtanh.f32 %v3219_v22  ;;  %v3017_v21 = vunpack.c.l.bf16 %v2813_v6  ;;  %v3018_v4 = vunpack.c.h.bf16 %v2813_v6  ;;  %v3100_v57 = vadd.f32 %v7654_v20, %v3004_v32 }
 0x44c   :  { %v2572_v9 = vpop.f32.mrf.mxu2  ;;  %v7811_v42 = vpop.eup %5398  ;;  %v3228_v11 = vunpack.c.h.bf16 %v3153_v53  ;;  %5410 = vtanh.f32 %v3223_v17  ;;  %v7814_v37 = vpack.c.bf16 %v3111_v46, %v3106_v26  ;;  %v3229_v36 = vunpack.c.h.bf16 %v3154_v41 }
 0x44d   :  { %v7816_v44 = vpop.eup %5400  ;;  %5412 = vtanh.f32 %v3224_v27  ;;  %v3225_v22 = vunpack.c.l.bf16 %v7809_v39  ;;  %v3019_v6 = vunpack.c.l.bf16 %v2814_v12  ;;  %v3113_v53 = vadd.f32 %v7647_v28, %v3017_v21 }
 0x44e   :  { %v2621_v30 = vpop.f32.mrf.mxu3  ;;  %v7818_v49 = vpop.eup %5402  ;;  %v3114_v26 = vadd.f32 %v7647_v28, %v3018_v4  ;;  %5414 = vtanh.f32 %v3228_v11  ;;  %v3226_v27 = vunpack.c.l.bf16 %v7814_v37 }
 0x44f   :  { %v2816_v50 = vpack.c.bf16 %v2621_v30, %v2572_v9  ;;  %v2670_v35 = vpop.f32.mrf.mxu0  ;;  %v3020_v9 = vunpack.c.h.bf16 %v2814_v12  ;;  %v7821_v32 = vpop.eup %5404  ;;  %v3101_v12 = vadd.f32 %v7654_v20, %v3005_v40  ;;  %5416 = vtanh.f32 %v3229_v36 }
 0x450   :  { %v7827_v46 = vpop.eup %5406  ;;  %5418 = vtanh.f32 %v3225_v22  ;;  %v8965_v22 = vunpack.c.h.bf16 %v7618_v14 }
 0x451   :  { %v3022_v5 = vunpack.c.l.bf16 %v2816_v50  ;;  %v3023_v34 = vunpack.c.h.bf16 %v2816_v50  ;;  %v2719_v31 = vpop.f32.mrf.mxu1  ;;  %v7830_v54 = vpop.eup %5408  ;;  %5420 = vtanh.f32 %v3226_v27 }
 0x452   :  { %v2817_v30 = vpack.c.bf16 %v2719_v31, %v2670_v35  ;;  %v7835_v4 = vpop.eup %5410 }
 0x453   :  { %v3118_v17 = vadd.f32 %v7652_v62, %v3022_v5  ;;  %v3119_v41 = vadd.f32 %v7652_v62, %v3023_v34  ;;  %v3115_v5 = vadd.f32 %v7647_v28, %v3019_v6  ;;  %v3116_v34 = vadd.f32 %v7647_v28, %v3020_v9 }
 0x454   :  { %v3024_v50 = vunpack.c.l.bf16 %v2817_v30  ;;  %v3025_v16 = vunpack.c.h.bf16 %v2817_v30  ;;  %v7833_v31 = vpop.f32.mrf.mxu2  ;;  %v7841_v30 = vpop.eup %5412  ;;  %v2985_v6 = vunpack.c.h.bf16 %v7752_v3  ;;  %v8964_v9 = vunpack.c.l.bf16 %v7618_v14 }
 0x455   :  { %v3158_v35 = vpack.c.bf16 %v3118_v17, %v3113_v53  ;;  %v3159_v21 = vpack.c.bf16 %v3119_v41, %v3114_v26  ;;  %8963 = vst [vmem:[#allocation38_spill] sm:$0xff] %v7833_v31  ;;  %v2984_v41 = vunpack.c.l.bf16 %v7752_v3  ;;  %v3086_v31 = vadd.f32 %v7659_v56, %v8965_v22 }
 0x456   :  { %v3120_v11 = vadd.f32 %v7652_v62, %v3024_v50  ;;  %v3121_v33 = vadd.f32 %v7652_v62, %v3025_v16  ;;  %v3085_v50 = vadd.f32 %v7659_v56, %v8964_v9  ;;  %v7848_v16 = vpop.eup %5414  ;;  %v3151_v14 = vpack.c.bf16 %v3101_v12, %v7806_v24 }
 0x457   :  { %v3233_v47 = vunpack.c.l.bf16 %v3158_v35  ;;  %v3234_v40 = vunpack.c.l.bf16 %v3159_v21  ;;  %v3238_v36 = vunpack.c.h.bf16 %v3158_v35  ;;  %v3239_v53 = vunpack.c.h.bf16 %v3159_v21  ;;  %v7853_v21 = vpop.eup %5416 }
 0x458   :  { %v3160_v26 = vpack.c.bf16 %v3120_v11, %v3115_v5  ;;  %v3161_v17 = vpack.c.bf16 %v3121_v33, %v3116_v34  ;;  %v8966_v33 = vunpack.c.l.bf16 %v7761_v43  ;;  %v3150_v5 = vpack.c.bf16 %v3100_v57, %v7803_v15  ;;  %v7863_v9 = vpop.eup %5418 }
 0x459   :  { %5422 = vtanh.f32 %v3233_v47  ;;  %v8967_v47 = vunpack.c.h.bf16 %v7761_v43  ;;  %v2974_v22 = vunpack.c.l.bf16 %v7728_v48  ;;  %v2975_v56 = vunpack.c.h.bf16 %v7728_v48  ;;  %v7870_v57 = vpop.eup %5420 }
 0x45a   :  { %5424 = vtanh.f32 %v3234_v40  ;;  %v3235_v27 = vunpack.c.l.bf16 %v3160_v26  ;;  %v3236_v35 = vunpack.c.l.bf16 %v3161_v17  ;;  %v3090_v3 = vadd.f32 %v7673_v10, %v8966_v33 }
 0x45b   :  { %5426 = vtanh.f32 %v3238_v36  ;;  %v3240_v34 = vunpack.c.h.bf16 %v3160_v26  ;;  %v3091_v11 = vadd.f32 %v7673_v10, %v8967_v47  ;;  %v3241_v40 = vunpack.c.h.bf16 %v3161_v17 }
 0x45c   :  { %5428 = vtanh.f32 %v3239_v53  ;;  %v3230_v33 = vunpack.c.h.bf16 %v7809_v39  ;;  %v7868_v15 = vpop.f32.mrf.mxu2  ;;  %v8969_v43 = vunpack.c.l.bf16 %v7597_v2  ;;  %v8970_v24 = vunpack.c.h.bf16 %v7597_v2 }
 0x45d   :  { %5430 = vtanh.f32 %v3235_v27  ;;  %8968 = vst [vmem:[#allocation50_spill] sm:$0xff] %v7868_v15  ;;  %v3231_v53 = vunpack.c.h.bf16 %v7814_v37  ;;  %v3080_v48 = vadd.f32 %v7601_v55, %v2984_v41  ;;  %v3145_v39 = vpack.c.bf16 %v3090_v3, %v3085_v50 }
 0x45e   :  { %v3075_v36 = vadd.f32 %v7599_v52, %v8969_v43  ;;  %v3076_v12 = vadd.f32 %v7599_v52, %v8970_v24  ;;  %5432 = vtanh.f32 %v3236_v35  ;;  %v3215_v17 = vunpack.c.l.bf16 %v3150_v5 }
 0x45f   :  { %v5423_v26 = vpop.eup %5422  ;;  %5434 = vtanh.f32 %v3240_v34  ;;  %v3081_v47 = vadd.f32 %v7601_v55, %v2985_v6  ;;  %v3146_v15 = vpack.c.bf16 %v3091_v11, %v3086_v31  ;;  %v3216_v10 = vunpack.c.l.bf16 %v3151_v14 }
 0x460   :  { %v5425_v27 = vpop.eup %5424  ;;  %5436 = vtanh.f32 %v3241_v40  ;;  %v8971_v2 = vunpack.c.l.bf16 %v7574_v7  ;;  %v3070_v37 = vadd.f32 %v7576_v8, %v2974_v22  ;;  %v3220_v35 = vunpack.c.h.bf16 %v3150_v5 }
 0x461   :  { %v5427_v43 = vpop.eup %5426  ;;  %5438 = vtanh.f32 %v3230_v33  ;;  %v8972_v41 = vunpack.c.h.bf16 %v7574_v7  ;;  %v3221_v3 = vunpack.c.h.bf16 %v3151_v14  ;;  %v3140_v34 = vpack.c.bf16 %v3080_v48, %v3075_v36 }
 0x462   :  { %v3065_v24 = vadd.f32 %v7578_v59, %v8971_v2  ;;  %v5429_v52 = vpop.eup %5428  ;;  %5440 = vtanh.f32 %v3231_v53  ;;  %v3358_v6 = vpack.c.bf16 %v5427_v43, %v5423_v26  ;;  %v3205_v11 = vunpack.c.l.bf16 %v3145_v39 }
 0x463   :  { %v3066_v50 = vadd.f32 %v7578_v59, %v8972_v41  ;;  %v5431_v31 = vpop.eup %5430  ;;  %5442 = vtanh.f32 %v3215_v17  ;;  %v3359_v40 = vpack.c.bf16 %v5429_v52, %v5425_v27  ;;  %v3071_v2 = vadd.f32 %v7576_v8, %v2975_v56 }
 0x464   :  { %v5433_v55 = vpop.eup %5432  ;;  %v3141_v62 = vpack.c.bf16 %v3081_v47, %v3076_v12  ;;  %v3206_v22 = vunpack.c.l.bf16 %v3146_v15  ;;  %5444 = vtanh.f32 %v3216_v10  ;;  %3427 = vmatpush.bf16.msrb.mxu3 %v3358_v6  ;;  %v8973_v7 = vunpack.c.l.bf16 %v7689_v25  ;;  %v7894_v36 = vpop.f32.mrf.mxu2 }
 0x465   :  { %v5435_v5 = vpop.eup %5434  ;;  %v7892_v14 = vpack.c.bf16 %v3070_v37, %v3065_v24  ;;  %v3210_v53 = vunpack.c.h.bf16 %v3145_v39  ;;  %5446 = vtanh.f32 %v3220_v35  ;;  %3476 = vmatpush.bf16.msra.mxu0 %v3359_v40  ;;  %v3211_v26 = vunpack.c.h.bf16 %v3146_v15 }
 0x466   :  { %v3060_v33 = vadd.f32 %v7556_v19, %v8973_v7  ;;  %v5437_v52 = vpop.eup %5436  ;;  %5448 = vtanh.f32 %v3221_v3  ;;  %v3360_v56 = vpack.c.bf16 %v5435_v5, %v5431_v31  ;;  %v3353_v10 = vpack.c.bf16 %v7848_v16, %v7835_v4 }
 0x467   :  { %v5439_v12 = vpop.eup %5438  ;;  %v3195_v48 = vunpack.c.l.bf16 %v3140_v34  ;;  %5450 = vtanh.f32 %v3205_v11  ;;  %v3361_v17 = vpack.c.bf16 %v5437_v52, %v5433_v55  ;;  %v3354_v27 = vpack.c.bf16 %v7853_v21, %v7841_v30 }
 0x468   :  { %v5441_v47 = vpop.eup %5440  ;;  %v8974_v39 = vunpack.c.h.bf16 %v7689_v25  ;;  %v3136_v24 = vpack.c.bf16 %v3071_v2, %v3066_v50  ;;  %v3196_v37 = vunpack.c.l.bf16 %v3141_v62  ;;  %5452 = vtanh.f32 %v3206_v22  ;;  %3525 = vmatpush.bf16.msra.mxu1 %v3360_v56  ;;  %3428 = vmatpush.bf16.msrb.mxu3 %v3353_v10 }
 0x469   :  { %v5443_v15 = vpop.eup %5442  ;;  %v8975_v4 = vunpack.c.l.bf16 %v7671_v63  ;;  %v7907_v55 = vpack.c.bf16 %v3060_v33, %v7699_v29  ;;  %v3200_v35 = vunpack.c.h.bf16 %v3140_v34  ;;  %5454 = vtanh.f32 %v3210_v53  ;;  %3574 = vmatpush.bf16.msra.mxu2 %v3361_v17  ;;  %3477 = vmatpush.bf16.msra.mxu0 %v3354_v27 }
 0x46a   :  { %v3061_v43 = vadd.f32 %v7556_v19, %v8974_v39  ;;  %v5445_v25 = vpop.eup %5444  ;;  %v3201_v30 = vunpack.c.h.bf16 %v3141_v62  ;;  %5456 = vtanh.f32 %v3211_v26  ;;  %v3355_v21 = vpack.c.bf16 %v5439_v12, %v7863_v9 }
 0x46b   :  { %v3050_v16 = vadd.f32 %v7535_v45, %v8975_v4  ;;  %v3348_v41 = vpack.c.bf16 %v7827_v46, %v7818_v49  ;;  %v5447_v50 = vpop.eup %5446  ;;  %v3185_v3 = vunpack.c.l.bf16 %v7892_v14  ;;  %5458 = vtanh.f32 %v3195_v48 }
 0x46c   :  { %v3356_v6 = vpack.c.bf16 %v5441_v47, %v7870_v57  ;;  %v3349_v29 = vpack.c.bf16 %v7830_v54, %v7821_v32  ;;  %v5449_v31 = vpop.eup %5448  ;;  %v8976_v34 = vunpack.c.h.bf16 %v7671_v63  ;;  %v3131_v11 = vpack.c.bf16 %v3061_v43, %v7703_v23  ;;  %3526 = vmatpush.bf16.msra.mxu1 %v3355_v21  ;;  %v7922_v54 = vpop.f32.mrf.mxu2  ;;  %v8977_v43 = vld [vmem:[#allocation44_spill] sm:$0xff]  ;;  %v8981_v21 = vld [vmem:[#allocation34_spill] sm:$0xff] }
 0x46d   :  { %v3186_v9 = vunpack.c.l.bf16 %v3136_v24  ;;  %5460 = vtanh.f32 %v3196_v37  ;;  %3429 = vmatpush.bf16.msrb.mxu3 %v3348_v41  ;;  %v5451_v49 = vpop.eup %5450  ;;  %v3125_v46 = vpack.c.bf16 %v3050_v16, %v7684_v51  ;;  %v3190_v40 = vunpack.c.h.bf16 %v7892_v14  ;;  %v8978_v37 = vld [vmem:[#allocation41_spill] sm:$0xff] }
 0x46e   :  { %v3051_v62 = vadd.f32 %v7535_v45, %v8976_v34  ;;  %5462 = vtanh.f32 %v3200_v35  ;;  %3575 = vmatpush.bf16.msra.mxu2 %v3356_v6  ;;  %3478 = vmatpush.bf16.msra.mxu0 %v3349_v29  ;;  %v5453_v32 = vpop.eup %5452  ;;  %v3191_v63 = vunpack.c.h.bf16 %v3136_v24  ;;  %v3350_v57 = vpack.c.bf16 %v5447_v50, %v5443_v15  ;;  %v8979_v15 = vld [vmem:[#allocation36_spill] sm:$0xff]  ;;  %v8983_v6 = vld [vmem:[#allocation42_spill] sm:$0xff] }
 0x46f   :  { %5464 = vtanh.f32 %v3201_v30  ;;  %v3343_v23 = vpack.c.bf16 %v7811_v42, %v7796_v60  ;;  %v5455_v2 = vpop.eup %5454  ;;  %v3175_v22 = vunpack.c.l.bf16 %v7907_v55  ;;  %v3351_v5 = vpack.c.bf16 %v5449_v31, %v5445_v25  ;;  %v8980_v30 = vld [vmem:[#allocation31_spill] sm:$0xff] }
 0x470   :  { %5466 = vtanh.f32 %v3185_v3  ;;  %v3344_v51 = vpack.c.bf16 %v7816_v44, %v7800_v1  ;;  %v5457_v7 = vpop.eup %5456  ;;  %v3126_v33 = vpack.c.bf16 %v3051_v62, %v7693_v0  ;;  %v3176_v14 = vunpack.c.l.bf16 %v3131_v11  ;;  %3527 = vmatpush.bf16.msra.mxu1 %v3350_v57  ;;  %v8982_v3 = vld [vmem:[#allocation29_spill] sm:$0xff]  ;;  %v8986_v57 = vld [vmem:[#allocation47_spill] sm:$0xff] }
 0x471   :  { %5468 = vtanh.f32 %v3186_v9  ;;  %3430 = vmatpush.bf16.msrb.mxu3 %v3343_v23  ;;  %v5459_v53 = vpop.eup %5458  ;;  %v3180_v52 = vunpack.c.h.bf16 %v7907_v55  ;;  %v3181_v42 = vunpack.c.h.bf16 %v3131_v11  ;;  %v3345_v26 = vpack.c.bf16 %v5455_v2, %v5451_v49  ;;  %v8984_v49 = vld [vmem:[#allocation40_spill] sm:$0xff] }
 0x472   :  { %5470 = vtanh.f32 %v3190_v40  ;;  %3576 = vmatpush.bf16.msra.mxu2 %v3351_v5  ;;  %3479 = vmatpush.bf16.msra.mxu0 %v3344_v51  ;;  %v3338_v1 = vpack.c.bf16 %v7779_v58, %v7770_v38  ;;  %v3165_v56 = vunpack.c.l.bf16 %v3125_v46  ;;  %v3346_v0 = vpack.c.bf16 %v5457_v7, %v5453_v32  ;;  %v8987_v23 = vld [vmem:[#allocation32_spill] sm:$0xff] }
 0x473   :  { %v5461_v60 = vpop.eup %5460  ;;  %5472 = vtanh.f32 %v3191_v63  ;;  %v3339_v10 = vpack.c.bf16 %v7785_v13, %v7774_v18  ;;  %v3166_v48 = vunpack.c.l.bf16 %v3126_v33  ;;  %v3170_v27 = vunpack.c.h.bf16 %v3125_v46  ;;  %v8985_v46 = vld [vmem:[#allocation33_spill] sm:$0xff] }
 0x474   :  { %v5463_v44 = vpop.eup %5462  ;;  %5474 = vtanh.f32 %v3175_v22  ;;  %3528 = vmatpush.bf16.msra.mxu1 %v3345_v26  ;;  %v7935_v47 = vpop.f32.mrf.mxu2  ;;  %v3171_v58 = vunpack.c.h.bf16 %v3126_v33  ;;  %v3333_v24 = vpack.c.bf16 %v8977_v43, %v7748_v61  ;;  %v3334_v4 = vpack.c.bf16 %v8979_v15, %v8978_v37  ;;  %v7951_v22 = vld [vmem:[#allocation5] sm:$0xff] }
 0x475   :  { %v5465_v12 = vpop.eup %5464  ;;  %5476 = vtanh.f32 %v3176_v14  ;;  %3431 = vmatpush.bf16.msrb.mxu3 %v3338_v1  ;;  %v3340_v39 = vpack.c.bf16 %v5463_v44, %v5459_v53  ;;  %v3328_v61 = vpack.c.bf16 %v8981_v21, %v8980_v30  ;;  %v3329_v29 = vpack.c.bf16 %v8983_v6, %v8982_v3  ;;  %v7961_v53 = vld [vmem:[#allocation5 + $0x8] sm:$0xff]  ;;  %v7995_v15 = vld [vmem:[#allocation5 + $0x20] sm:$0xff] }
 0x476   :  { %v5467_v17 = vpop.eup %5466  ;;  %5478 = vtanh.f32 %v3180_v52  ;;  %3577 = vmatpush.bf16.msra.mxu2 %v3346_v0  ;;  %3480 = vmatpush.bf16.msra.mxu0 %v3339_v10  ;;  %v3341_v13 = vpack.c.bf16 %v5465_v12, %v5461_v60  ;;  %v3323_v40 = vpack.c.bf16 %v8985_v46, %v8984_v49  ;;  %v3324_v2 = vpack.c.bf16 %v8987_v23, %v8986_v57  ;;  %v8988_v1 = vld [vmem:[#allocation11_spill] sm:$0xff]  ;;  %v8989_v44 = vld [vmem:[#allocation12_spill] sm:$0xff]  ;;  %v8990_v0 = vld [vmem:[#allocation25_spill] sm:$0xff] }
 0x477   :  { %v5469_v38 = vpop.eup %5468  ;;  %5480 = vtanh.f32 %v3181_v42  ;;  %v7971_v42 = vld [vmem:[#allocation5 + $0x10] sm:$0xff]  ;;  %v5793_v26 = vmov 4   ;;  %v8996_v43 = vld [vmem:[#allocation23_spill] sm:$0xff]  ;;  %v9003_v49 = vld [vmem:[#allocation46_spill] sm:$0xff] }
 0x478   :  { %v5471_v18 = vpop.eup %5470  ;;  %5482 = vtanh.f32 %v3165_v56  ;;  %3529 = vmatpush.bf16.msra.mxu1 %v3340_v39  ;;  %4877 = vset.pattern.permute.xlu1 %v5793_v26  ;;  %v8991_v10 = vld [vmem:[#allocation24_spill] sm:$0xff]  ;;  %v8992_v12 = vld [vmem:[#allocation21_spill] sm:$0xff]  ;;  %v8999_v37 = vld [vmem:[#allocation15_spill] sm:$0xff] }
 0x479   :  { %v5473_v16 = vpop.eup %5472  ;;  %5484 = vtanh.f32 %v3166_v48  ;;  %3432 = vmatpush.bf16.msrb.mxu3 %v3333_v24  ;;  %v3335_v25 = vpack.c.bf16 %v5471_v18, %v5467_v17  ;;  %4876 = vset.pattern.permute.xlu0 %v5793_v26  ;;  %v8993_v17 = vld [vmem:[#allocation26_spill] sm:$0xff]  ;;  %v8997_v24 = vld [vmem:[#allocation20_spill] sm:$0xff] }
 0x47a   :  { %v5475_v55 = vpop.eup %5474  ;;  %5486 = vtanh.f32 %v3170_v27  ;;  %3578 = vmatpush.bf16.msra.mxu2 %v3341_v13  ;;  %3481 = vmatpush.bf16.msra.mxu0 %v3334_v4  ;;  %v3336_v50 = vpack.c.bf16 %v5473_v16, %v5469_v38  ;;  %v7983_v27 = vld [vmem:[#allocation5 + $0x18] sm:$0xff]  ;;  %v9000_v4 = vld [vmem:[#allocation16_spill] sm:$0xff] }
 0x47b   :  { %v5477_v35 = vpop.eup %5476  ;;  %5488 = vtanh.f32 %v3171_v58  ;;  %3737 = vperm.xlu1 %4877, %v8988_v1   ;;  %3729 = vperm.xlu0 %4876, %v8989_v44   ;;  %v8994_v38 = vld [vmem:[#allocation17_spill] sm:$0xff]  ;;  %v8995_v58 = vld [vmem:[#allocation22_spill] sm:$0xff]  ;;  %v8017_v57 = vld [vmem:[#allocation5 + $0x28] sm:$0xff] }
 0x47c   :  { %v5479_v41 = vpop.eup %5478  ;;  %3530 = vmatpush.bf16.msra.mxu1 %v3335_v25  ;;  %v7945_v62 = vpop.f32.mrf.mxu2  ;;  %4875 = vset.pattern.permute.xlu2 %v5793_v26  ;;  %v8998_v18 = vld [vmem:[#allocation18_spill] sm:$0xff]  ;;  %v9001_v16 = vld [vmem:[#allocation13_spill] sm:$0xff]  ;;  %v9002_v25 = vld [vmem:[#allocation19_spill] sm:$0xff] }
 0x47d   :  { %v5481_v31 = vpop.eup %5480  ;;  %3433 = vmatpush.bf16.msrb.mxu3 %v3328_v61  ;;  %v3330_v9 = vpack.c.bf16 %v5479_v41, %v5475_v55  ;;  %3721 = vperm.xlu2 %4875, %v8990_v0   ;;  %v9006_v0 = vld [vmem:[#allocation48_spill] sm:$0xff] }
 0x47e   :  { %v5483_v34 = vpop.eup %5482  ;;  %3579 = vmatpush.bf16.msra.mxu2 %v3336_v50  ;;  %3482 = vmatpush.bf16.msra.mxu0 %v3329_v29  ;;  %v3331_v63 = vpack.c.bf16 %v5481_v31, %v5477_v35  ;;  %v5794_v50 = vmov 6   ;;  %v8007_v29 = vld [vmem:[%s8698_s1] sm:$0xff] }
 0x47f   :  { %v5485_v11 = vpop.eup %5484 }
 0x480   :  { %v5487_v32 = vpop.eup %5486  ;;  %3531 = vmatpush.bf16.msra.mxu1 %v3330_v9 }
 0x481   :  { %v5489_v5 = vpop.eup %5488  ;;  %3434 = vmatpush.bf16.msrb.mxu3 %v3323_v40  ;;  %v3325_v51 = vpack.c.bf16 %v5487_v32, %v5483_v34 }
 0x482   :  { %3580 = vmatpush.bf16.msra.mxu2 %v3331_v63  ;;  %3483 = vmatpush.bf16.msra.mxu0 %v3324_v2  ;;  %v3326_v7 = vpack.c.bf16 %v5489_v5, %v5485_v11  ;;  %v5690_v11 = vld [vmem:[%s8698_s1 + $0x10] sm:$0xff]  ;;  %v9004_v63 = vld [vmem:[#allocation14_spill] sm:$0xff]  ;;  %v9005_v5 = vld [vmem:[#allocation43_spill] sm:$0xff] }
 0x483   :  { %3753 = vperm.xlu1 %4877, %v8991_v10   ;;  %3769 = vperm.xlu0 %4876, %v8992_v12  }
 0x484   :  { %3435 = vmatmul.bf16.vlgmr.msrb.gmra.mxu3 %v7951_v22  ;;  %3532 = vmatpush.bf16.msra.mxu1 %v3325_v51  ;;  %v7955_v33 = vpop.f32.mrf.mxu2 }
 0x485   :  { %3484 = vmatmul.bf16.vlgmr.msra.gmra.mxu0 %v7951_v22  ;;  %3745 = vperm.xlu2 %4875, %v8993_v17  }
 0x486   :  { %3581 = vmatpush.bf16.msra.mxu2 %v3326_v7 }
 0x487   :  { %3533 = vmatmul.bf16.vlgmr.msra.gmra.mxu1 %v7951_v22 }
 0x489   :  { %3582 = vmatmul.bf16.vlgmr.msra.gmra.mxu2 %v7951_v22 }
 0x48b   :  { %3777 = vperm.xlu1 %4877, %v8994_v38   ;;  %3793 = vperm.xlu0 %4876, %v8995_v58   ;;  %v9008_v58 = vld [vmem:[#allocation39_spill] sm:$0xff] }
 0x48c   :  { %v7959_v14 = vpop.f32.mrf.mxu2 }
 0x48d   :  { %3761 = vperm.xlu2 %4875, %v8996_v43  }
 0x493   :  { %3801 = vperm.xlu1 %4877, %v8997_v24   ;;  %3817 = vperm.xlu0 %4876, %v8998_v18  }
 0x494   :  { %3440 = vmatmul.bf16.gmra.mxu3 %v7961_v53  ;;  %v7965_v52 = vpop.f32.mrf.mxu2 }
 0x495   :  { %3489 = vmatmul.bf16.gmra.mxu0 %v7961_v53  ;;  %3785 = vperm.xlu2 %4875, %v8999_v37   ;;  %v2797_v23 = vpack.c.bf16 %v7965_v52, %v7965_v52  ;;  %v2791_v52 = vpack.c.bf16 %v7955_v33, %v7955_v33  ;;  %v5692_v33 = vld [vmem:[%s8698_s1 + $0x38] sm:$0xff] }
 0x497   :  { %3538 = vmatmul.bf16.gmra.mxu1 %v7961_v53  ;;  %v2991_v12 = vunpack.c.l.bf16 %v2797_v23 }
 0x499   :  { %3587 = vmatmul.bf16.gmra.mxu2 %v7961_v53 }
 0x49b   :  { %3825 = vperm.xlu1 %4877, %v9000_v4   ;;  %3841 = vperm.xlu0 %4876, %v9001_v16   ;;  %v2785_v4 = vpack.c.bf16 %v7935_v47, %v7935_v47  ;;  %v2981_v16 = vunpack.c.l.bf16 %v2791_v52  ;;  %v2779_v47 = vpack.c.bf16 %v7894_v36, %v7894_v36 }
 0x49c   :  { %v7969_v60 = vpop.f32.mrf.mxu2 }
 0x49d   :  { %3809 = vperm.xlu2 %4875, %v9002_v25   ;;  %v2800_v31 = vpack.c.bf16 %v7969_v60, %v7969_v60  ;;  %v2794_v60 = vpack.c.bf16 %v7959_v14, %v7959_v14  ;;  %v2782_v25 = vpack.c.bf16 %v7922_v54, %v7922_v54  ;;  %v9012_v54 = vld [vmem:[#allocation50_spill] sm:$0xff] }
 0x49f   :  { %v2996_v26 = vunpack.c.l.bf16 %v2800_v31  ;;  %v2986_v14 = vunpack.c.l.bf16 %v2794_v60  ;;  %v9011_v31 = vld [vmem:[#allocation37_spill] sm:$0xff]  ;;  %v9013_v60 = vld [vmem:[#allocation38_spill] sm:$0xff] }
 0x4a3   :  { %4878 = vset.pattern.permute.xlu1 %v5794_v50  ;;  %4880 = vset.pattern.permute.xlu0 %v5794_v50 }
 0x4a4   :  { %3445 = vmatmul.bf16.gmra.mxu3 %v7971_v42  ;;  %v2756_v56 = vpop.f32.mrf.mxu2  ;;  %4361 = vperm.xlu1 %4878, %v8007_v29  }
 0x4a5   :  { %3494 = vmatmul.bf16.gmra.mxu0 %v7971_v42  ;;  %v2803_v3 = vpack.c.bf16 %v2756_v56, %v2756_v56  ;;  %4369 = vperm.xlu0 %4880, %v5690_v11   ;;  %v5694_v11 = vld [vmem:[%s8698_s1 + $0x28] sm:$0xff] }
 0x4a6   :  { %3833 = vperm.xlu2 %4875, %v9004_v63  }
 0x4a7   :  { %3543 = vmatmul.bf16.gmra.mxu1 %v7971_v42  ;;  %v3001_v2 = vunpack.c.l.bf16 %v2803_v3 }
 0x4a9   :  { %3592 = vmatmul.bf16.gmra.mxu2 %v7971_v42 }
 0x4ac   :  { %v2758_v48 = vpop.f32.mrf.mxu2 }
 0x4ad   :  { %v2806_v21 = vpack.c.bf16 %v2758_v48, %v2758_v48  ;;  %v9007_v48 = vld [vmem:[#allocation30_spill] sm:$0xff]  ;;  %4389 = vperm.xlu0 %4880, %v5692_v33  }
 0x4ae   :  { %v3097_v17 = vadd.f32 %v9007_v48, %v3001_v2  ;;  %4879 = vset.pattern.permute.xlu2 %v5794_v50 }
 0x4af   :  { %v3006_v9 = vunpack.c.l.bf16 %v2806_v21  ;;  %v9010_v21 = vld [vmem:[#allocation35_spill] sm:$0xff] }
 0x4b1   :  { %v3102_v1 = vadd.f32 %v7654_v20, %v3006_v9  ;;  %v5691_v20 = vld [vmem:[%s8698_s1 + $0x18] sm:$0xff]  ;;  %v2776_v9 = vpack.c.bf16 %v9012_v54, %v9012_v54 }
 0x4b2   :  { %4373 = vperm.xlu1 %4878, %v5691_v20   ;;  %v9014_v20 = vld [vmem:[#allocation28_spill] sm:$0xff] }
 0x4b3   :  { %v3152_v43 = vpack.c.bf16 %v3102_v1, %v3097_v17  ;;  %v2961_v1 = vunpack.c.l.bf16 %v2779_v47  ;;  %v5701_v47 = vld [vmem:[%s8698_s1 + $0x48] sm:$0xff] }
 0x4b4   :  { %3450 = vmatmul.bf16.gmra.mxu3 %v7983_v27  ;;  %v2761_v39 = vpop.f32.mrf.mxu2 }
 0x4b5   :  { %3499 = vmatmul.bf16.gmra.mxu0 %v7983_v27  ;;  %v2809_v30 = vpack.c.bf16 %v2761_v39, %v2761_v39  ;;  %v3092_v39 = vadd.f32 %v9008_v58, %v2996_v26  ;;  %v3217_v50 = vunpack.c.l.bf16 %v3152_v43  ;;  %v3222_v3 = vunpack.c.h.bf16 %v3152_v43  ;;  %v5698_v58 = vld [vmem:[%s8698_s1 + $0x68] sm:$0xff] }
 0x4b6   :  { %v2773_v26 = vpack.c.bf16 %v9013_v60, %v9013_v60 }
 0x4b7   :  { %3548 = vmatmul.bf16.gmra.mxu1 %v7983_v27  ;;  %v3011_v6 = vunpack.c.l.bf16 %v2809_v30 }
 0x4b9   :  { %3597 = vmatmul.bf16.gmra.mxu2 %v7983_v27  ;;  %v3107_v51 = vadd.f32 %v9005_v5, %v3011_v6  ;;  %v2971_v6 = vunpack.c.l.bf16 %v2785_v4  ;;  %v8064_v5 = vld [vmem:[#allocation5 + $0x30] sm:$0xff] }
 0x4ba   :  { %4381 = vperm.xlu1 %4878, %v5694_v11  }
 0x4bc   :  { %v2763_v13 = vpop.f32.mrf.mxu2 }
 0x4bd   :  { %v2812_v35 = vpack.c.bf16 %v2763_v13, %v2763_v13 }
 0x4bf   :  { %v3016_v61 = vunpack.c.l.bf16 %v2812_v35 }
 0x4c1   :  { %v3112_v46 = vadd.f32 %v9003_v49, %v3016_v61  ;;  %v3082_v61 = vadd.f32 %v9010_v21, %v2986_v14  ;;  %v2966_v49 = vunpack.c.l.bf16 %v2782_v25  ;;  %v5700_v21 = vld [vmem:[%s8698_s1 + $0x58] sm:$0xff] }
 0x4c3   :  { %v3157_v44 = vpack.c.bf16 %v3112_v46, %v3107_v51  ;;  %v5695_v46 = vld [vmem:[%s8698_s1 + $0x50] sm:$0xff]  ;;  %v5696_v51 = vld [vmem:[%s8698_s1 + $0x20] sm:$0xff] }
 0x4c4   :  { %3455 = vmatmul.bf16.gmra.mxu3 %v7995_v15  ;;  %v2766_v55 = vpop.f32.mrf.mxu2  ;;  %4401 = vperm.xlu0 %4880, %v5695_v46   ;;  %v5703_v46 = vld [vmem:[%s8698_s1 + $0x60] sm:$0xff] }
 0x4c5   :  { %3504 = vmatmul.bf16.gmra.mxu0 %v7995_v15  ;;  %v2815_v41 = vpack.c.bf16 %v2766_v55, %v2766_v55  ;;  %v3227_v24 = vunpack.c.l.bf16 %v3157_v44  ;;  %v3232_v37 = vunpack.c.h.bf16 %v3157_v44  ;;  %v9009_v55 = vld [vmem:[#allocation45_spill] sm:$0xff] }
 0x4c6   :  { %v3087_v35 = vadd.f32 %v9009_v55, %v2991_v12 }
 0x4c7   :  { %3553 = vmatmul.bf16.gmra.mxu1 %v7995_v15  ;;  %v3021_v40 = vunpack.c.l.bf16 %v2815_v41 }
 0x4c8   :  { %v3147_v41 = vpack.c.bf16 %v3092_v39, %v3087_v35 }
 0x4c9   :  { %3602 = vmatmul.bf16.gmra.mxu2 %v7995_v15  ;;  %v3117_v56 = vadd.f32 %v7647_v28, %v3021_v40  ;;  %v2788_v28 = vpack.c.bf16 %v7945_v62, %v7945_v62  ;;  %v5693_v62 = vld [vmem:[%s8698_s1 + $0x8] sm:$0xff] }
 0x4ca   :  { %4365 = vperm.xlu2 %4879, %v5693_v62   ;;  %v3207_v63 = vunpack.c.l.bf16 %v3147_v41  ;;  %v3212_v2 = vunpack.c.h.bf16 %v3147_v41 }
 0x4cb   :  { %v2976_v30 = vunpack.c.l.bf16 %v2788_v28  ;;  %v3057_v28 = vadd.f32 %v9014_v20, %v2961_v1 }
 0x4cc   :  { %v2768_v34 = vpop.f32.mrf.mxu2  ;;  %4413 = vperm.xlu0 %4880, %v5698_v58  }
 0x4cd   :  { %v2818_v32 = vpack.c.bf16 %v2768_v34, %v2768_v34  ;;  %v3077_v34 = vadd.f32 %v9011_v31, %v2981_v16  ;;  %v3072_v36 = vadd.f32 %v7576_v8, %v2976_v30  ;;  %v3067_v8 = vadd.f32 %v7578_v59, %v2971_v6  ;;  %v5697_v59 = vld [vmem:[%s8698_s1 + $0x40] sm:$0xff] }
 0x4ce   :  { %4393 = vperm.xlu1 %4878, %v5697_v59  }
 0x4cf   :  { %v3026_v7 = vunpack.c.l.bf16 %v2818_v32  ;;  %v3142_v32 = vpack.c.bf16 %v3082_v61, %v3077_v34  ;;  %v3137_v52 = vpack.c.bf16 %v3072_v36, %v3067_v8 }
 0x4d1   :  { %v3122_v10 = vadd.f32 %v9006_v0, %v3026_v7  ;;  %v2956_v0 = vunpack.c.l.bf16 %v2776_v9  ;;  %v3197_v12 = vunpack.c.l.bf16 %v3142_v32  ;;  %v3202_v48 = vunpack.c.h.bf16 %v3142_v32  ;;  %v5702_v9 = vld [vmem:[%s8698_s1 + $0x70] sm:$0xff] }
 0x4d2   :  { %4377 = vperm.xlu2 %4879, %v5696_v51   ;;  %v3187_v43 = vunpack.c.l.bf16 %v3137_v52 }
 0x4d3   :  { %v3162_v38 = vpack.c.bf16 %v3122_v10, %v3117_v56  ;;  %v3062_v10 = vadd.f32 %v7556_v19, %v2966_v49  ;;  %v3052_v39 = vadd.f32 %v7535_v45, %v2956_v0 }
 0x4d4   :  { %3460 = vmatmul.bf16.gmra.mxu3 %v8017_v57 }
 0x4d5   :  { %3509 = vmatmul.bf16.gmra.mxu0 %v8017_v57  ;;  %v3237_v18 = vunpack.c.l.bf16 %v3162_v38  ;;  %v3242_v13 = vunpack.c.h.bf16 %v3162_v38  ;;  %v2951_v38 = vunpack.c.l.bf16 %v2773_v26  ;;  %v3132_v33 = vpack.c.bf16 %v3062_v10, %v3057_v28 }
 0x4d6   :  { %4405 = vperm.xlu1 %4878, %v5700_v21  }
 0x4d7   :  { %3558 = vmatmul.bf16.gmra.mxu1 %v8017_v57  ;;  %5490 = vtanh.f32 %v3237_v18  ;;  %v5699_v18 = vld [vmem:[%s8698_s1 + $0x30] sm:$0xff]  ;;  %v3177_v55 = vunpack.c.l.bf16 %v3132_v33  ;;  %v3182_v35 = vunpack.c.h.bf16 %v3132_v33 }
 0x4d8   :  { %5492 = vtanh.f32 %v3242_v13 }
 0x4d9   :  { %3607 = vmatmul.bf16.gmra.mxu2 %v8017_v57  ;;  %5494 = vtanh.f32 %v3227_v24  ;;  %v3192_v24 = vunpack.c.h.bf16 %v3137_v52 }
 0x4da   :  { %5496 = vtanh.f32 %v3232_v37  ;;  %4385 = vperm.xlu2 %4879, %v5699_v18   ;;  %v9015_v37 = vld [vmem:[#allocation49_spill] sm:$0xff] }
 0x4db   :  { %5498 = vtanh.f32 %v3217_v50  ;;  %v3047_v62 = vadd.f32 %v9015_v37, %v2951_v38 }
 0x4dc   :  { %5500 = vtanh.f32 %v3222_v3  ;;  %v8092_v3 = vld [vmem:[#allocation5 + $0x38] sm:$0xff] }
 0x4dd   :  { %v5491_v40 = vpop.eup %5490  ;;  %5502 = vtanh.f32 %v3207_v63  ;;  %v3127_v16 = vpack.c.bf16 %v3052_v39, %v3047_v62 }
 0x4de   :  { %v5493_v23 = vpop.eup %5492  ;;  %5504 = vtanh.f32 %v3212_v2  ;;  %4417 = vperm.xlu1 %4878, %v5702_v9  }
 0x4df   :  { %v5495_v7 = vpop.eup %5494  ;;  %v3362_v44 = vpack.c.bf16 %v5493_v23, %v5491_v40  ;;  %5506 = vtanh.f32 %v3197_v12  ;;  %v3167_v41 = vunpack.c.l.bf16 %v3127_v16  ;;  %v3172_v50 = vunpack.c.h.bf16 %v3127_v16  ;;  %v5704_v23 = vld [vmem:[%s8698_s1 + $0x78] sm:$0xff]  ;;  %s5796_s1 = smov [#allocation7]  }
 0x4e0   :  { %v5497_v56 = vpop.eup %5496  ;;  %5508 = vtanh.f32 %v3202_v48  ;;  %s4663_s5 = sshll.u32 %s5796_s1, 4  ;;  %s4664_s5 = int_to_ptr.vmem [resolvable:$true] %s4663_s5 }
 0x4e1   :  { %3623 = vmatpush.bf16.msra.mxu3 %v3362_v44  ;;  %v5499_v17 = vpop.eup %5498  ;;  %v3357_v14 = vpack.c.bf16 %v5497_v56, %v5495_v7  ;;  %5510 = vtanh.f32 %v3187_v43  ;;  %v9016_v43 = vld [vmem:[#allocation27_spill] sm:$0xff] }
 0x4e2   :  { %v5501_v19 = vpop.eup %5500  ;;  %5512 = vtanh.f32 %v3192_v24  ;;  %4397 = vperm.xlu2 %4879, %v5701_v47  }
 0x4e3   :  { %v5503_v13 = vpop.eup %5502  ;;  %v3352_v4 = vpack.c.bf16 %v5501_v19, %v5499_v17  ;;  %5514 = vtanh.f32 %v3177_v55  ;;  %v3722_v19 = vpop.permute.xlu2 %3721 }
 0x4e4   :  { %3465 = vmatmul.bf16.gmra.mxu3 %v8064_v5  ;;  %v5505_v45 = vpop.eup %5504  ;;  %5516 = vtanh.f32 %v3182_v35  ;;  %v3727_v24 = vperm.slane %v3722_v19, %v9016_v43 }
 0x4e5   :  { %3514 = vmatmul.bf16.gmra.mxu0 %v8064_v5  ;;  %3624 = vmatpush.bf16.msra.mxu3 %v3357_v14  ;;  %v5507_v25 = vpop.eup %5506  ;;  %v3347_v30 = vpack.c.bf16 %v5505_v45, %v5503_v13  ;;  %5518 = vtanh.f32 %v3167_v41 }
 0x4e6   :  { %v5509_v61 = vpop.eup %5508  ;;  %5520 = vtanh.f32 %v3172_v50  ;;  %v8118_v37 = vunpack.c.l.bf16 %v3727_v24 }
 0x4e7   :  { %3563 = vmatmul.bf16.gmra.mxu1 %v8064_v5  ;;  %v5511_v6 = vpop.eup %5510  ;;  %v3342_v31 = vpack.c.bf16 %v5509_v61, %v5507_v25 }
 0x4e8   :  { %v5513_v34 = vpop.eup %5512  ;;  %9017 = vst [vmem:[#allocation44_spill] sm:$0xff] %v8118_v37 }
 0x4e9   :  { %3612 = vmatmul.bf16.gmra.mxu2 %v8064_v5  ;;  %3625 = vmatpush.bf16.msra.mxu3 %v3352_v4  ;;  %v5515_v11 = vpop.eup %5514  ;;  %v3337_v54 = vpack.c.bf16 %v5513_v34, %v5511_v6 }
 0x4ea   :  { %v5517_v49 = vpop.eup %5516  ;;  %4409 = vperm.xlu2 %4879, %v5703_v46  }
 0x4eb   :  { %v5519_v40 = vpop.eup %5518  ;;  %v3332_v36 = vpack.c.bf16 %v5517_v49, %v5515_v11  ;;  %v3746_v34 = vpop.permute.xlu2 %3745 }
 0x4ec   :  { %v5521_v32 = vpop.eup %5520 }
 0x4ed   :  { %3626 = vmatpush.bf16.msra.mxu3 %v3347_v30  ;;  %v3327_v63 = vpack.c.bf16 %v5521_v32, %v5519_v40  ;;  %v3738_v41 = vpop.permute.xlu1 %3737 }
 0x4f1   :  { %3627 = vmatpush.bf16.msra.mxu3 %v3342_v31  ;;  %v3743_v31 = vperm.slane %v3738_v41, %v9016_v43 }
 0x4f2   :  { %4421 = vperm.xlu2 %4879, %v5704_v23  }
 0x4f3   :  { %v8129_v40 = vunpack.c.l.bf16 %v3743_v31 }
 0x4f4   :  { %3470 = vmatmul.bf16.gmra.mxu3 %v8092_v3 }
 0x4f5   :  { %3519 = vmatmul.bf16.gmra.mxu0 %v8092_v3  ;;  %3628 = vmatpush.bf16.msra.mxu3 %v3337_v54  ;;  %9018 = vst [vmem:[#allocation41_spill] sm:$0xff] %v8129_v40 }
 0x4f7   :  { %3568 = vmatmul.bf16.gmra.mxu1 %v8092_v3 }
 0x4f9   :  { %3617 = vmatmul.bf16.gmra.mxu2 %v8092_v3  ;;  %3629 = vmatpush.bf16.msra.mxu3 %v3332_v36 }
 0x4fd   :  { %3630 = vmatpush.bf16.msra.mxu3 %v3327_v63 }
 0x502   :  { %v3485_v2 = vpop.f32.mrf.mxu0 }
 0x504   :  { %3631 = vmatmul.bf16.vlgmr.msra.gmra.mxu3 %v7951_v22  ;;  %v3534_v51 = vpop.f32.mrf.mxu1  ;;  %v5795_v22 = vmov 7  }
 0x505   :  { %4881 = vset.pattern.permute.xlu0 %v5795_v22 }
 0x506   :  { %4627 = vperm.xlu0 %4881, %v8007_v29  }
 0x507   :  { %v3436_v7 = vpop.f32.mrf.mxu3 }
 0x508   :  { %v3672_v60 = vpack.c.bf16 %v3485_v2, %v3436_v7 }
 0x50a   :  { %v3487_v26 = vpop.f32.mrf.mxu0  ;;  %v3848_v58 = vunpack.c.l.bf16 %v3672_v60  ;;  %v3849_v39 = vunpack.c.h.bf16 %v3672_v60 }
 0x50c   :  { %v3583_v1 = vpop.f32.mrf.mxu2  ;;  %v3536_v44 = vpop.f32.mrf.mxu1  ;;  %v3944_v4 = vadd.f32 %v8118_v37, %v3848_v58  ;;  %v3945_v29 = vadd.f32 %v8118_v37, %v3849_v39 }
 0x50d   :  { %v3673_v8 = vpack.c.bf16 %v3583_v1, %v3534_v51  ;;  %v3754_v39 = vpop.permute.xlu1 %3753 }
 0x50e   :  { %v4024_v61 = vpack.c.bf16 %v3945_v29, %v3944_v4  ;;  %v3759_v29 = vperm.slane %v3754_v39, %v9016_v43 }
 0x50f   :  { %v3438_v56 = vpop.f32.mrf.mxu3  ;;  %v3850_v18 = vunpack.c.l.bf16 %v3673_v8  ;;  %v3851_v13 = vunpack.c.h.bf16 %v3673_v8 }
 0x510   :  { %v8111_v0 = vpack.c.bf16 %v3487_v26, %v3438_v56  ;;  %v4072_v63 = vunpack.c.l.bf16 %v4024_v61  ;;  %v4073_v51 = vunpack.c.h.bf16 %v4024_v61 }
 0x511   :  { %v3946_v35 = vadd.f32 %v8118_v37, %v3850_v18  ;;  %v3947_v25 = vadd.f32 %v8118_v37, %v3851_v13  ;;  %v3762_v13 = vpop.permute.xlu2 %3761 }
 0x512   :  { %v3490_v10 = vpop.f32.mrf.mxu0  ;;  %5522 = vtanh.f32 %v4072_v63 }
 0x513   :  { %v4025_v54 = vpack.c.bf16 %v3947_v25, %v3946_v35  ;;  %5524 = vtanh.f32 %v4073_v51 }
 0x514   :  { %v3585_v52 = vpop.f32.mrf.mxu2  ;;  %3636 = vmatmul.bf16.gmra.mxu3 %v7961_v53  ;;  %v3539_v48 = vpop.f32.mrf.mxu1 }
 0x515   :  { %v8114_v12 = vpack.c.bf16 %v3585_v52, %v3536_v44  ;;  %v4074_v44 = vunpack.c.l.bf16 %v4025_v54 }
 0x517   :  { %v3441_v17 = vpop.f32.mrf.mxu3  ;;  %5526 = vtanh.f32 %v4074_v44 }
 0x518   :  { %v3678_v38 = vpack.c.bf16 %v3490_v10, %v3441_v17  ;;  %v4075_v10 = vunpack.c.h.bf16 %v4025_v54 }
 0x51a   :  { %v3492_v20 = vpop.f32.mrf.mxu0  ;;  %v3858_v30 = vunpack.c.l.bf16 %v3678_v38  ;;  %v3859_v50 = vunpack.c.h.bf16 %v3678_v38  ;;  %5528 = vtanh.f32 %v4075_v10  ;;  %v3853_v10 = vunpack.c.l.bf16 %v8111_v0 }
 0x51c   :  { %v3588_v28 = vpop.f32.mrf.mxu2  ;;  %v3541_v59 = vpop.f32.mrf.mxu1  ;;  %v3954_v7 = vadd.f32 %v8129_v40, %v3858_v30  ;;  %v3955_v60 = vadd.f32 %v8129_v40, %v3859_v50  ;;  %v8148_v50 = vunpack.c.l.bf16 %v3759_v29 }
 0x51d   :  { %v3679_v14 = vpack.c.bf16 %v3588_v28, %v3539_v48 }
 0x51e   :  { %v4030_v52 = vpack.c.bf16 %v3955_v60, %v3954_v7  ;;  %9020 = vst [vmem:[#allocation31_spill] sm:$0xff] %v8148_v50 }
 0x51f   :  { %v3443_v33 = vpop.f32.mrf.mxu3  ;;  %v3860_v47 = vunpack.c.l.bf16 %v3679_v14  ;;  %v3861_v11 = vunpack.c.h.bf16 %v3679_v14 }
 0x520   :  { %v3681_v53 = vpack.c.bf16 %v3492_v20, %v3443_v33  ;;  %v4082_v58 = vunpack.c.l.bf16 %v4030_v52 }
 0x521   :  { %v3956_v26 = vadd.f32 %v8129_v40, %v3860_v47  ;;  %v3957_v56 = vadd.f32 %v8129_v40, %v3861_v11  ;;  %v3730_v11 = vpop.permute.xlu0 %3729 }
 0x522   :  { %v3495_v62 = vpop.f32.mrf.mxu0  ;;  %v3863_v9 = vunpack.c.l.bf16 %v3681_v53  ;;  %v3864_v49 = vunpack.c.h.bf16 %v3681_v53  ;;  %v4083_v53 = vunpack.c.h.bf16 %v4030_v52  ;;  %5530 = vtanh.f32 %v4082_v58 }
 0x523   :  { %v4031_v22 = vpack.c.bf16 %v3957_v56, %v3956_v26  ;;  %v3854_v52 = vunpack.c.h.bf16 %v8111_v0 }
 0x524   :  { %v3590_v45 = vpop.f32.mrf.mxu2  ;;  %3641 = vmatmul.bf16.gmra.mxu3 %v7971_v42  ;;  %v3544_v55 = vpop.f32.mrf.mxu1  ;;  %v3751_v42 = vperm.slane %v3746_v34, %v9016_v43  ;;  %5532 = vtanh.f32 %v4083_v53 }
 0x525   :  { %v3682_v16 = vpack.c.bf16 %v3590_v45, %v3541_v59  ;;  %v3767_v45 = vperm.slane %v3762_v13, %v9016_v43  ;;  %v4085_v30 = vunpack.c.h.bf16 %v4031_v22 }
 0x526   :  { %v8131_v23 = vunpack.c.l.bf16 %v3751_v42 }
 0x527   :  { %v3446_v21 = vpop.f32.mrf.mxu3  ;;  %v3865_v36 = vunpack.c.l.bf16 %v3682_v16  ;;  %v3866_v32 = vunpack.c.h.bf16 %v3682_v16  ;;  %v8150_v47 = vunpack.c.l.bf16 %v3767_v45  ;;  %v3778_v45 = vpop.permute.xlu1 %3777 }
 0x528   :  { %v8125_v6 = vpack.c.bf16 %v3495_v62, %v3446_v21  ;;  %9019 = vst [vmem:[#allocation36_spill] sm:$0xff] %v8131_v23  ;;  %v3959_v48 = vadd.f32 %v8131_v23, %v3863_v9  ;;  %v3960_v17 = vadd.f32 %v8131_v23, %v3864_v49  ;;  %v4084_v62 = vunpack.c.l.bf16 %v4031_v22  ;;  %v8146_v21 = vpop.eup %5522 }
 0x529   :  { %v3961_v20 = vadd.f32 %v8131_v23, %v3865_v36  ;;  %v3962_v28 = vadd.f32 %v8131_v23, %v3866_v32  ;;  %9021 = vst [vmem:[#allocation34_spill] sm:$0xff] %v8150_v47  ;;  %v3735_v49 = vperm.slane %v3730_v11, %v9016_v43 }
 0x52a   :  { %v3497_v46 = vpop.f32.mrf.mxu0  ;;  %v3868_v59 = vunpack.c.l.bf16 %v8125_v6  ;;  %v3869_v19 = vunpack.c.h.bf16 %v8125_v6  ;;  %v4033_v18 = vpack.c.bf16 %v3960_v17, %v3959_v48  ;;  %v8152_v6 = vpop.eup %5524  ;;  %5534 = vtanh.f32 %v4084_v62 }
 0x52b   :  { %v4034_v4 = vpack.c.bf16 %v3962_v28, %v3961_v20  ;;  %v8154_v54 = vpop.eup %5526  ;;  %5536 = vtanh.f32 %v4085_v30  ;;  %v8171_v48 = vunpack.c.l.bf16 %v3735_v49 }
 0x52c   :  { %v3593_v2 = vpop.f32.mrf.mxu2  ;;  %v3546_v8 = vpop.f32.mrf.mxu1  ;;  %v4087_v31 = vunpack.c.l.bf16 %v4033_v18  ;;  %v4088_v34 = vunpack.c.h.bf16 %v4033_v18  ;;  %v3964_v9 = vadd.f32 %v8148_v50, %v3868_v59  ;;  %v3965_v32 = vadd.f32 %v8148_v50, %v3869_v19 }
 0x52d   :  { %v3685_v1 = vpack.c.bf16 %v3593_v2, %v3544_v55  ;;  %9022 = vst [vmem:[#allocation29_spill] sm:$0xff] %v8171_v48  ;;  %v3950_v29 = vadd.f32 %v8171_v48, %v3854_v52 }
 0x52e   :  { %5538 = vtanh.f32 %v4087_v31  ;;  %v4036_v44 = vpack.c.bf16 %v3965_v32, %v3964_v9  ;;  %v3783_v31 = vperm.slane %v3778_v45, %v9016_v43 }
 0x52f   :  { %v3448_v38 = vpop.f32.mrf.mxu3  ;;  %v3870_v33 = vunpack.c.l.bf16 %v3685_v1  ;;  %v3871_v16 = vunpack.c.h.bf16 %v3685_v1  ;;  %5540 = vtanh.f32 %v4088_v34 }
 0x530   :  { %v3687_v14 = vpack.c.bf16 %v3497_v46, %v3448_v38  ;;  %v8158_v46 = vpop.eup %5528  ;;  %v3855_v38 = vunpack.c.l.bf16 %v8114_v12  ;;  %v4092_v59 = vunpack.c.l.bf16 %v4036_v44  ;;  %v4093_v62 = vunpack.c.h.bf16 %v4036_v44 }
 0x531   :  { %v3966_v63 = vadd.f32 %v8148_v50, %v3870_v33  ;;  %v3967_v51 = vadd.f32 %v8148_v50, %v3871_v16  ;;  %v8167_v56 = vpop.eup %5530  ;;  %v3856_v33 = vunpack.c.h.bf16 %v8114_v12 }
 0x532   :  { %v3500_v24 = vpop.f32.mrf.mxu0  ;;  %v3873_v55 = vunpack.c.l.bf16 %v3687_v14  ;;  %v3874_v35 = vunpack.c.h.bf16 %v3687_v14  ;;  %v8173_v17 = vpop.eup %5532  ;;  %v3951_v12 = vadd.f32 %v8171_v48, %v3855_v38 }
 0x533   :  { %v4037_v20 = vpack.c.bf16 %v3967_v51, %v3966_v63  ;;  %v8176_v28 = vpop.eup %5534  ;;  %v3952_v49 = vadd.f32 %v8171_v48, %v3856_v33  ;;  %v3770_v51 = vpop.permute.xlu0 %3769 }
 0x534   :  { %v3595_v25 = vpop.f32.mrf.mxu2  ;;  %3646 = vmatmul.bf16.gmra.mxu3 %v7983_v27  ;;  %v3549_v41 = vpop.f32.mrf.mxu1  ;;  %v4089_v27 = vunpack.c.l.bf16 %v4034_v4  ;;  %v3969_v7 = vadd.f32 %v8150_v47, %v3873_v55  ;;  %v3970_v60 = vadd.f32 %v8150_v47, %v3874_v35  ;;  %v3775_v44 = vperm.slane %v3770_v51, %v9016_v43 }
 0x535   :  { %v3688_v61 = vpack.c.bf16 %v3595_v25, %v3546_v8  ;;  %v4090_v8 = vunpack.c.h.bf16 %v4034_v4  ;;  %v8180_v0 = vpop.eup %5536  ;;  %v3949_v4 = vadd.f32 %v8171_v48, %v3853_v10  ;;  %v4094_v35 = vunpack.c.l.bf16 %v4037_v20 }
 0x536   :  { %5542 = vtanh.f32 %v4089_v27  ;;  %v4039_v39 = vpack.c.bf16 %v3970_v60, %v3969_v7  ;;  %v8189_v16 = vpop.eup %5538  ;;  %v4095_v25 = vunpack.c.h.bf16 %v4037_v20  ;;  %v4028_v20 = vpack.c.bf16 %v3952_v49, %v3951_v12 }
 0x537   :  { %v3451_v42 = vpop.f32.mrf.mxu3  ;;  %v3875_v36 = vunpack.c.l.bf16 %v3688_v61  ;;  %v3876_v2 = vunpack.c.h.bf16 %v3688_v61  ;;  %5544 = vtanh.f32 %v4090_v8  ;;  %v8192_v30 = vpop.eup %5540  ;;  %v4027_v63 = vpack.c.bf16 %v3950_v29, %v3949_v4 }
 0x538   :  { %v8165_v26 = vpack.c.bf16 %v3500_v24, %v3451_v42  ;;  %5546 = vtanh.f32 %v4092_v59  ;;  %v4098_v9 = vunpack.c.h.bf16 %v4039_v39 }
 0x539   :  { %v3971_v19 = vadd.f32 %v8150_v47, %v3875_v36  ;;  %v3972_v58 = vadd.f32 %v8150_v47, %v3876_v2  ;;  %5548 = vtanh.f32 %v4093_v62  ;;  %v3786_v2 = vpop.permute.xlu2 %3785  ;;  %v4078_v45 = vunpack.c.h.bf16 %v4027_v63 }
 0x53a   :  { %v3502_v1 = vpop.f32.mrf.mxu0  ;;  %v3878_v24 = vunpack.c.l.bf16 %v8165_v26  ;;  %v3879_v53 = vunpack.c.h.bf16 %v8165_v26  ;;  %5550 = vtanh.f32 %v4094_v35  ;;  %v3791_v8 = vperm.slane %v3786_v2, %v9016_v43 }
 0x53b   :  { %v4040_v61 = vpack.c.bf16 %v3972_v58, %v3971_v19  ;;  %5552 = vtanh.f32 %v4095_v25  ;;  %v3802_v25 = vpop.permute.xlu1 %3801 }
 0x53c   :  { %v3598_v22 = vpop.f32.mrf.mxu2  ;;  %v3551_v14 = vpop.f32.mrf.mxu1  ;;  %v8213_v4 = vunpack.c.l.bf16 %v3791_v8 }
 0x53d   :  { %v8185_v18 = vpack.c.bf16 %v3598_v22, %v3549_v41  ;;  %v4097_v41 = vunpack.c.l.bf16 %v4039_v39  ;;  %v8195_v34 = vpop.eup %5542  ;;  %v4099_v38 = vunpack.c.l.bf16 %v4040_v61  ;;  %v4100_v22 = vunpack.c.h.bf16 %v4040_v61 }
 0x53e   :  { %v8200_v7 = vpop.eup %5544  ;;  %9025 = vst [vmem:[#allocation33_spill] sm:$0xff] %v8213_v4 }
 0x53f   :  { %v3453_v13 = vpop.f32.mrf.mxu3  ;;  %v3880_v36 = vunpack.c.l.bf16 %v8185_v18  ;;  %v3881_v32 = vunpack.c.h.bf16 %v8185_v18  ;;  %5554 = vtanh.f32 %v4097_v41  ;;  %v8209_v58 = vpop.eup %5546  ;;  %v4077_v18 = vunpack.c.l.bf16 %v4027_v63 }
 0x540   :  { %v3693_v55 = vpack.c.bf16 %v3502_v1, %v3453_v13  ;;  %v8203_v1 = vunpack.c.l.bf16 %v3783_v31  ;;  %v8211_v13 = vunpack.c.l.bf16 %v3775_v44  ;;  %5556 = vtanh.f32 %v4098_v9  ;;  %v8215_v29 = vpop.eup %5548 }
 0x541   :  { %5558 = vtanh.f32 %v4099_v38  ;;  %v8219_v12 = vpop.eup %5550 }
 0x542   :  { %v3883_v11 = vunpack.c.l.bf16 %v3693_v55  ;;  %v3884_v42 = vunpack.c.h.bf16 %v3693_v55  ;;  %v3505_v27 = vpop.f32.mrf.mxu0  ;;  %9023 = vst [vmem:[#allocation42_spill] sm:$0xff] %v8203_v1  ;;  %5560 = vtanh.f32 %v4100_v22  ;;  %v3974_v9 = vadd.f32 %v8211_v13, %v3878_v24  ;;  %v8235_v24 = vpop.permute.xlu2 %3809 }
 0x543   :  { %9024 = vst [vmem:[#allocation40_spill] sm:$0xff] %v8211_v13  ;;  %5562 = vtanh.f32 %v4077_v18  ;;  %v3975_v49 = vadd.f32 %v8211_v13, %v3879_v53  ;;  %v3976_v38 = vadd.f32 %v8211_v13, %v3880_v36  ;;  %v3977_v22 = vadd.f32 %v8211_v13, %v3881_v32 }
 0x544   :  { %v3600_v60 = vpop.f32.mrf.mxu2  ;;  %3651 = vmatmul.bf16.gmra.mxu3 %v7995_v15  ;;  %v3554_v52 = vpop.f32.mrf.mxu1  ;;  %v3979_v59 = vadd.f32 %v8203_v1, %v3883_v11  ;;  %v3980_v19 = vadd.f32 %v8203_v1, %v3884_v42  ;;  %v4079_v11 = vunpack.c.l.bf16 %v4028_v20  ;;  %5564 = vtanh.f32 %v4078_v45 }
 0x545   :  { %v3694_v10 = vpack.c.bf16 %v3600_v60, %v3551_v14  ;;  %v8221_v42 = vpop.eup %5552 }
 0x546   :  { %v4045_v14 = vpack.c.bf16 %v3980_v19, %v3979_v59  ;;  %v8229_v63 = vpop.eup %5554  ;;  %5566 = vtanh.f32 %v4079_v11  ;;  %v3807_v59 = vperm.slane %v3802_v25, %v9016_v43 }
 0x547   :  { %v3885_v15 = vunpack.c.l.bf16 %v3694_v10  ;;  %v3886_v39 = vunpack.c.h.bf16 %v3694_v10  ;;  %v3456_v33 = vpop.f32.mrf.mxu3  ;;  %v8237_v26 = vpop.eup %5556 }
 0x548   :  { %v3696_v62 = vpack.c.bf16 %v3505_v27, %v3456_v33  ;;  %v4080_v27 = vunpack.c.h.bf16 %v4028_v20  ;;  %v4107_v60 = vunpack.c.l.bf16 %v4045_v14  ;;  %v8240_v19 = vpop.eup %5558 }
 0x549   :  { %v3981_v55 = vadd.f32 %v8203_v1, %v3885_v15  ;;  %v3982_v35 = vadd.f32 %v8203_v1, %v3886_v39  ;;  %v8242_v18 = vpop.eup %5560 }
 0x54a   :  { %v3888_v61 = vunpack.c.l.bf16 %v3696_v62  ;;  %v3889_v41 = vunpack.c.h.bf16 %v3696_v62  ;;  %v3507_v31 = vpop.f32.mrf.mxu0  ;;  %5568 = vtanh.f32 %v4080_v27  ;;  %v4042_v62 = vpack.c.bf16 %v3975_v49, %v3974_v9  ;;  %v8244_v45 = vpop.eup %5562 }
 0x54b   :  { %v4046_v51 = vpack.c.bf16 %v3982_v35, %v3981_v55  ;;  %5570 = vtanh.f32 %v4107_v60  ;;  %v8253_v60 = vpop.permute.xlu1 %3825 }
 0x54c   :  { %v3603_v2 = vpop.f32.mrf.mxu2  ;;  %v3984_v8 = vadd.f32 %v8213_v4, %v3888_v61  ;;  %v3985_v44 = vadd.f32 %v8213_v4, %v3889_v41  ;;  %v3556_v53 = vpop.f32.mrf.mxu1  ;;  %v8248_v61 = vpack.c.bf16 %v3977_v22, %v3976_v38  ;;  %v4102_v38 = vunpack.c.l.bf16 %v4042_v62 }
 0x54d   :  { %v3697_v10 = vpack.c.bf16 %v3603_v2, %v3554_v52  ;;  %v4108_v52 = vunpack.c.h.bf16 %v4045_v14  ;;  %v4109_v32 = vunpack.c.l.bf16 %v4046_v51  ;;  %v4110_v55 = vunpack.c.h.bf16 %v4046_v51  ;;  %v3794_v41 = vpop.permute.xlu0 %3793 }
 0x54e   :  { %v4048_v20 = vpack.c.bf16 %v3985_v44, %v3984_v8  ;;  %v3799_v8 = vperm.slane %v3794_v41, %v9016_v43  ;;  %v8257_v51 = vpack.c.bf16 %v8152_v6, %v8146_v21  ;;  %v8262_v22 = vunpack.c.l.bf16 %v3807_v59 }
 0x54f   :  { %v3890_v15 = vunpack.c.l.bf16 %v3697_v10  ;;  %v3891_v39 = vunpack.c.h.bf16 %v3697_v10  ;;  %v3458_v33 = vpop.f32.mrf.mxu3  ;;  %5572 = vtanh.f32 %v4108_v52  ;;  %v3815_v21 = vperm.slane %v8235_v24, %v9016_v43 }
 0x550   :  { %v3699_v36 = vpack.c.bf16 %v3507_v31, %v3458_v33  ;;  %v4112_v27 = vunpack.c.l.bf16 %v4048_v20  ;;  %v8251_v31 = vpop.eup %5564  ;;  %v4113_v49 = vunpack.c.h.bf16 %v4048_v20  ;;  %5574 = vtanh.f32 %v4109_v32  ;;  %9026 = vst [vmem:[#allocation47_spill] sm:$0xff] %v8262_v22 }
 0x551   :  { %v3986_v35 = vadd.f32 %v8213_v4, %v3890_v15  ;;  %v3987_v25 = vadd.f32 %v8213_v4, %v3891_v39  ;;  %v8259_v44 = vpop.eup %5566  ;;  %v8264_v15 = vunpack.c.l.bf16 %v3799_v8  ;;  %5576 = vtanh.f32 %v4110_v55 }
 0x552   :  { %v3893_v11 = vunpack.c.l.bf16 %v3699_v36  ;;  %v3894_v2 = vunpack.c.h.bf16 %v3699_v36  ;;  %v3510_v14 = vpop.f32.mrf.mxu0  ;;  %v8266_v39 = vpop.eup %5568  ;;  %v4103_v33 = vunpack.c.h.bf16 %v4042_v62  ;;  %5578 = vtanh.f32 %v4112_v27 }
 0x553   :  { %v4049_v9 = vpack.c.bf16 %v3987_v25, %v3986_v35  ;;  %9027 = vst [vmem:[#allocation32_spill] sm:$0xff] %v8264_v15  ;;  %v8270_v6 = vpop.eup %5570  ;;  %v4104_v52 = vunpack.c.l.bf16 %v8248_v61  ;;  %5580 = vtanh.f32 %v4113_v49  ;;  %v4105_v27 = vunpack.c.h.bf16 %v8248_v61 }
 0x554   :  { %v3605_v10 = vpop.f32.mrf.mxu2  ;;  %3656 = vmatmul.bf16.gmra.mxu3 %v8017_v57  ;;  %v3989_v57 = vadd.f32 %v8264_v15, %v3893_v11  ;;  %v3990_v59 = vadd.f32 %v8264_v15, %v3894_v2  ;;  %5582 = vtanh.f32 %v4102_v38  ;;  %v3559_v24 = vpop.f32.mrf.mxu1  ;;  %v8288_v38 = vunpack.c.l.bf16 %v3815_v21 }
 0x555   :  { %v3700_v20 = vpack.c.bf16 %v3605_v10, %v3556_v53  ;;  %v4114_v35 = vunpack.c.l.bf16 %v4049_v9  ;;  %v8275_v53 = vpop.permute.xlu2 %3833  ;;  %v4115_v62 = vunpack.c.h.bf16 %v4049_v9  ;;  %v8277_v8 = vpop.eup %5572  ;;  %5584 = vtanh.f32 %v4103_v33 }
 0x556   :  { %v4051_v41 = vpack.c.bf16 %v3990_v59, %v3989_v57  ;;  %v8282_v10 = vpop.eup %5574  ;;  %5586 = vtanh.f32 %v4104_v52  ;;  %9028 = vst [vmem:[#allocation11_spill] sm:$0xff] %v8288_v38  ;;  %v8290_v33 = vpop.permute.xlu0 %3817 }
 0x557   :  { %v3895_v36 = vunpack.c.l.bf16 %v3700_v20  ;;  %v3896_v32 = vunpack.c.h.bf16 %v3700_v20  ;;  %v3461_v25 = vpop.f32.mrf.mxu3  ;;  %v8286_v9 = vpop.eup %5576  ;;  %5588 = vtanh.f32 %v4114_v35 }
 0x558   :  { %v3702_v55 = vpack.c.bf16 %v3510_v14, %v3461_v25  ;;  %v4233_v14 = vpack.c.bf16 %v8158_v46, %v8154_v54  ;;  %v4117_v61 = vunpack.c.l.bf16 %v4051_v41  ;;  %v8292_v57 = vpop.eup %5578  ;;  %5590 = vtanh.f32 %v4115_v62  ;;  %v8301_v35 = vpop.permute.xlu1 %4361 }
 0x559   :  { %v3991_v11 = vadd.f32 %v8264_v15, %v3895_v36  ;;  %v3992_v2 = vadd.f32 %v8264_v15, %v3896_v32  ;;  %v4280_v32 = vunpack.c.l.bf16 %v8257_v51  ;;  %v8299_v54 = vpop.eup %5580  ;;  %5592 = vtanh.f32 %v4105_v27  ;;  %9030 = vst [vmem:[#allocation25_spill] sm:$0xff] %v8301_v35 }
 0x55a   :  { %v3898_v49 = vunpack.c.l.bf16 %v3702_v55  ;;  %v3899_v20 = vunpack.c.h.bf16 %v3702_v55  ;;  %v3512_v4 = vpop.f32.mrf.mxu0  ;;  %9029 = vst [vmem:[#allocation12_spill] sm:$0xff] %v8299_v54  ;;  %v4118_v21 = vunpack.c.h.bf16 %v4051_v41  ;;  %v4281_v25 = vunpack.c.h.bf16 %v8257_v51  ;;  %v8304_v55 = vpop.eup %5582 }
 0x55b   :  { %v8294_v36 = vpack.c.bf16 %v3992_v2, %v3991_v11  ;;  %v4282_v2 = vunpack.c.l.bf16 %v4233_v14  ;;  %v4283_v15 = vunpack.c.h.bf16 %v4233_v14  ;;  %v8308_v52 = vpop.eup %5584  ;;  %5594 = vtanh.f32 %v4117_v61 }
 0x55c   :  { %v3608_v59 = vpop.f32.mrf.mxu2  ;;  %v3994_v62 = vadd.f32 %v8262_v22, %v3898_v49  ;;  %v3995_v11 = vadd.f32 %v8262_v22, %v3899_v20  ;;  %v8312_v41 = vpop.eup %5586  ;;  %v4424_v20 = vmul.f32 %v8301_v35, %v4280_v32  ;;  %5596 = vtanh.f32 %v4118_v21 }
 0x55d   :  { %v3703_v46 = vpack.c.bf16 %v3608_v59, %v3559_v24  ;;  %v4235_v24 = vpack.c.bf16 %v8251_v31, %v8244_v45  ;;  %v4119_v27 = vunpack.c.l.bf16 %v8294_v36  ;;  %v4120_v49 = vunpack.c.h.bf16 %v8294_v36  ;;  %v8317_v59 = vpop.eup %5588  ;;  %v3561_v36 = vpop.f32.mrf.mxu1 }
 0x55e   :  { %9031 = vst [vmem:[#allocation24_spill] sm:$0xff] %v8317_v59  ;;  %v4236_v61 = vpack.c.bf16 %v8266_v39, %v8259_v44  ;;  %v8324_v31 = vpop.eup %5590  ;;  %v4054_v40 = vpack.c.bf16 %v3995_v11, %v3994_v62  ;;  %v4425_v44 = vmul.f32 %v8301_v35, %v4281_v25  ;;  %v4427_v39 = vmul.f32 %v8301_v35, %v4283_v15 }
 0x55f   :  { %v3900_v1 = vunpack.c.l.bf16 %v3703_v46  ;;  %v3901_v13 = vunpack.c.h.bf16 %v3703_v46  ;;  %v3463_v47 = vpop.f32.mrf.mxu3  ;;  %v8320_v46 = vpop.permute.xlu2 %4365  ;;  %v4285_v45 = vunpack.c.l.bf16 %v4235_v24  ;;  %9033 = vst [vmem:[#allocation26_spill] sm:$0xff] %v8324_v31  ;;  %v4286_v23 = vunpack.c.h.bf16 %v4235_v24 }
 0x560   :  { %v3705_v51 = vpack.c.bf16 %v3512_v4, %v3463_v47  ;;  %9032 = vst [vmem:[#allocation21_spill] sm:$0xff] %v8320_v46  ;;  %v8327_v32 = vpop.eup %5592  ;;  %v4287_v21 = vunpack.c.l.bf16 %v4236_v61  ;;  %v4288_v37 = vunpack.c.h.bf16 %v4236_v61  ;;  %5598 = vtanh.f32 %v4119_v27 }
 0x561   :  { %v3996_v14 = vadd.f32 %v8262_v22, %v3900_v1  ;;  %v3997_v47 = vadd.f32 %v8262_v22, %v3901_v13  ;;  %v4426_v1 = vmul.f32 %v8301_v35, %v4282_v2  ;;  %v4429_v13 = vmul.f32 %v8320_v46, %v4285_v45  ;;  %v8335_v24 = vpop.eup %5594 }
 0x562   :  { %v3903_v4 = vunpack.c.l.bf16 %v3705_v51  ;;  %v3904_v50 = vunpack.c.h.bf16 %v3705_v51  ;;  %v3515_v48 = vpop.f32.mrf.mxu0  ;;  %v4430_v51 = vmul.f32 %v8320_v46, %v4286_v23  ;;  %9034 = vst [vmem:[#allocation17_spill] sm:$0xff] %v8335_v24  ;;  %v4431_v61 = vmul.f32 %v8320_v46, %v4287_v21  ;;  %v8345_v15 = vpop.eup %5596 }
 0x563   :  { %v4055_v22 = vpack.c.bf16 %v3997_v47, %v3996_v14  ;;  %v8341_v31 = vadd.f32 %v4429_v13, %v4424_v20  ;;  %v4122_v45 = vunpack.c.l.bf16 %v4054_v40  ;;  %5600 = vtanh.f32 %v4120_v49 }
 0x564   :  { %v3610_v59 = vpop.f32.mrf.mxu2  ;;  %3661 = vmatmul.bf16.gmra.mxu3 %v8064_v5  ;;  %v3999_v62 = vadd.f32 %v8288_v38, %v3903_v4  ;;  %v4000_v11 = vadd.f32 %v8288_v38, %v3904_v50  ;;  %v4432_v5 = vmul.f32 %v8320_v46, %v4288_v37  ;;  %v8343_v25 = vadd.f32 %v4430_v51, %v4425_v44 }
 0x565   :  { %v3706_v2 = vpack.c.bf16 %v3610_v59, %v3561_v36  ;;  %v8347_v54 = vadd.f32 %v4431_v61, %v4426_v1  ;;  %v4123_v4 = vunpack.c.h.bf16 %v4054_v40  ;;  %v9035_v59 = vperm.slane %v8290_v33, %v9016_v43  ;;  %v3564_v13 = vpop.f32.mrf.mxu1 }
 0x566   :  { %v4057_v37 = vpack.c.bf16 %v4000_v11, %v3999_v62  ;;  %v8356_v36 = vadd.f32 %v4432_v5, %v4427_v39  ;;  %v4124_v21 = vunpack.c.l.bf16 %v4055_v22  ;;  %5602 = vtanh.f32 %v4122_v45  ;;  %v8364_v11 = vpop.eup %5598  ;;  %v8366_v45 = vpop.permute.xlu0 %3841 }
 0x567   :  { %v3905_v23 = vunpack.c.l.bf16 %v3706_v2  ;;  %v3906_v35 = vunpack.c.h.bf16 %v3706_v2  ;;  %v3466_v24 = vpop.f32.mrf.mxu3  ;;  %v8352_v14 = vunpack.c.l.bf16 %v9035_v59  ;;  %v3831_v40 = vperm.slane %v8253_v60, %v9016_v43 }
 0x568   :  { %v3708_v50 = vpack.c.bf16 %v3515_v48, %v3466_v24  ;;  %v4125_v48 = vunpack.c.h.bf16 %v4055_v22  ;;  %5604 = vtanh.f32 %v4123_v4  ;;  %v4127_v24 = vunpack.c.l.bf16 %v4057_v37 }
 0x569   :  { %9036 = vst [vmem:[#allocation22_spill] sm:$0xff] %v8352_v14  ;;  %v4001_v20 = vadd.f32 %v8288_v38, %v3905_v23  ;;  %v4002_v47 = vadd.f32 %v8288_v38, %v3906_v35  ;;  %v4241_v49 = vpack.c.bf16 %v8192_v30, %v8189_v16  ;;  %5606 = vtanh.f32 %v4124_v21  ;;  %v8370_v4 = vpop.eup %5600 }
 0x56a   :  { %v3908_v44 = vunpack.c.l.bf16 %v3708_v50  ;;  %v3909_v1 = vunpack.c.h.bf16 %v3708_v50  ;;  %v3517_v62 = vpop.f32.mrf.mxu0  ;;  %v4128_v2 = vunpack.c.h.bf16 %v4057_v37  ;;  %v4242_v23 = vpack.c.bf16 %v8200_v7, %v8195_v34 }
 0x56b   :  { %v4058_v35 = vpack.c.bf16 %v4002_v47, %v4001_v20  ;;  %5608 = vtanh.f32 %v4125_v48  ;;  %v3839_v50 = vperm.slane %v8275_v53, %v9016_v43  ;;  %v8376_v37 = vunpack.c.l.bf16 %v3831_v40  ;;  %v8382_v48 = vpop.permute.xlu1 %4373 }
 0x56c   :  { %v4004_v33 = vadd.f32 %v8352_v14, %v3908_v44  ;;  %v4005_v27 = vadd.f32 %v8352_v14, %v3909_v1  ;;  %v3613_v51 = vpop.f32.mrf.mxu2  ;;  %v8374_v30 = vpop.eup %5602  ;;  %5610 = vtanh.f32 %v4127_v24  ;;  %v4295_v20 = vunpack.c.l.bf16 %v4241_v49  ;;  %9037 = vst [vmem:[#allocation23_spill] sm:$0xff] %v8382_v48 }
 0x56d   :  { %v3709_v39 = vpack.c.bf16 %v3613_v51, %v3564_v13  ;;  %v4129_v59 = vunpack.c.l.bf16 %v4058_v35  ;;  %v4130_v21 = vunpack.c.h.bf16 %v4058_v35  ;;  %v4296_v7 = vunpack.c.h.bf16 %v4241_v49 }
 0x56e   :  { %v4060_v60 = vpack.c.bf16 %v4005_v27, %v4004_v33  ;;  %v8378_v47 = vpop.eup %5604  ;;  %5612 = vtanh.f32 %v4128_v2  ;;  %v4297_v53 = vunpack.c.l.bf16 %v4242_v23  ;;  %v4244_v33 = vpack.c.bf16 %v8215_v29, %v8209_v58 }
 0x56f   :  { %v3910_v22 = vunpack.c.l.bf16 %v3709_v39  ;;  %v3911_v61 = vunpack.c.h.bf16 %v3709_v39  ;;  %v3468_v5 = vpop.f32.mrf.mxu3  ;;  %v8386_v27 = vpop.eup %5606  ;;  %v4298_v24 = vunpack.c.h.bf16 %v4242_v23  ;;  %5614 = vtanh.f32 %v4129_v59 }
 0x570   :  { %v3711_v16 = vpack.c.bf16 %v3517_v62, %v3468_v5  ;;  %v4132_v1 = vunpack.c.l.bf16 %v4060_v60  ;;  %v4133_v40 = vunpack.c.h.bf16 %v4060_v60  ;;  %v8389_v35 = vunpack.c.l.bf16 %v3839_v50 }
 0x571   :  { %v4006_v44 = vadd.f32 %v8352_v14, %v3910_v22  ;;  %v4007_v34 = vadd.f32 %v8352_v14, %v3911_v61  ;;  %v4245_v62 = vpack.c.bf16 %v8221_v42, %v8219_v12  ;;  %v8395_v49 = vpop.eup %5608  ;;  %5616 = vtanh.f32 %v4130_v21 }
 0x572   :  { %v3913_v13 = vunpack.c.l.bf16 %v3711_v16  ;;  %v3914_v51 = vunpack.c.h.bf16 %v3711_v16  ;;  %v4439_v29 = vmul.f32 %v8382_v48, %v4295_v20  ;;  %v4440_v2 = vmul.f32 %v8382_v48, %v4296_v7  ;;  %v8399_v60 = vpop.eup %5610  ;;  %v8407_v16 = vpop.permute.xlu2 %4377 }
 0x573   :  { %v4061_v58 = vpack.c.bf16 %v4007_v34, %v4006_v44  ;;  %5618 = vtanh.f32 %v4132_v1  ;;  %v4441_v61 = vmul.f32 %v8382_v48, %v4297_v53  ;;  %v4300_v5 = vunpack.c.l.bf16 %v4244_v33  ;;  %9038 = vst [vmem:[#allocation20_spill] sm:$0xff] %v8407_v16  ;;  %v3520_v34 = vpop.f32.mrf.mxu0  ;;  %v8411_v7 = vpop.permute.xlu0 %4369 }
 0x574   :  { %3666 = vmatmul.bf16.gmra.mxu3 %v8092_v3  ;;  %v3566_v3 = vpop.f32.mrf.mxu1  ;;  %v3615_v22 = vpop.f32.mrf.mxu2  ;;  %v4238_v23 = vpack.c.bf16 %v8173_v17, %v8167_v56  ;;  %5620 = vtanh.f32 %v4133_v40  ;;  %v4009_v12 = vadd.f32 %v8376_v37, %v3913_v13  ;;  %v4010_v42 = vadd.f32 %v8376_v37, %v3914_v51 }
 0x575   :  { %v4442_v50 = vmul.f32 %v8382_v48, %v4298_v24  ;;  %v8409_v20 = vpop.eup %5612  ;;  %v4301_v21 = vunpack.c.h.bf16 %v4244_v33  ;;  %v4302_v44 = vunpack.c.l.bf16 %v4245_v62  ;;  %v4239_v56 = vpack.c.bf16 %v8180_v0, %v8176_v28 }
 0x576   :  { %9039 = vst [vmem:[#allocation18_spill] sm:$0xff] %v8409_v20  ;;  %v4290_v17 = vunpack.c.l.bf16 %v4238_v23  ;;  %v4134_v1 = vunpack.c.l.bf16 %v4061_v58  ;;  %v4135_v53 = vunpack.c.h.bf16 %v4061_v58  ;;  %v4303_v40 = vunpack.c.h.bf16 %v4245_v62  ;;  %v8415_v51 = vpop.eup %5614 }
 0x577   :  { %v3471_v59 = vpop.f32.mrf.mxu3  ;;  %v4291_v13 = vunpack.c.h.bf16 %v4238_v23  ;;  %v3712_v24 = vpack.c.bf16 %v3615_v22, %v3566_v3  ;;  %v4444_v39 = vmul.f32 %v8407_v16, %v4300_v5  ;;  %v4292_v14 = vunpack.c.l.bf16 %v4239_v56  ;;  %v8418_v33 = vpop.eup %5616 }
 0x578   :  { %v4293_v38 = vunpack.c.h.bf16 %v4239_v56  ;;  %v4063_v48 = vpack.c.bf16 %v4010_v42, %v4009_v12  ;;  %v3714_v46 = vpack.c.bf16 %v3520_v34, %v3471_v59  ;;  %v4434_v20 = vmul.f32 %v8411_v7, %v4290_v17  ;;  %v8437_v17 = vpop.permute.xlu1 %4381 }
 0x579   :  { %v4435_v28 = vmul.f32 %v8411_v7, %v4291_v13  ;;  %v8422_v0 = vpop.eup %5618  ;;  %v4445_v62 = vmul.f32 %v8407_v16, %v4301_v21  ;;  %v4446_v58 = vmul.f32 %v8407_v16, %v4302_v44  ;;  %v4436_v3 = vmul.f32 %v8411_v7, %v4292_v14 }
 0x57a   :  { %v4437_v22 = vmul.f32 %v8411_v7, %v4293_v38  ;;  %v8428_v5 = vpop.eup %5620  ;;  %5622 = vtanh.f32 %v4134_v1  ;;  %v4447_v23 = vmul.f32 %v8407_v16, %v4303_v40  ;;  %v4505_v12 = vadd.f32 %v8341_v31, %v4434_v20 }
 0x57b   :  { %v4526_v42 = vadd.f32 %v8343_v25, %v4435_v28  ;;  %v3915_v59 = vunpack.c.l.bf16 %v3712_v24  ;;  %v4547_v34 = vadd.f32 %v8347_v54, %v4436_v3  ;;  %v4247_v44 = vpack.c.bf16 %v8237_v26, %v8229_v63 }
 0x57c   :  { %v4568_v21 = vadd.f32 %v8356_v36, %v4437_v22  ;;  %5624 = vtanh.f32 %v4135_v53  ;;  %v3916_v14 = vunpack.c.h.bf16 %v3712_v24  ;;  %v3918_v38 = vunpack.c.l.bf16 %v3714_v46  ;;  %v3569_v20 = vpop.f32.mrf.mxu1  ;;  %v3618_v25 = vpop.f32.mrf.mxu2 }
 0x57d   :  { %v4506_v56 = vadd.f32 %v4505_v12, %v4439_v29  ;;  %v4137_v1 = vunpack.c.l.bf16 %v4063_v48  ;;  %v4527_v40 = vadd.f32 %v4526_v42, %v4440_v2  ;;  %v4548_v13 = vadd.f32 %v4547_v34, %v4441_v61  ;;  %v3522_v22 = vpop.f32.mrf.mxu0 }
 0x57e   :  { %v4569_v31 = vadd.f32 %v4568_v21, %v4442_v50  ;;  %v3919_v28 = vunpack.c.h.bf16 %v3714_v46  ;;  %v3715_v16 = vpack.c.bf16 %v3618_v25, %v3569_v20  ;;  %v8441_v54 = vpack.c.bf16 %v8242_v18, %v8240_v19 }
 0x57f   :  { %v4305_v36 = vunpack.c.l.bf16 %v4247_v44  ;;  %v3473_v63 = vpop.f32.mrf.mxu3  ;;  %v4138_v26 = vunpack.c.h.bf16 %v4063_v48  ;;  %v4011_v53 = vadd.f32 %v8376_v37, %v3915_v59  ;;  %v4306_v29 = vunpack.c.h.bf16 %v4247_v44 }
 0x580   :  { %v4507_v24 = vadd.f32 %v4506_v56, %v4444_v39  ;;  %v8444_v3 = vpop.eup %5622  ;;  %v4012_v2 = vadd.f32 %v8376_v37, %v3916_v14  ;;  %v4014_v61 = vadd.f32 %v8389_v35, %v3918_v38  ;;  %v4307_v46 = vunpack.c.l.bf16 %v8441_v54 }
 0x581   :  { %v4449_v50 = vmul.f32 %v8437_v17, %v4305_v36  ;;  %v4450_v19 = vmul.f32 %v8437_v17, %v4306_v29  ;;  %v4528_v18 = vadd.f32 %v4527_v40, %v4445_v62  ;;  %v4549_v12 = vadd.f32 %v4548_v13, %v4446_v58 }
 0x582   :  { %v8451_v48 = vadd.f32 %v4569_v31, %v4447_v23  ;;  %v8453_v42 = vpop.eup %5624  ;;  %v4015_v39 = vadd.f32 %v8389_v35, %v3919_v28  ;;  %v3920_v59 = vunpack.c.l.bf16 %v3715_v16  ;;  %v3921_v34 = vunpack.c.h.bf16 %v3715_v16  ;;  %v8468_v16 = vpop.permute.xlu2 %4385 }
 0x583   :  { %v4508_v21 = vadd.f32 %v4507_v24, %v4449_v50  ;;  %v4529_v44 = vadd.f32 %v4528_v18, %v4450_v19  ;;  %v4250_v14 = vpack.c.bf16 %v8308_v52, %v8304_v55  ;;  %v8460_v38 = vpack.c.bf16 %v8327_v32, %v8312_v41  ;;  %v8477_v28 = vpop.permute.xlu0 %4389 }
 0x584   :  { %v3717_v56 = vpack.c.bf16 %v3522_v22, %v3473_v63  ;;  %5626 = vtanh.f32 %v4137_v1  ;;  %v9040_v62 = vperm.slane %v8366_v45, %v9016_v43  ;;  %v4064_v23 = vpack.c.bf16 %v4012_v2, %v4011_v53  ;;  %v3571_v36 = vpop.f32.mrf.mxu1  ;;  %v3620_v24 = vpop.f32.mrf.mxu2 }
 0x585   :  { %v4451_v40 = vmul.f32 %v8437_v17, %v4307_v46  ;;  %5628 = vtanh.f32 %v4138_v26  ;;  %v4310_v13 = vunpack.c.l.bf16 %v4250_v14  ;;  %v4311_v31 = vunpack.c.h.bf16 %v4250_v14 }
 0x586   :  { %v8465_v58 = vunpack.c.l.bf16 %v9040_v62  ;;  %v4312_v52 = vunpack.c.l.bf16 %v8460_v38  ;;  %v4066_v55 = vpack.c.bf16 %v4015_v39, %v4014_v61  ;;  %v4016_v41 = vadd.f32 %v8389_v35, %v3920_v59 }
 0x587   :  { %v4017_v32 = vadd.f32 %v8389_v35, %v3921_v34  ;;  %v4253_v43 = vpack.c.bf16 %v8277_v8, %v8270_v6  ;;  %v4454_v45 = vmul.f32 %v8468_v16, %v4310_v13  ;;  %v4455_v1 = vmul.f32 %v8468_v16, %v4311_v31  ;;  %v8484_v2 = vpop.f32.mrf.mxu3 }
 0x588   :  { %v3923_v20 = vunpack.c.l.bf16 %v3717_v56  ;;  %v3924_v25 = vunpack.c.h.bf16 %v3717_v56  ;;  %v4139_v63 = vunpack.c.l.bf16 %v4064_v23  ;;  %v4550_v26 = vadd.f32 %v4549_v12, %v4451_v40  ;;  %v9041_v56 = vld [vmem:[#allocation12_spill] sm:$0xff] }
 0x589   :  { %v4456_v53 = vmul.f32 %v8468_v16, %v4312_v52  ;;  %v8482_v29 = vpack.c.bf16 %v8286_v9, %v8282_v10  ;;  %v4140_v6 = vunpack.c.h.bf16 %v4064_v23  ;;  %v4509_v8 = vadd.f32 %v4508_v21, %v4454_v45 }
 0x58a   :  { %v4530_v61 = vadd.f32 %v4529_v44, %v4455_v1  ;;  %v4315_v46 = vunpack.c.l.bf16 %v4253_v43  ;;  %v8486_v50 = vpop.eup %5626  ;;  %v4142_v22 = vunpack.c.l.bf16 %v4066_v55  ;;  %v4067_v19 = vpack.c.bf16 %v4017_v32, %v4016_v41  ;;  %v9042_v41 = vld [vmem:[#allocation24_spill] sm:$0xff]  ;;  %v9043_v32 = vld [vmem:[#allocation26_spill] sm:$0xff] }
 0x58b   :  { %v4316_v18 = vunpack.c.h.bf16 %v4253_v43  ;;  %v4317_v12 = vunpack.c.l.bf16 %v8482_v29  ;;  %v8489_v39 = vpop.eup %5628  ;;  %v4019_v59 = vadd.f32 %v8465_v58, %v3923_v20  ;;  %v4020_v10 = vadd.f32 %v8465_v58, %v3924_v25  ;;  %v8502_v25 = vpop.permute.xlu1 %4393 }
 0x58c   :  { %v4459_v9 = vmul.f32 %v8477_v28, %v4315_v46  ;;  %v3718_v34 = vpack.c.bf16 %v3620_v24, %v3571_v36  ;;  %v4551_v14 = vadd.f32 %v4550_v26, %v4456_v53  ;;  %v4256_v62 = vpack.c.bf16 %v9041_v56, %v8292_v57  ;;  %v9044_v24 = vld [vmem:[#allocation17_spill] sm:$0xff] }
 0x58d   :  { %v4460_v21 = vmul.f32 %v8477_v28, %v4316_v18  ;;  %v4461_v44 = vmul.f32 %v8477_v28, %v4317_v12  ;;  %5630 = vtanh.f32 %v4139_v63  ;;  %v4143_v31 = vunpack.c.h.bf16 %v4066_v55 }
 0x58e   :  { %v4510_v23 = vadd.f32 %v4509_v8, %v4459_v9  ;;  %v3925_v40 = vunpack.c.l.bf16 %v3718_v34  ;;  %v3926_v13 = vunpack.c.h.bf16 %v3718_v34  ;;  %5632 = vtanh.f32 %v4140_v6 }
 0x58f   :  { %v4531_v52 = vadd.f32 %v4530_v61, %v4460_v21  ;;  %v8500_v43 = vpack.c.bf16 %v9043_v32, %v9042_v41  ;;  %5634 = vtanh.f32 %v4142_v22  ;;  %v4144_v45 = vunpack.c.l.bf16 %v4067_v19  ;;  %v8520_v12 = vpop.f32.mrf.mxu3  ;;  %v9045_v32 = vld [vmem:[#allocation44_spill] sm:$0xff] }
 0x590   :  { %v4145_v1 = vunpack.c.h.bf16 %v4067_v19  ;;  %v4069_v20 = vpack.c.bf16 %v4020_v10, %v4019_v59  ;;  %v4552_v36 = vadd.f32 %v4551_v14, %v4461_v44  ;;  %v4320_v26 = vunpack.c.l.bf16 %v4256_v62  ;;  %v8516_v19 = vpop.permute.xlu2 %4397 }
 0x591   :  { %v4321_v57 = vunpack.c.h.bf16 %v4256_v62  ;;  %v4322_v63 = vunpack.c.l.bf16 %v8500_v43  ;;  %v4021_v53 = vadd.f32 %v8465_v58, %v3925_v40  ;;  %v4022_v55 = vadd.f32 %v8465_v58, %v3926_v13 }
 0x592   :  { %v4259_v6 = vpack.c.bf16 %v8345_v15, %v9044_v24  ;;  %v8511_v8 = vpack.c.bf16 %v8370_v4, %v8364_v11  ;;  %v4464_v61 = vmul.f32 %v8502_v25, %v4320_v26  ;;  %v3674_v18 = vpack.c.bf16 %v8484_v2, %v8484_v2 }
 0x593   :  { %v4465_v46 = vmul.f32 %v8502_v25, %v4321_v57  ;;  %v4466_v22 = vmul.f32 %v8502_v25, %v4322_v63  ;;  %v8522_v59 = vpop.eup %5630  ;;  %5636 = vtanh.f32 %v4143_v31  ;;  %v4147_v15 = vunpack.c.l.bf16 %v4069_v20 }
 0x594   :  { %v4325_v10 = vunpack.c.l.bf16 %v4259_v6  ;;  %v4326_v11 = vunpack.c.h.bf16 %v4259_v6  ;;  %v8524_v4 = vpop.eup %5632  ;;  %5638 = vtanh.f32 %v4144_v45  ;;  %v4511_v9 = vadd.f32 %v4510_v23, %v4464_v61 }
 0x595   :  { %v4532_v34 = vadd.f32 %v4531_v52, %v4465_v46  ;;  %v8526_v14 = vpop.eup %5634  ;;  %5640 = vtanh.f32 %v4145_v1  ;;  %v4070_v21 = vpack.c.bf16 %v4022_v55, %v4021_v53  ;;  %v4327_v44 = vunpack.c.l.bf16 %v8511_v8  ;;  %v8535_v1 = vpop.permute.xlu0 %4401 }
 0x596   :  { %v4469_v2 = vmul.f32 %v8516_v19, %v4325_v10  ;;  %v4148_v56 = vunpack.c.h.bf16 %v4069_v20  ;;  %v4553_v62 = vadd.f32 %v4552_v36, %v4466_v22  ;;  %v4470_v40 = vmul.f32 %v8516_v19, %v4326_v11  ;;  %v9046_v20 = vld [vmem:[#allocation18_spill] sm:$0xff]  ;;  %v8546_v46 = vpop.permute.xlu1 %4405 }
 0x597   :  { %v3852_v13 = vunpack.c.l.bf16 %v3674_v18  ;;  %5642 = vtanh.f32 %v4147_v15  ;;  %v4471_v31 = vmul.f32 %v8516_v19, %v4327_v44  ;;  %v4262_v23 = vpack.c.bf16 %v8378_v47, %v8374_v30 }
 0x598   :  { %v4512_v41 = vadd.f32 %v4511_v9, %v4469_v2  ;;  %v4533_v52 = vadd.f32 %v4532_v34, %v4470_v40  ;;  %v8539_v26 = vpack.c.bf16 %v8395_v49, %v8386_v27  ;;  %v4265_v36 = vpack.c.bf16 %v9046_v20, %v8399_v60  ;;  %v8556_v9 = vpop.f32.mrf.mxu3 }
 0x599   :  { %v3948_v45 = vadd.f32 %v9045_v32, %v3852_v13  ;;  %v8543_v57 = vpop.eup %5636  ;;  %v4149_v63 = vunpack.c.l.bf16 %v4070_v21  ;;  %v4150_v53 = vunpack.c.h.bf16 %v4070_v21  ;;  %v4330_v55 = vunpack.c.l.bf16 %v4262_v23 }
 0x59a   :  { %v4331_v24 = vunpack.c.h.bf16 %v4262_v23  ;;  %v5639_v6 = vpop.eup %5638  ;;  %v4554_v30 = vadd.f32 %v4553_v62, %v4471_v31  ;;  %v4332_v61 = vunpack.c.l.bf16 %v8539_v26  ;;  %v8550_v27 = vpack.c.bf16 %v8418_v33, %v8415_v51  ;;  %v8563_v23 = vpop.permute.xlu2 %4409 }
 0x59b   :  { %v4026_v47 = vpack.c.bf16 %v3948_v45, %v3948_v45  ;;  %v5641_v49 = vpop.eup %5640  ;;  %v4474_v60 = vmul.f32 %v8535_v1, %v4330_v55  ;;  %v4335_v18 = vunpack.c.l.bf16 %v4265_v36  ;;  %v4336_v15 = vunpack.c.h.bf16 %v4265_v36 }
 0x59c   :  { %v4475_v22 = vmul.f32 %v8535_v1, %v4331_v24  ;;  %5644 = vtanh.f32 %v4148_v56  ;;  %v4476_v10 = vmul.f32 %v8535_v1, %v4332_v61  ;;  %v4337_v11 = vunpack.c.l.bf16 %v8550_v27 }
 0x59d   :  { %v5643_v34 = vpop.eup %5642  ;;  %v4076_v21 = vunpack.c.l.bf16 %v4026_v47  ;;  %v4513_v44 = vadd.f32 %v4512_v41, %v4474_v60  ;;  %v4479_v51 = vmul.f32 %v8546_v46, %v4335_v18  ;;  %5646 = vtanh.f32 %v4149_v63 }
 0x59e   :  { %v4534_v2 = vadd.f32 %v4533_v52, %v4475_v22  ;;  %v4555_v33 = vadd.f32 %v4554_v30, %v4476_v10  ;;  %v4480_v62 = vmul.f32 %v8546_v46, %v4336_v15  ;;  %5648 = vtanh.f32 %v4150_v53  ;;  %v9047_v30 = vld [vmem:[#allocation29_spill] sm:$0xff] }
 0x59f   :  { %v4481_v40 = vmul.f32 %v8546_v46, %v4337_v11  ;;  %v4514_v56 = vadd.f32 %v4513_v44, %v4479_v51  ;;  %v4268_v13 = vpack.c.bf16 %v8428_v5, %v8422_v0  ;;  %v8567_v41 = vpack.c.bf16 %v8453_v42, %v8444_v3 }
 0x5a0   :  { %v4535_v31 = vadd.f32 %v4534_v2, %v4480_v62  ;;  %v3677_v52 = vpack.c.bf16 %v8520_v12, %v8520_v12  ;;  %v4271_v32 = vpack.c.bf16 %v8489_v39, %v8486_v50  ;;  %5650 = vtanh.f32 %v4076_v21  ;;  %v8580_v12 = vpop.permute.xlu0 %4413  ;;  %v3639_v10 = vpop.f32.mrf.mxu3 }
 0x5a1   :  { %v4340_v45 = vunpack.c.l.bf16 %v4268_v13  ;;  %v4341_v20 = vunpack.c.h.bf16 %v4268_v13  ;;  %v4556_v63 = vadd.f32 %v4555_v33, %v4481_v40  ;;  %v4342_v0 = vunpack.c.l.bf16 %v8567_v41  ;;  %v8592_v40 = vpop.permute.xlu1 %4417 }
 0x5a2   :  { %v5645_v36 = vpop.eup %5644  ;;  %v3857_v5 = vunpack.c.l.bf16 %v3677_v52  ;;  %v8576_v53 = vpack.c.bf16 %v8524_v4, %v8522_v59  ;;  %v4345_v55 = vunpack.c.l.bf16 %v4271_v32  ;;  %v4346_v50 = vunpack.c.h.bf16 %v4271_v32 }
 0x5a3   :  { %v4484_v3 = vmul.f32 %v8563_v23, %v4340_v45  ;;  %v4485_v42 = vmul.f32 %v8563_v23, %v4341_v20  ;;  %v5647_v39 = vpop.eup %5646  ;;  %v4486_v24 = vmul.f32 %v8563_v23, %v4342_v0  ;;  %v4274_v51 = vpack.c.bf16 %v8543_v57, %v8526_v14 }
 0x5a4   :  { %v3953_v47 = vadd.f32 %v9047_v30, %v3857_v5  ;;  %v4347_v61 = vunpack.c.l.bf16 %v8576_v53  ;;  %v5649_v60 = vpop.eup %5648  ;;  %v4489_v15 = vmul.f32 %v8580_v12, %v4345_v55  ;;  %v4490_v21 = vmul.f32 %v8580_v12, %v4346_v50 }
 0x5a5   :  { %v4515_v22 = vadd.f32 %v4514_v56, %v4484_v3  ;;  %v4536_v18 = vadd.f32 %v4535_v31, %v4485_v42  ;;  %v4557_v59 = vadd.f32 %v4556_v63, %v4486_v24  ;;  %v8590_v33 = vpack.c.bf16 %v5641_v49, %v5639_v6  ;;  %v8600_v6 = vpop.permute.xlu2 %4421 }
 0x5a6   :  { %v4029_v4 = vpack.c.bf16 %v3953_v47, %v3953_v47  ;;  %v5651_v11 = vpop.eup %5650  ;;  %v4491_v44 = vmul.f32 %v8580_v12, %v4347_v61  ;;  %v4350_v31 = vunpack.c.l.bf16 %v4274_v51  ;;  %v4351_v52 = vunpack.c.h.bf16 %v4274_v51  ;;  %v9049_v51 = vld [vmem:[#allocation25_spill] sm:$0xff] }
 0x5a7   :  { %v4516_v62 = vadd.f32 %v4515_v22, %v4489_v15  ;;  %v4537_v56 = vadd.f32 %v4536_v18, %v4490_v21  ;;  %v4352_v32 = vunpack.c.l.bf16 %v8590_v33  ;;  %v4234_v45 = vpack.c.bf16 %v5651_v11, %v5651_v11  ;;  %v9048_v11 = vld [vmem:[#allocation41_spill] sm:$0xff] }
 0x5a8   :  { %v4081_v2 = vunpack.c.l.bf16 %v4029_v4  ;;  %v4558_v13 = vadd.f32 %v4557_v59, %v4491_v44  ;;  %v4277_v20 = vpack.c.bf16 %v5645_v36, %v5643_v34  ;;  %v8595_v63 = vpack.c.bf16 %v5649_v60, %v5647_v39  ;;  %v3642_v36 = vpop.f32.mrf.mxu3 }
 0x5a9   :  { %v4494_v0 = vmul.f32 %v8592_v40, %v4350_v31  ;;  %v4495_v14 = vmul.f32 %v8592_v40, %v4351_v52  ;;  %v4496_v57 = vmul.f32 %v8592_v40, %v4352_v32  ;;  %v3680_v49 = vpack.c.bf16 %v8556_v9, %v8556_v9  ;;  %v9050_v52 = vld [vmem:[#allocation36_spill] sm:$0xff] }
 0x5aa   :  { %5652 = vtanh.f32 %v4081_v2  ;;  %v4355_v5 = vunpack.c.l.bf16 %v4277_v20  ;;  %v4356_v3 = vunpack.c.h.bf16 %v4277_v20  ;;  %v4357_v42 = vunpack.c.l.bf16 %v8595_v63 }
 0x5ab   :  { %v4517_v55 = vadd.f32 %v4516_v62, %v4494_v0  ;;  %v4538_v50 = vadd.f32 %v4537_v56, %v4495_v14  ;;  %v4559_v34 = vadd.f32 %v4558_v13, %v4496_v57  ;;  %v4284_v39 = vunpack.c.l.bf16 %v4234_v45  ;;  %v9051_v45 = vld [vmem:[#allocation31_spill] sm:$0xff] }
 0x5ac   :  { %v4499_v24 = vmul.f32 %v8600_v6, %v4355_v5  ;;  %v4500_v30 = vmul.f32 %v8600_v6, %v4356_v3  ;;  %v4501_v47 = vmul.f32 %v8600_v6, %v4357_v42  ;;  %v3862_v60 = vunpack.c.l.bf16 %v3680_v49 }
 0x5ad   :  { %v3683_v22 = vpack.c.bf16 %v3639_v10, %v3639_v10  ;;  %v3686_v18 = vpack.c.bf16 %v3642_v36, %v3642_v36  ;;  %v4428_v62 = vmul.f32 %v9049_v51, %v4284_v39  ;;  %v9052_v10 = vld [vmem:[#allocation21_spill] sm:$0xff] }
 0x5ae   :  { %v4518_v59 = vadd.f32 %v4517_v55, %v4499_v24  ;;  %v4539_v4 = vadd.f32 %v4538_v50, %v4500_v30  ;;  %v4560_v15 = vadd.f32 %v4559_v34, %v4501_v47  ;;  %v3958_v21 = vadd.f32 %v9048_v11, %v3862_v60 }
 0x5af   :  { %v3867_v44 = vunpack.c.l.bf16 %v3683_v22  ;;  %v3872_v2 = vunpack.c.l.bf16 %v3686_v18  ;;  %v4589_v42 = vsel %vm4588_vm0, %v4428_v62, 0.0 }
 0x5b0   :  { %v5653_v61 = vpop.eup %5652  ;;  %v4540_v13 = vrot.slane %v4539_v4, 4  ;;  %v4032_v31 = vpack.c.bf16 %v3958_v21, %v3958_v21  ;;  %v4561_v14 = vrot.slane %v4560_v15, 4  ;;  %v8613_v3 = vpop.f32.mrf.mxu3  ;;  %v4519_v30 = vrot.slane %v4518_v59, 4 }
 0x5b1   :  { %v4237_v9 = vpack.c.bf16 %v5653_v61, %v5653_v61  ;;  %v3963_v32 = vadd.f32 %v9050_v52, %v3867_v44  ;;  %v3968_v20 = vadd.f32 %v9051_v45, %v3872_v2  ;;  %v9053_v45 = vld [vmem:[#allocation23_spill] sm:$0xff] }
 0x5b2   :  { %v4086_v57 = vunpack.c.l.bf16 %v4032_v31  ;;  %v4541_v34 = vadd.f32 %v4540_v13, %v4539_v4  ;;  %v4562_v39 = vadd.f32 %v4561_v14, %v4560_v15  ;;  %v4520_v22 = vadd.f32 %v4519_v30, %v4518_v59  ;;  %v9054_v14 = vld [vmem:[#allocation20_spill] sm:$0xff] }
 0x5b3   :  { %v4289_v56 = vunpack.c.l.bf16 %v4237_v9  ;;  %v4035_v49 = vpack.c.bf16 %v3963_v32, %v3963_v32  ;;  %v4038_v5 = vpack.c.bf16 %v3968_v20, %v3968_v20 }
 0x5b4   :  { %5654 = vtanh.f32 %v4086_v57  ;;  %v4542_v47 = vrot.slane %v4541_v34, 2  ;;  %v4563_v61 = vrot.slane %v4562_v39, 2  ;;  %v4521_v4 = vrot.slane %v4520_v22, 2 }
 0x5b5   :  { %v4433_v0 = vmul.f32 %v9052_v10, %v4289_v56  ;;  %v4091_v36 = vunpack.c.l.bf16 %v4035_v49  ;;  %v4096_v24 = vunpack.c.l.bf16 %v4038_v5 }
 0x5b6   :  { %v4543_v21 = vadd.f32 %v4542_v47, %v4541_v34  ;;  %v4564_v62 = vadd.f32 %v4563_v61, %v4562_v39 }
 0x5b7   :  { %v4590_v55 = vsel %vm4588_vm0, %v4433_v0, 0.0  ;;  %5656 = vtanh.f32 %v4091_v36  ;;  %v4522_v0 = vadd.f32 %v4521_v4, %v4520_v22 }
 0x5b8   :  { %v4591_v50 = vadd.f32 %v4590_v55, %v4589_v42  ;;  %5658 = vtanh.f32 %v4096_v24  ;;  %v3647_v18 = vpop.f32.mrf.mxu3  ;;  %v4544_v31 = vrot.slane %v4543_v21, 1  ;;  %v4565_v59 = vrot.slane %v4564_v62, 1 }
 0x5b9   :  { %v4523_v39 = vrot.slane %v4522_v0, 1  ;;  %v3692_v4 = vpack.c.bf16 %v3647_v18, %v3647_v18  ;;  %v9056_v18 = vld [vmem:[#allocation40_spill] sm:$0xff] }
 0x5ba   :  { %v5655_v60 = vpop.eup %5654  ;;  %v4545_v55 = vadd.f32 %v4544_v31, %v4543_v21  ;;  %v4566_v36 = vadd.f32 %v4565_v59, %v4564_v62  ;;  %v4318_v59 = vunpack.c.h.bf16 %v8482_v29 }
 0x5bb   :  { %v4240_v9 = vpack.c.bf16 %v5655_v60, %v5655_v60  ;;  %v4524_v47 = vadd.f32 %v4523_v39, %v4522_v0 }
 0x5bd   :  { %v5657_v11 = vpop.eup %5656  ;;  %v4294_v2 = vunpack.c.l.bf16 %v4240_v9 }
 0x5be   :  { %v5659_v44 = vpop.eup %5658  ;;  %v4243_v51 = vpack.c.bf16 %v5657_v11, %v5657_v11 }
 0x5bf   :  { %v4246_v56 = vpack.c.bf16 %v5659_v44, %v5659_v44  ;;  %v4438_v15 = vmul.f32 %v8411_v7, %v4294_v2  ;;  %v8623_v7 = vpop.permute.xlu0 %4627  ;;  %v4308_v2 = vunpack.c.h.bf16 %v8441_v54  ;;  %v9055_v54 = vld [vmem:[#allocation34_spill] sm:$0xff] }
 0x5c0   :  { %v4299_v13 = vunpack.c.l.bf16 %v4243_v51  ;;  %v3649_v49 = vpop.f32.mrf.mxu3  ;;  %v4631_v30 = vadd.f32 %v8623_v7, %v4545_v55  ;;  %v4630_v9 = vadd.f32 %v8623_v7, %v4524_v47  ;;  %v3689_v51 = vpack.c.bf16 %v8613_v3, %v8613_v3 }
 0x5c1   :  { %v4304_v52 = vunpack.c.l.bf16 %v4246_v56  ;;  %v4592_v32 = vsel %vm4588_vm0, %v4438_v15, 0.0  ;;  %v4452_v56 = vmul.f32 %v8437_v17, %v4308_v2  ;;  %v4313_v15 = vunpack.c.h.bf16 %v8460_v38 }
 0x5c2   :  { %v4443_v20 = vmul.f32 %v9053_v45, %v4299_v13  ;;  %v4593_v10 = vadd.f32 %v4592_v32, %v4591_v50  ;;  %v4632_v50 = vadd.f32 %v8623_v7, %v4566_v36  ;;  %v4640_v60 = vrot.slane %v4631_v30, 7 }
 0x5c3   :  { %v4448_v57 = vmul.f32 %v9054_v14, %v4304_v52  ;;  %v3877_v13 = vunpack.c.l.bf16 %v3689_v51  ;;  %v3695_v31 = vpack.c.bf16 %v3649_v49, %v3649_v49  ;;  %v3882_v52 = vunpack.c.l.bf16 %v3692_v4  ;;  %v9059_v51 = vld [vmem:[#allocation32_spill] sm:$0xff] }
 0x5c4   :  { %v4594_v5 = vsel %vm4588_vm0, %v4443_v20, 0.0  ;;  %v4641_v22 = vrot.slane %v4632_v50, 6  ;;  %v4645_v11 = vsel %vm4644_vm1, %v4630_v9, %v4640_v60  ;;  %v4571_v45 = vadd.f32 %v8451_v48, %v4452_v56  ;;  %v9057_v48 = vld [vmem:[#allocation42_spill] sm:$0xff]  ;;  %v9058_v50 = vld [vmem:[#allocation33_spill] sm:$0xff] }
 0x5c5   :  { %v4595_v42 = vadd.f32 %v4594_v5, %v4593_v10  ;;  %v4596_v34 = vsel %vm4588_vm0, %v4448_v57, 0.0  ;;  %v4457_v20 = vmul.f32 %v8468_v16, %v4313_v15  ;;  %v3973_v10 = vadd.f32 %v9055_v54, %v3877_v13  ;;  %v9060_v13 = vld [vmem:[#allocation47_spill] sm:$0xff] }
 0x5c6   :  { %v8630_v21 = vsel %vm4646_vm2, %v4645_v11, %v4641_v22  ;;  %v3887_v3 = vunpack.c.l.bf16 %v3695_v31  ;;  %v3978_v57 = vadd.f32 %v9056_v18, %v3882_v52  ;;  %v4462_v49 = vmul.f32 %v8477_v28, %v4318_v59  ;;  %v9061_v54 = vld [vmem:[#allocation11_spill] sm:$0xff] }
 0x5c7   :  { %v8625_v24 = vadd.f32 %v4596_v34, %v4595_v42  ;;  %v4572_v38 = vadd.f32 %v4571_v45, %v4457_v20  ;;  %v4323_v55 = vunpack.c.h.bf16 %v8500_v43  ;;  %v4041_v34 = vpack.c.bf16 %v3973_v10, %v3973_v10 }
 0x5c8   :  { %v3652_v61 = vpop.f32.mrf.mxu3  ;;  %v3983_v36 = vadd.f32 %v9057_v48, %v3887_v3  ;;  %v4044_v29 = vpack.c.bf16 %v3978_v57, %v3978_v57  ;;  %v4328_v9 = vunpack.c.h.bf16 %v8511_v8  ;;  %v4333_v20 = vunpack.c.h.bf16 %v8539_v26 }
 0x5c9   :  { %v3698_v32 = vpack.c.bf16 %v3652_v61, %v3652_v61  ;;  %v4573_v60 = vadd.f32 %v4572_v38, %v4462_v49  ;;  %v4467_v22 = vmul.f32 %v8502_v25, %v4323_v55  ;;  %v4101_v11 = vunpack.c.l.bf16 %v4041_v34 }
 0x5ca   :  { %v4047_v2 = vpack.c.bf16 %v3983_v36, %v3983_v36  ;;  %v4106_v56 = vunpack.c.l.bf16 %v4044_v29  ;;  %v4472_v45 = vmul.f32 %v8516_v19, %v4328_v9 }
 0x5cb   :  { %v3892_v5 = vunpack.c.l.bf16 %v3698_v32  ;;  %v4574_v32 = vadd.f32 %v4573_v60, %v4467_v22  ;;  %5660 = vtanh.f32 %v4101_v11 }
 0x5cc   :  { %v4111_v59 = vunpack.c.l.bf16 %v4047_v2  ;;  %5662 = vtanh.f32 %v4106_v56 }
 0x5cd   :  { %v3988_v47 = vadd.f32 %v9058_v50, %v3892_v5  ;;  %v4575_v57 = vadd.f32 %v4574_v32, %v4472_v45  ;;  %v4477_v5 = vmul.f32 %v8535_v1, %v4333_v20  ;;  %v4343_v50 = vunpack.c.h.bf16 %v8567_v41 }
 0x5ce   :  { %5664 = vtanh.f32 %v4111_v59 }
 0x5cf   :  { %v4050_v15 = vpack.c.bf16 %v3988_v47, %v3988_v47  ;;  %v4487_v2 = vmul.f32 %v8563_v23, %v4343_v50 }
 0x5d0   :  { %v3654_v44 = vpop.f32.mrf.mxu3 }
 0x5d1   :  { %v3701_v14 = vpack.c.bf16 %v3654_v44, %v3654_v44  ;;  %v5661_v34 = vpop.eup %5660 }
 0x5d2   :  { %v5663_v47 = vpop.eup %5662  ;;  %v4249_v60 = vpack.c.bf16 %v5661_v34, %v5661_v34 }
 0x5d3   :  { %v3897_v39 = vunpack.c.l.bf16 %v3701_v14  ;;  %v9062_v14 = vld [vmem:[#allocation22_spill] sm:$0xff] }
 0x5d4   :  { %v5665_v22 = vpop.eup %5664 }
 0x5d8   :  { %v3657_v62 = vpop.f32.mrf.mxu3 }
 0x5d9   :  { %v3704_v42 = vpack.c.bf16 %v3657_v62, %v3657_v62  ;;  %v3993_v62 = vadd.f32 %v9059_v51, %v3897_v39  ;;  %v4348_v51 = vunpack.c.h.bf16 %v8576_v53 }
 0x5db   :  { %v3902_v61 = vunpack.c.l.bf16 %v3704_v42  ;;  %v4053_v8 = vpack.c.bf16 %v3993_v62, %v3993_v62  ;;  %v4338_v42 = vunpack.c.h.bf16 %v8550_v27  ;;  %v4252_v62 = vpack.c.bf16 %v5663_v47, %v5663_v47 }
 0x5dc   :  { %v4492_v32 = vmul.f32 %v8580_v12, %v4348_v51 }
 0x5dd   :  { %v3998_v31 = vadd.f32 %v9060_v13, %v3902_v61  ;;  %v4121_v49 = vunpack.c.l.bf16 %v4053_v8  ;;  %v4482_v29 = vmul.f32 %v8546_v46, %v4338_v42  ;;  %v4255_v13 = vpack.c.bf16 %v5665_v22, %v5665_v22 }
 0x5de   :  { %v4314_v45 = vunpack.c.l.bf16 %v4252_v62  ;;  %v4353_v8 = vunpack.c.h.bf16 %v8590_v33  ;;  %v4358_v33 = vunpack.c.h.bf16 %v8595_v63 }
 0x5df   :  { %v4056_v3 = vpack.c.bf16 %v3998_v31, %v3998_v31 }
 0x5e0   :  { %v3659_v0 = vpop.f32.mrf.mxu3  ;;  %v4502_v63 = vmul.f32 %v8600_v6, %v4358_v33 }
 0x5e1   :  { %v3707_v30 = vpack.c.bf16 %v3659_v0, %v3659_v0  ;;  %v4116_v0 = vunpack.c.l.bf16 %v4050_v15  ;;  %v4126_v48 = vunpack.c.l.bf16 %v4056_v3  ;;  %v4309_v15 = vunpack.c.l.bf16 %v4249_v60 }
 0x5e3   :  { %v3907_v43 = vunpack.c.l.bf16 %v3707_v30  ;;  %5666 = vtanh.f32 %v4116_v0  ;;  %v4576_v30 = vadd.f32 %v4575_v57, %v4477_v5  ;;  %v4458_v57 = vmul.f32 %v8468_v16, %v4314_v45 }
 0x5e4   :  { %5668 = vtanh.f32 %v4121_v49 }
 0x5e5   :  { %v4003_v10 = vadd.f32 %v9061_v54, %v3907_v43  ;;  %5670 = vtanh.f32 %v4126_v48  ;;  %v4453_v54 = vmul.f32 %v8437_v17, %v4309_v15  ;;  %v4600_v16 = vsel %vm4588_vm0, %v4458_v57, 0.0 }
 0x5e7   :  { %v4059_v55 = vpack.c.bf16 %v4003_v10, %v4003_v10  ;;  %v4319_v10 = vunpack.c.l.bf16 %v4255_v13 }
 0x5e8   :  { %v3662_v44 = vpop.f32.mrf.mxu3 }
 0x5e9   :  { %v3710_v4 = vpack.c.bf16 %v3662_v44, %v3662_v44  ;;  %v4131_v61 = vunpack.c.l.bf16 %v4059_v55  ;;  %v4577_v44 = vadd.f32 %v4576_v30, %v4482_v29  ;;  %v4497_v55 = vmul.f32 %v8592_v40, %v4353_v8 }
 0x5ea   :  { %v4463_v17 = vmul.f32 %v8477_v28, %v4319_v10 }
 0x5eb   :  { %v3912_v52 = vunpack.c.l.bf16 %v3710_v4  ;;  %v5667_v4 = vpop.eup %5666  ;;  %5672 = vtanh.f32 %v4131_v61 }
 0x5ec   :  { %v5669_v31 = vpop.eup %5668  ;;  %v4258_v20 = vpack.c.bf16 %v5667_v4, %v5667_v4  ;;  %v4602_v28 = vsel %vm4588_vm0, %v4463_v17, 0.0 }
 0x5ed   :  { %v4008_v18 = vadd.f32 %v9062_v14, %v3912_v52  ;;  %v4578_v52 = vadd.f32 %v4577_v44, %v4487_v2  ;;  %v5671_v59 = vpop.eup %5670  ;;  %v4261_v0 = vpack.c.bf16 %v5669_v31, %v5669_v31 }
 0x5ee   :  { %v4324_v5 = vunpack.c.l.bf16 %v4258_v20  ;;  %v4264_v42 = vpack.c.bf16 %v5671_v59, %v5671_v59 }
 0x5ef   :  { %v4062_v36 = vpack.c.bf16 %v4008_v18, %v4008_v18  ;;  %v4579_v18 = vadd.f32 %v4578_v52, %v4492_v32  ;;  %v4329_v48 = vunpack.c.l.bf16 %v4261_v0 }
 0x5f0   :  { %v3664_v38 = vpop.f32.mrf.mxu3  ;;  %v4468_v29 = vmul.f32 %v8502_v25, %v4324_v5  ;;  %v4334_v50 = vunpack.c.l.bf16 %v4264_v42 }
 0x5f1   :  { %v3713_v26 = vpack.c.bf16 %v3664_v38, %v3664_v38  ;;  %v4136_v9 = vunpack.c.l.bf16 %v4062_v36  ;;  %v5673_v3 = vpop.eup %5672  ;;  %v4580_v61 = vadd.f32 %v4579_v18, %v4497_v55  ;;  %v4473_v22 = vmul.f32 %v8516_v19, %v4329_v48 }
 0x5f2   :  { %v4267_v36 = vpack.c.bf16 %v5673_v3, %v5673_v3  ;;  %v4604_v51 = vsel %vm4588_vm0, %v4468_v29, 0.0  ;;  %v4478_v25 = vmul.f32 %v8535_v1, %v4334_v50 }
 0x5f3   :  { %v3917_v39 = vunpack.c.l.bf16 %v3713_v26  ;;  %5674 = vtanh.f32 %v4136_v9  ;;  %v4581_v4 = vadd.f32 %v4580_v61, %v4502_v63 }
 0x5f4   :  { %v4339_v9 = vunpack.c.l.bf16 %v4267_v36  ;;  %v4608_v31 = vsel %vm4588_vm0, %v4478_v25, 0.0 }
 0x5f5   :  { %v4013_v27 = vadd.f32 %v8376_v37, %v3917_v39  ;;  %v4582_v32 = vrot.slane %v4581_v4, 4 }
 0x5f7   :  { %v4065_v11 = vpack.c.bf16 %v4013_v27, %v4013_v27 }
 0x5f8   :  { %v3667_v43 = vpop.f32.mrf.mxu3 }
 0x5f9   :  { %v4141_v41 = vunpack.c.l.bf16 %v4065_v11  ;;  %v3716_v56 = vpack.c.bf16 %v3667_v43, %v3667_v43  ;;  %v5675_v49 = vpop.eup %5674 }
 0x5fa   :  { %v4270_v47 = vpack.c.bf16 %v5675_v49, %v5675_v49 }
 0x5fb   :  { %v3922_v37 = vunpack.c.l.bf16 %v3716_v56  ;;  %5676 = vtanh.f32 %v4141_v41 }
 0x5fc   :  { %v4344_v62 = vunpack.c.l.bf16 %v4270_v47 }
 0x5fd   :  { %v4018_v53 = vadd.f32 %v8389_v35, %v3922_v37  ;;  %v4598_v35 = vsel %vm4588_vm0, %v4453_v54, 0.0  ;;  %v4583_v54 = vadd.f32 %v4582_v32, %v4581_v4 }
 0x5fe   :  { %v4599_v27 = vadd.f32 %v4598_v35, %v8625_v24  ;;  %v4606_v24 = vsel %vm4588_vm0, %v4473_v22, 0.0  ;;  %v4488_v37 = vmul.f32 %v8563_v23, %v4344_v62 }
 0x5ff   :  { %v4068_v14 = vpack.c.bf16 %v4018_v53, %v4018_v53  ;;  %v4584_v57 = vrot.slane %v4583_v54, 2 }
 0x600   :  { %v3669_v38 = vpop.f32.mrf.mxu3  ;;  %v4601_v44 = vadd.f32 %v4600_v16, %v4599_v27  ;;  %v4612_v8 = vsel %vm4588_vm0, %v4488_v37, 0.0 }
 0x601   :  { %v4146_v26 = vunpack.c.l.bf16 %v4068_v14  ;;  %v3719_v34 = vpack.c.bf16 %v3669_v38, %v3669_v38  ;;  %v5677_v39 = vpop.eup %5676  ;;  %v4585_v49 = vadd.f32 %v4584_v57, %v4583_v54 }
 0x602   :  { %v4273_v11 = vpack.c.bf16 %v5677_v39, %v5677_v39  ;;  %v4603_v41 = vadd.f32 %v4602_v28, %v4601_v44 }
 0x603   :  { %5678 = vtanh.f32 %v4146_v26  ;;  %v3927_v30 = vunpack.c.l.bf16 %v3719_v34  ;;  %v4586_v33 = vrot.slane %v4585_v49, 1 }
 0x604   :  { %v4349_v15 = vunpack.c.l.bf16 %v4273_v11  ;;  %v4605_v19 = vadd.f32 %v4604_v51, %v4603_v41 }
 0x605   :  { %v4023_v60 = vadd.f32 %v8465_v58, %v3927_v30  ;;  %v4483_v58 = vmul.f32 %v8546_v46, %v4339_v9  ;;  %v4587_v35 = vadd.f32 %v4586_v33, %v4585_v49  ;;  %v4653_v30 = vlaneseq }
 0x606   :  { %v4607_v1 = vadd.f32 %v4606_v24, %v4605_v19  ;;  %v4493_v20 = vmul.f32 %v8580_v12, %v4349_v15 }
 0x607   :  { %v4071_v2 = vpack.c.bf16 %v4023_v60, %v4023_v60  ;;  %v4610_v45 = vsel %vm4588_vm0, %v4483_v58, 0.0  ;;  %v4633_v36 = vadd.f32 %v8623_v7, %v4587_v35  ;;  %vm4655_vm5 = vcmp.lt.s32.totalorder %v4653_v30, 600 }
 0x608   :  { %v4609_v59 = vadd.f32 %v4608_v31, %v4607_v1  ;;  %v4614_v0 = vsel %vm4588_vm0, %v4493_v20, 0.0 }
 0x609   :  { %v5679_v43 = vpop.eup %5678  ;;  %v4151_v56 = vunpack.c.l.bf16 %v4071_v2 }
 0x60a   :  { %v4276_v13 = vpack.c.bf16 %v5679_v43, %v5679_v43  ;;  %v4611_v10 = vadd.f32 %v4610_v45, %v4609_v59 }
 0x60b   :  { %5680 = vtanh.f32 %v4151_v56 }
 0x60c   :  { %v4354_v52 = vunpack.c.l.bf16 %v4276_v13  ;;  %v4613_v14 = vadd.f32 %v4612_v8, %v4611_v10 }
 0x60e   :  { %v4498_v46 = vmul.f32 %v8592_v40, %v4354_v52  ;;  %v4615_v5 = vadd.f32 %v4614_v0, %v4613_v14 }
 0x610   :  { %v4616_v23 = vsel %vm4588_vm0, %v4498_v46, 0.0 }
 0x611   :  { %v5681_v53 = vpop.eup %5680  ;;  %v4617_v12 = vadd.f32 %v4616_v23, %v4615_v5 }
 0x612   :  { %v4279_v3 = vpack.c.bf16 %v5681_v53, %v5681_v53 }
 0x614   :  { %v4359_v18 = vunpack.c.l.bf16 %v4279_v3 }
 0x616   :  { %v4503_v42 = vmul.f32 %v8600_v6, %v4359_v18  ;;  %v4642_v6 = vrot.slane %v4633_v36, 5 }
 0x618   :  { %v4618_v38 = vsel %vm4588_vm0, %v4503_v42, 0.0 }
 0x619   :  { %v4619_v55 = vadd.f32 %v4618_v38, %v4617_v12 }
 0x61b   :  { %v4620_v40 = vrot.slane %v4619_v55, 4 }
 0x61d   :  { %v4621_v26 = vadd.f32 %v4620_v40, %v4619_v55 }
 0x61f   :  { %v4622_v34 = vrot.slane %v4621_v26, 2 }
 0x621   :  { %v4623_v17 = vadd.f32 %v4622_v34, %v4621_v26 }
 0x623   :  { %v4624_v48 = vrot.slane %v4623_v17, 1 }
 0x625   :  { %v4625_v39 = vadd.f32 %v4624_v48, %v4623_v17 }
 0x627   :  { %v4634_v16 = vadd.f32 %v8623_v7, %v4625_v39 }
 0x629   :  { %v4643_v29 = vrot.slane %v4634_v16, 4 }
 0x62b   :  { %v4649_v50 = vsel %vm4648_vm3, %v4642_v6, %v4643_v29 }
 0x62c   :  { %v4651_v47 = vsel %vm4650_vm4, %v8630_v21, %v4649_v50 }
 0x62d   :  { %4657 = vst.msk [vmem:[#allocation7] sm:$0x1f] %vm4655_vm5, %v4651_v47 }
 0x62e   :  { %4668 = dma.vmem_to_hbm [thread:$0]  %s4664_s5, 80, %s4666_s11, [#allocation4]  }
 0x62f   :  { %5781 = dma.done.wait [#allocation4], 80  }
 0x630   :  { %5782 = vsyncadd [#allocation4], 4294967216 }
 0x631   :  { %4673 = vsyncpa [#allocation3], 1 }
 0x632   :  { %4674 = vsyncpa [#allocation6], 1 }
 0x633   :  { %4675 = vsyncpa [#allocation4], 1 }

</bundles_post_ra>
